<compile_context>
chip_gen: v7x
topology: tpu7x:2x2x1
jax: 0.10.0
libtpu: 0.0.40
codegen_flags: <defaults>
</compile_context>

<pallas_src>
import functools

import jax
import jax.numpy as jnp
from jax import lax
from jax.experimental import pallas as pl
from jax.experimental.pallas import tpu as pltpu


# ----------------------------------------------------------------------------
# Fused per-image kernel: upsample + 4 convs + GELU, all intermediates in VMEM.
# ----------------------------------------------------------------------------
def _fused_layer_kernel(x_ref, y_ref, last_ref, mask_ref, ah_ref, awt_ref,
                        wa_ref, ba_ref, wb_ref, bb_ref, wc_ref, bc_ref,
                        wd_ref, bd_ref, out_ref, patch_ref, *, H, W):
    f32 = jnp.float32
    mask = mask_ref[...]                      # (9, H*W) f32, 1.0 = in-bounds tap

    def conv3x3(w_r, b_r, sources, apply_gelu=False):
        """Weight-stationary 3x3 conv over (virtually) concatenated sources.

        sources: list of (Cin_s, H*W) f32 slabs.  Builds the im2col patch slab
        (9 * sum Cin_s, H*W) in the bf16 VMEM scratch (row order: tap-major,
        then source, then cin -- must match _make_conv_lhs) and runs ONE long-K
        MXU dot with H*W (>=128) on the lane axis.  Bias/GELU epilogue in f32.
        """
        r = 0
        for dy in range(3):
            for dx in range(3):
                off = (dy - 1) * W + (dx - 1)
                tap = 3 * dy + dx
                for s in sources:
                    cin = s.shape[0]
                    if off == 0:
                        sh = s                         # center tap: no shift/mask
                    else:
                        # shifted[c, p] = s[c, p + off] if (h, w) in-bounds else 0
                        # (wrapped lanes from the roll land only at masked spots)
                        sh = jnp.roll(s, -off, axis=-1) * mask[tap:tap + 1, :]
                    patch_ref[r:r + cin, :] = sh.astype(jnp.bfloat16)
                    r += cin
        acc = jnp.dot(w_r[...], patch_ref[0:r, :],
                      preferred_element_type=f32)      # (Cout, H*W), f32 acc
        acc = acc + b_r[...]                           # bias (Cout, 1) broadcast
        if apply_gelu:                                 # exact GELU (erf), f32 VPU/EUP
            acc = 0.5 * acc * (1.0 + lax.erf(acc * 0.7071067811865476))
        return acc

    x = x_ref[0].astype(f32)                  # (C,  H*W)
    y = y_ref[0].astype(f32)                  # (C,  H*W)
    lastb = last_ref[0].astype(f32)           # (2C, h2, w2)
    c2, h2, w2 = lastb.shape

    # ---- bilinear x2 upsample (align_corners=True), separable: A_h @ L_c @ A_w^T
    # O(C*H*W*(h2+w2)) instead of the old dense kron matrix O((H*W)^2).
    ah = ah_ref[...]                          # (H, h2)
    awt = awt_ref[...]                        # (w2, W)
    up_rows = []
    for c in range(c2):
        uc = jnp.dot(jnp.dot(ah, lastb[c], preferred_element_type=f32), awt,
                     preferred_element_type=f32)                      # (H, W)
        # flatten row-major onto lanes (matches p = h*W + w convention)
        up_rows.append(jnp.concatenate([uc[h:h + 1, :] for h in range(H)],
                                       axis=1))                       # (1, H*W)
    last_up = jnp.concatenate(up_rows, axis=0)                        # (2C, H*W)

    # ---- CDM ----
    states = conv3x3(wa_ref, ba_ref, [x, y])                          # (C*num_L, H*W)
    # TODO(synk): CDM.P (BasicBlock) definition not provided -> identity passthrough.
    # TODO(synk): CDM.statetrans (StateTransformer) definition not provided -> identity.

    res = conv3x3(wb_ref, bb_ref, [x, states, y])                     # (2C, H*W)
    res = conv3x3(wc_ref, bc_ref, [res, last_up], apply_gelu=True)    # (C,  H*W)
    res = conv3x3(wd_ref, bd_ref, [res])                              # (C,  H*W)
    out_ref[0] = res.astype(out_ref.dtype)    # lane-dense (C, H*W) store


# ----------------------------------------------------------------------------
# Trace-time glue: interpolation matrices, tap masks, weight repacking.
# ----------------------------------------------------------------------------
def _interp_matrix(out_size, in_size):
    """1-D bilinear interpolation matrix, align_corners=True: (out_size, in_size)."""
    if in_size == 1:
        return jnp.ones((out_size, 1), jnp.float32)
    pos = jnp.arange(out_size, dtype=jnp.float32) * (in_size - 1) / (out_size - 1)
    lo = jnp.clip(jnp.floor(pos).astype(jnp.int32), 0, in_size - 2)
    frac = pos - lo.astype(jnp.float32)
    rows = jnp.arange(out_size)
    m = jnp.zeros((out_size, in_size), jnp.float32)
    m = m.at[rows, lo].set(1.0 - frac)
    m = m.at[rows, lo + 1].add(frac)
    return m


def _tap_masks(H, W):
    """(9, H*W) f32 validity masks for the 9 taps of a zero-padded 3x3 conv."""
    hh = jnp.arange(H).reshape(H, 1)
    ww = jnp.arange(W).reshape(1, W)
    rows = []
    for dy in range(3):
        for dx in range(3):
            valid = ((hh + dy - 1 >= 0) & (hh + dy - 1 < H) &
                     (ww + dx - 1 >= 0) & (ww + dx - 1 < W))
            rows.append(valid.reshape(H * W))
    return jnp.stack(rows, axis=0).astype(jnp.float32)


def _make_conv_lhs(w_oihw, split_sizes):
    """OIHW (Cout, Cin, 3, 3) -> bf16 (Cout, 9*Cin) weight-stationary LHS.

    Columns ordered tap-major, then source (per split_sizes along Cin), then cin,
    matching the patch-slab row order assembled inside the kernel.
    """
    srcs, start = [], 0
    for sz in split_sizes:
        srcs.append(w_oihw[:, start:start + sz])
        start += sz
    cols = []
    for dy in range(3):
        for dx in range(3):
            for ws in srcs:
                cols.append(ws[:, :, dy, dx])
    return jnp.concatenate(cols, axis=1).astype(jnp.bfloat16)


# ----------------------------------------------------------------------------
# Forward pass wrapper (single pallas_call).
# ----------------------------------------------------------------------------
def reconstruct_decoder_layer_forward(params, x, y, last):
    """
    x, y : (B, C, H, W)           NCHW, C = in_channel // 2
    last : (B, 2*C, H//2, W//2)   NCHW, half resolution
    returns (res: (B, C, H, W), decon_loss)
    """
    B, C, H, W = x.shape
    _, C2, h2, w2 = last.shape
    HW = H * W
    num_L = params["linear_trans"][0].shape[0] // C

    # weight repacking (free at trace time), bf16 for the MXU operands
    wa = _make_conv_lhs(params["linear_trans"][0], (C, C))
    wb = _make_conv_lhs(params["scale_down"][0], (C, C * num_L, C))
    wc = _make_conv_lhs(params["conv1"][0], (C2, C2))
    wd = _make_conv_lhs(params["conv2"][0], (C,))
    ba = params["linear_trans"][1].reshape(-1, 1)
    bb = params["scale_down"][1].reshape(-1, 1)
    bc = params["conv1"][1].reshape(-1, 1)
    bd = params["conv2"][1].reshape(-1, 1)
    ah = _interp_matrix(H, h2)          # (H, h2)
    awt = _interp_matrix(W, w2).T       # (w2, W)
    masks = _tap_masks(H, W)            # (9, HW)

    # free, contiguous reshapes: spatial flattened onto the lane axis (lane-dense)
    xf = x.reshape(B, C, HW)
    yf = y.reshape(B, C, HW)

    max_rows = 9 * max(2 * C, C * (num_L + 2), 2 * C2, C)
    kern = functools.partial(_fused_layer_kernel, H=H, W=W)
    const2d = lambda i: (0, 0)

    out = pl.pallas_call(
        kern,
        out_shape=jax.ShapeDtypeStruct((B, C, HW), x.dtype),
        grid=(B,),
        in_specs=[
            pl.BlockSpec((1, C, HW), lambda i: (i, 0, 0)),          # x (flat)
            pl.BlockSpec((1, C, HW), lambda i: (i, 0, 0)),          # y (flat)
            pl.BlockSpec((1, C2, h2, w2), lambda i: (i, 0, 0, 0)),  # last
            pl.BlockSpec((9, HW), const2d),                         # tap masks
            pl.BlockSpec((H, h2), const2d),                         # A_h
            pl.BlockSpec((w2, W), const2d),                         # A_w^T
            pl.BlockSpec(wa.shape, const2d), pl.BlockSpec(ba.shape, const2d),
            pl.BlockSpec(wb.shape, const2d), pl.BlockSpec(bb.shape, const2d),
            pl.BlockSpec(wc.shape, const2d), pl.BlockSpec(bc.shape, const2d),
            pl.BlockSpec(wd.shape, const2d), pl.BlockSpec(bd.shape, const2d),
        ],
        out_specs=pl.BlockSpec((1, C, HW), lambda i: (i, 0, 0)),
        scratch_shapes=[pltpu.VMEM((max_rows, HW), jnp.bfloat16)],  # im2col patches
        compiler_params=pltpu.CompilerParams(
            dimension_semantics=("parallel",)),   # B>=2 shards across v7x's 2 TCs
    )(xf, yf, last, masks, ah, awt, wa, ba, wb, bb, wc, bc, wd, bd)

    # TODO(synk): for large H*W (per-image block exceeding VMEM, esp. v7x 64 MiB),
    # tile H into row strips with a 1-row halo via the index_map.
    decon_loss = jnp.float32(0.0)
    return out.reshape(B, C, H, W), decon_loss


# ----------------------------------------------------------------------------
# Deterministic synthetic params + pure-XLA f32 reference (for self-check).
# ----------------------------------------------------------------------------
def init_params(key, in_channel, num_L):
    C = in_channel // 2

    def conv_init(k, cin, cout):
        kw, kb = jax.random.split(k)
        w = 0.1 * jax.random.normal(kw, (cout, cin, 3, 3), jnp.float32)   # OIHW
        b = 0.1 * jax.random.normal(kb, (cout,), jnp.float32)
        return w, b

    k1, k2, k3, k4 = jax.random.split(key, 4)
    return {
        "linear_trans": conv_init(k1, 2 * C, C * num_L),    # CDM.linear_trans
        "scale_down": conv_init(k2, C * (num_L + 2), 2 * C),
        "conv1": conv_init(k3, 4 * C, C),
        "conv2": conv_init(k4, C, C),
    }


def _reference_forward(params, x, y, last):
    def conv(inp, w, b):
        o = lax.conv_general_dilated(inp, w, window_strides=(1, 1), padding="SAME",
                                     dimension_numbers=("NCHW", "OIHW", "NCHW"))
        return o + b.reshape(1, -1, 1, 1)

    H, W = x.shape[2], x.shape[3]
    h2, w2 = last.shape[2], last.shape[3]
    up = jnp.einsum("Ph,bchw,Qw->bcPQ", _interp_matrix(H, h2), last,
                    _interp_matrix(W, w2))
    states = conv(jnp.concatenate([x, y], axis=1), *params["linear_trans"])
    res = conv(jnp.concatenate([x, states, y], axis=1), *params["scale_down"])
    res = conv(jnp.concatenate([res, up], axis=1), *params["conv1"])
    res = 0.5 * res * (1.0 + lax.erf(res * 0.7071067811865476))
    res = conv(res, *params["conv2"])
    return res


if __name__ == "__main__":
    in_channel, num_L, head = 8, 4, 2   # head unused (StateTransformer is a TODO identity)
    B, H, W = 2, 16, 16
    C = in_channel // 2

    key = jax.random.PRNGKey(0)
    kp, kx, ky, kl = jax.random.split(key, 4)
    params = init_params(kp, in_channel, num_L)

    x = jax.random.normal(kx, (B, C, H, W), jnp.float32)
    y = jax.random.normal(ky, (B, C, H, W), jnp.float32)
    last = jax.random.normal(kl, (B, 2 * C, H // 2, W // 2), jnp.float32)

    out, decon_loss = jax.jit(reconstruct_decoder_layer_forward)(params, x, y, last)
    out = jax.block_until_ready(out)
    assert out.shape == (B, C, H, W)
    assert bool(jnp.isfinite(out).all())

    # cross-check against the pure-XLA f32 reference (kernel uses bf16 MXU operands)
    ref = _reference_forward(params, x, y, last)
    assert float(jnp.max(jnp.abs(out - ref))) < 1e-1

    print("KERNEL_OK")
</pallas_src>

<mosaic_0001>
module attributes {stable_mosaic.version = 11 : i64} {
  func.func private @main(%arg0: i32) attributes {dimension_semantics = [#tpu.dimension_semantics<core_parallel>], iteration_bounds = array<i64: 2>, tpu.core_type = #tpu.core_type<sc_scalar_subcore>, window_params = []} {
    return
  }
}

module attributes {stable_mosaic.version = 11 : i64} {
  func.func private @main(%arg0: i32) attributes {dimension_semantics = [#tpu.dimension_semantics<core_parallel>], iteration_bounds = array<i64: 2>, tpu.core_type = #tpu.core_type<sc_scalar_subcore>, window_params = []} {
    return
  }
}

module attributes {stable_mosaic.version = 11 : i64} {
  func.func @_fused_layer_kernel(%arg0: i32, %arg1: memref<1x4x256xf32, #tpu.memory_space<vmem>>, %arg2: memref<1x4x256xf32, #tpu.memory_space<vmem>>, %arg3: memref<1x8x8x8xf32, #tpu.memory_space<vmem>>, %arg4: memref<9x256xf32, #tpu.memory_space<vmem>>, %arg5: memref<16x8xf32, #tpu.memory_space<vmem>>, %arg6: memref<8x16xf32, #tpu.memory_space<vmem>>, %arg7: memref<16x72xbf16, #tpu.memory_space<vmem>>, %arg8: memref<16x1xf32, #tpu.memory_space<vmem>>, %arg9: memref<8x216xbf16, #tpu.memory_space<vmem>>, %arg10: memref<8x1xf32, #tpu.memory_space<vmem>>, %arg11: memref<4x144xbf16, #tpu.memory_space<vmem>>, %arg12: memref<4x1xf32, #tpu.memory_space<vmem>>, %arg13: memref<4x36xbf16, #tpu.memory_space<vmem>>, %arg14: memref<4x1xf32, #tpu.memory_space<vmem>>, %arg15: memref<1x4x256xf32, #tpu.memory_space<vmem>>, %arg16: memref<216x256xbf16, #tpu.memory_space<vmem>>) attributes {dimension_semantics = [#tpu.dimension_semantics<parallel>], iteration_bounds = array<i64: 2>, scalar_prefetch = 0 : i64, scratch_operands = 1 : i64, tpu.core_type = #tpu.core_type<tc>, window_params = [{transform_indices = @transform_0, window_bounds = array<i64: 1, 4, 256>}, {transform_indices = @transform_1, window_bounds = array<i64: 1, 4, 256>}, {transform_indices = @transform_2, window_bounds = array<i64: 1, 8, 8, 8>}, {pipeline_mode = #tpu.pipeline_mode<synchronous>, transform_indices = @transform_3, window_bounds = array<i64: 9, 256>}, {pipeline_mode = #tpu.pipeline_mode<synchronous>, transform_indices = @transform_4, window_bounds = array<i64: 16, 8>}, {pipeline_mode = #tpu.pipeline_mode<synchronous>, transform_indices = @transform_5, window_bounds = array<i64: 8, 16>}, {pipeline_mode = #tpu.pipeline_mode<synchronous>, transform_indices = @transform_6, window_bounds = array<i64: 16, 72>}, {pipeline_mode = #tpu.pipeline_mode<synchronous>, transform_indices = @transform_7, window_bounds = array<i64: 16, 1>}, {pipeline_mode = #tpu.pipeline_mode<synchronous>, transform_indices = @transform_8, window_bounds = array<i64: 8, 216>}, {pipeline_mode = #tpu.pipeline_mode<synchronous>, transform_indices = @transform_9, window_bounds = array<i64: 8, 1>}, {pipeline_mode = #tpu.pipeline_mode<synchronous>, transform_indices = @transform_10, window_bounds = array<i64: 4, 144>}, {pipeline_mode = #tpu.pipeline_mode<synchronous>, transform_indices = @transform_11, window_bounds = array<i64: 4, 1>}, {pipeline_mode = #tpu.pipeline_mode<synchronous>, transform_indices = @transform_12, window_bounds = array<i64: 4, 36>}, {pipeline_mode = #tpu.pipeline_mode<synchronous>, transform_indices = @transform_13, window_bounds = array<i64: 4, 1>}, {transform_indices = @transform_14, window_bounds = array<i64: 1, 4, 256>}]} {
    %c0 = arith.constant 0 : index
    %c0_0 = arith.constant 0 : index
    %0 = vector.load %arg4[%c0, %c0_0] : memref<9x256xf32, #tpu.memory_space<vmem>>, vector<9x256xf32>
    %c0_1 = arith.constant 0 : index
    %c0_2 = arith.constant 0 : index
    %c0_3 = arith.constant 0 : index
    %1 = vector.load %arg1[%c0_1, %c0_2, %c0_3] : memref<1x4x256xf32, #tpu.memory_space<vmem>>, vector<1x4x256xf32>
    %2 = vector.shape_cast %1 : vector<1x4x256xf32> to vector<4x256xf32>
    %c0_4 = arith.constant 0 : index
    %c0_5 = arith.constant 0 : index
    %c0_6 = arith.constant 0 : index
    %3 = vector.load %arg2[%c0_4, %c0_5, %c0_6] : memref<1x4x256xf32, #tpu.memory_space<vmem>>, vector<1x4x256xf32>
    %4 = vector.shape_cast %3 : vector<1x4x256xf32> to vector<4x256xf32>
    %c0_7 = arith.constant 0 : index
    %c0_8 = arith.constant 0 : index
    %c0_9 = arith.constant 0 : index
    %c0_10 = arith.constant 0 : index
    %5 = vector.load %arg3[%c0_7, %c0_8, %c0_9, %c0_10] : memref<1x8x8x8xf32, #tpu.memory_space<vmem>>, vector<1x8x8x8xf32>
    %6 = vector.shape_cast %5 : vector<1x8x8x8xf32> to vector<8x8x8xf32>
    %c0_11 = arith.constant 0 : index
    %c0_12 = arith.constant 0 : index
    %7 = vector.load %arg5[%c0_11, %c0_12] : memref<16x8xf32, #tpu.memory_space<vmem>>, vector<16x8xf32>
    %c0_13 = arith.constant 0 : index
    %c0_14 = arith.constant 0 : index
    %8 = vector.load %arg6[%c0_13, %c0_14] : memref<8x16xf32, #tpu.memory_space<vmem>>, vector<8x16xf32>
    %9 = vector.extract_strided_slice %6 {offsets = [0, 0, 0], sizes = [1, 8, 8], strides = [1, 1, 1]} : vector<8x8x8xf32> to vector<1x8x8xf32>
    %10 = vector.shape_cast %9 : vector<1x8x8xf32> to vector<8x8xf32>
    %cst = arith.constant dense<0.000000e+00> : vector<16x8xf32>
    %11 = tpu.matmul %7, %10, %cst {dimension_numbers = #tpu.dot_dimension_numbers<[1], [0], [0], [1], [0, 0, 1, 1], [], []>} : vector<16x8xf32>, vector<8x8xf32>, vector<16x8xf32> -> vector<16x8xf32>
    %cst_15 = arith.constant dense<0.000000e+00> : vector<16x16xf32>
    %12 = tpu.matmul %11, %8, %cst_15 {dimension_numbers = #tpu.dot_dimension_numbers<[1], [0], [0], [1], [0, 0, 1, 1], [], []>} : vector<16x8xf32>, vector<8x16xf32>, vector<16x16xf32> -> vector<16x16xf32>
    %13 = vector.extract_strided_slice %12 {offsets = [0, 0], sizes = [1, 16], strides = [1, 1]} : vector<16x16xf32> to vector<1x16xf32>
    %14 = vector.extract_strided_slice %12 {offsets = [1, 0], sizes = [1, 16], strides = [1, 1]} : vector<16x16xf32> to vector<1x16xf32>
    %15 = vector.extract_strided_slice %12 {offsets = [2, 0], sizes = [1, 16], strides = [1, 1]} : vector<16x16xf32> to vector<1x16xf32>
    %16 = vector.extract_strided_slice %12 {offsets = [3, 0], sizes = [1, 16], strides = [1, 1]} : vector<16x16xf32> to vector<1x16xf32>
    %17 = vector.extract_strided_slice %12 {offsets = [4, 0], sizes = [1, 16], strides = [1, 1]} : vector<16x16xf32> to vector<1x16xf32>
    %18 = vector.extract_strided_slice %12 {offsets = [5, 0], sizes = [1, 16], strides = [1, 1]} : vector<16x16xf32> to vector<1x16xf32>
    %19 = vector.extract_strided_slice %12 {offsets = [6, 0], sizes = [1, 16], strides = [1, 1]} : vector<16x16xf32> to vector<1x16xf32>
    %20 = vector.extract_strided_slice %12 {offsets = [7, 0], sizes = [1, 16], strides = [1, 1]} : vector<16x16xf32> to vector<1x16xf32>
    %21 = vector.extract_strided_slice %12 {offsets = [8, 0], sizes = [1, 16], strides = [1, 1]} : vector<16x16xf32> to vector<1x16xf32>
    %22 = vector.extract_strided_slice %12 {offsets = [9, 0], sizes = [1, 16], strides = [1, 1]} : vector<16x16xf32> to vector<1x16xf32>
    %23 = vector.extract_strided_slice %12 {offsets = [10, 0], sizes = [1, 16], strides = [1, 1]} : vector<16x16xf32> to vector<1x16xf32>
    %24 = vector.extract_strided_slice %12 {offsets = [11, 0], sizes = [1, 16], strides = [1, 1]} : vector<16x16xf32> to vector<1x16xf32>
    %25 = vector.extract_strided_slice %12 {offsets = [12, 0], sizes = [1, 16], strides = [1, 1]} : vector<16x16xf32> to vector<1x16xf32>
    %26 = vector.extract_strided_slice %12 {offsets = [13, 0], sizes = [1, 16], strides = [1, 1]} : vector<16x16xf32> to vector<1x16xf32>
    %27 = vector.extract_strided_slice %12 {offsets = [14, 0], sizes = [1, 16], strides = [1, 1]} : vector<16x16xf32> to vector<1x16xf32>
    %28 = vector.extract_strided_slice %12 {offsets = [15, 0], sizes = [1, 16], strides = [1, 1]} : vector<16x16xf32> to vector<1x16xf32>
    %29 = tpu.concatenate %13, %14, %15, %16, %17, %18, %19, %20, %21, %22, %23, %24, %25, %26, %27, %28 in 1 : vector<1x16xf32>, vector<1x16xf32>, vector<1x16xf32>, vector<1x16xf32>, vector<1x16xf32>, vector<1x16xf32>, vector<1x16xf32>, vector<1x16xf32>, vector<1x16xf32>, vector<1x16xf32>, vector<1x16xf32>, vector<1x16xf32>, vector<1x16xf32>, vector<1x16xf32>, vector<1x16xf32>, vector<1x16xf32> -> vector<1x256xf32>
    %30 = vector.extract_strided_slice %6 {offsets = [1, 0, 0], sizes = [1, 8, 8], strides = [1, 1, 1]} : vector<8x8x8xf32> to vector<1x8x8xf32>
    %31 = vector.shape_cast %30 : vector<1x8x8xf32> to vector<8x8xf32>
    %cst_16 = arith.constant dense<0.000000e+00> : vector<16x8xf32>
    %32 = tpu.matmul %7, %31, %cst_16 {dimension_numbers = #tpu.dot_dimension_numbers<[1], [0], [0], [1], [0, 0, 1, 1], [], []>} : vector<16x8xf32>, vector<8x8xf32>, vector<16x8xf32> -> vector<16x8xf32>
    %cst_17 = arith.constant dense<0.000000e+00> : vector<16x16xf32>
    %33 = tpu.matmul %32, %8, %cst_17 {dimension_numbers = #tpu.dot_dimension_numbers<[1], [0], [0], [1], [0, 0, 1, 1], [], []>} : vector<16x8xf32>, vector<8x16xf32>, vector<16x16xf32> -> vector<16x16xf32>
    %34 = vector.extract_strided_slice %33 {offsets = [0, 0], sizes = [1, 16], strides = [1, 1]} : vector<16x16xf32> to vector<1x16xf32>
    %35 = vector.extract_strided_slice %33 {offsets = [1, 0], sizes = [1, 16], strides = [1, 1]} : vector<16x16xf32> to vector<1x16xf32>
    %36 = vector.extract_strided_slice %33 {offsets = [2, 0], sizes = [1, 16], strides = [1, 1]} : vector<16x16xf32> to vector<1x16xf32>
    %37 = vector.extract_strided_slice %33 {offsets = [3, 0], sizes = [1, 16], strides = [1, 1]} : vector<16x16xf32> to vector<1x16xf32>
    %38 = vector.extract_strided_slice %33 {offsets = [4, 0], sizes = [1, 16], strides = [1, 1]} : vector<16x16xf32> to vector<1x16xf32>
    %39 = vector.extract_strided_slice %33 {offsets = [5, 0], sizes = [1, 16], strides = [1, 1]} : vector<16x16xf32> to vector<1x16xf32>
    %40 = vector.extract_strided_slice %33 {offsets = [6, 0], sizes = [1, 16], strides = [1, 1]} : vector<16x16xf32> to vector<1x16xf32>
    %41 = vector.extract_strided_slice %33 {offsets = [7, 0], sizes = [1, 16], strides = [1, 1]} : vector<16x16xf32> to vector<1x16xf32>
    %42 = vector.extract_strided_slice %33 {offsets = [8, 0], sizes = [1, 16], strides = [1, 1]} : vector<16x16xf32> to vector<1x16xf32>
    %43 = vector.extract_strided_slice %33 {offsets = [9, 0], sizes = [1, 16], strides = [1, 1]} : vector<16x16xf32> to vector<1x16xf32>
    %44 = vector.extract_strided_slice %33 {offsets = [10, 0], sizes = [1, 16], strides = [1, 1]} : vector<16x16xf32> to vector<1x16xf32>
    %45 = vector.extract_strided_slice %33 {offsets = [11, 0], sizes = [1, 16], strides = [1, 1]} : vector<16x16xf32> to vector<1x16xf32>
    %46 = vector.extract_strided_slice %33 {offsets = [12, 0], sizes = [1, 16], strides = [1, 1]} : vector<16x16xf32> to vector<1x16xf32>
    %47 = vector.extract_strided_slice %33 {offsets = [13, 0], sizes = [1, 16], strides = [1, 1]} : vector<16x16xf32> to vector<1x16xf32>
    %48 = vector.extract_strided_slice %33 {offsets = [14, 0], sizes = [1, 16], strides = [1, 1]} : vector<16x16xf32> to vector<1x16xf32>
    %49 = vector.extract_strided_slice %33 {offsets = [15, 0], sizes = [1, 16], strides = [1, 1]} : vector<16x16xf32> to vector<1x16xf32>
    %50 = tpu.concatenate %34, %35, %36, %37, %38, %39, %40, %41, %42, %43, %44, %45, %46, %47, %48, %49 in 1 : vector<1x16xf32>, vector<1x16xf32>, vector<1x16xf32>, vector<1x16xf32>, vector<1x16xf32>, vector<1x16xf32>, vector<1x16xf32>, vector<1x16xf32>, vector<1x16xf32>, vector<1x16xf32>, vector<1x16xf32>, vector<1x16xf32>, vector<1x16xf32>, vector<1x16xf32>, vector<1x16xf32>, vector<1x16xf32> -> vector<1x256xf32>
    %51 = vector.extract_strided_slice %6 {offsets = [2, 0, 0], sizes = [1, 8, 8], strides = [1, 1, 1]} : vector<8x8x8xf32> to vector<1x8x8xf32>
    %52 = vector.shape_cast %51 : vector<1x8x8xf32> to vector<8x8xf32>
    %cst_18 = arith.constant dense<0.000000e+00> : vector<16x8xf32>
    %53 = tpu.matmul %7, %52, %cst_18 {dimension_numbers = #tpu.dot_dimension_numbers<[1], [0], [0], [1], [0, 0, 1, 1], [], []>} : vector<16x8xf32>, vector<8x8xf32>, vector<16x8xf32> -> vector<16x8xf32>
    %cst_19 = arith.constant dense<0.000000e+00> : vector<16x16xf32>
    %54 = tpu.matmul %53, %8, %cst_19 {dimension_numbers = #tpu.dot_dimension_numbers<[1], [0], [0], [1], [0, 0, 1, 1], [], []>} : vector<16x8xf32>, vector<8x16xf32>, vector<16x16xf32> -> vector<16x16xf32>
    %55 = vector.extract_strided_slice %54 {offsets = [0, 0], sizes = [1, 16], strides = [1, 1]} : vector<16x16xf32> to vector<1x16xf32>
    %56 = vector.extract_strided_slice %54 {offsets = [1, 0], sizes = [1, 16], strides = [1, 1]} : vector<16x16xf32> to vector<1x16xf32>
    %57 = vector.extract_strided_slice %54 {offsets = [2, 0], sizes = [1, 16], strides = [1, 1]} : vector<16x16xf32> to vector<1x16xf32>
    %58 = vector.extract_strided_slice %54 {offsets = [3, 0], sizes = [1, 16], strides = [1, 1]} : vector<16x16xf32> to vector<1x16xf32>
    %59 = vector.extract_strided_slice %54 {offsets = [4, 0], sizes = [1, 16], strides = [1, 1]} : vector<16x16xf32> to vector<1x16xf32>
    %60 = vector.extract_strided_slice %54 {offsets = [5, 0], sizes = [1, 16], strides = [1, 1]} : vector<16x16xf32> to vector<1x16xf32>
    %61 = vector.extract_strided_slice %54 {offsets = [6, 0], sizes = [1, 16], strides = [1, 1]} : vector<16x16xf32> to vector<1x16xf32>
    %62 = vector.extract_strided_slice %54 {offsets = [7, 0], sizes = [1, 16], strides = [1, 1]} : vector<16x16xf32> to vector<1x16xf32>
    %63 = vector.extract_strided_slice %54 {offsets = [8, 0], sizes = [1, 16], strides = [1, 1]} : vector<16x16xf32> to vector<1x16xf32>
    %64 = vector.extract_strided_slice %54 {offsets = [9, 0], sizes = [1, 16], strides = [1, 1]} : vector<16x16xf32> to vector<1x16xf32>
    %65 = vector.extract_strided_slice %54 {offsets = [10, 0], sizes = [1, 16], strides = [1, 1]} : vector<16x16xf32> to vector<1x16xf32>
    %66 = vector.extract_strided_slice %54 {offsets = [11, 0], sizes = [1, 16], strides = [1, 1]} : vector<16x16xf32> to vector<1x16xf32>
    %67 = vector.extract_strided_slice %54 {offsets = [12, 0], sizes = [1, 16], strides = [1, 1]} : vector<16x16xf32> to vector<1x16xf32>
    %68 = vector.extract_strided_slice %54 {offsets = [13, 0], sizes = [1, 16], strides = [1, 1]} : vector<16x16xf32> to vector<1x16xf32>
    %69 = vector.extract_strided_slice %54 {offsets = [14, 0], sizes = [1, 16], strides = [1, 1]} : vector<16x16xf32> to vector<1x16xf32>
    %70 = vector.extract_strided_slice %54 {offsets = [15, 0], sizes = [1, 16], strides = [1, 1]} : vector<16x16xf32> to vector<1x16xf32>
    %71 = tpu.concatenate %55, %56, %57, %58, %59, %60, %61, %62, %63, %64, %65, %66, %67, %68, %69, %70 in 1 : vector<1x16xf32>, vector<1x16xf32>, vector<1x16xf32>, vector<1x16xf32>, vector<1x16xf32>, vector<1x16xf32>, vector<1x16xf32>, vector<1x16xf32>, vector<1x16xf32>, vector<1x16xf32>, vector<1x16xf32>, vector<1x16xf32>, vector<1x16xf32>, vector<1x16xf32>, vector<1x16xf32>, vector<1x16xf32> -> vector<1x256xf32>
    %72 = vector.extract_strided_slice %6 {offsets = [3, 0, 0], sizes = [1, 8, 8], strides = [1, 1, 1]} : vector<8x8x8xf32> to vector<1x8x8xf32>
    %73 = vector.shape_cast %72 : vector<1x8x8xf32> to vector<8x8xf32>
    %cst_20 = arith.constant dense<0.000000e+00> : vector<16x8xf32>
    %74 = tpu.matmul %7, %73, %cst_20 {dimension_numbers = #tpu.dot_dimension_numbers<[1], [0], [0], [1], [0, 0, 1, 1], [], []>} : vector<16x8xf32>, vector<8x8xf32>, vector<16x8xf32> -> vector<16x8xf32>
    %cst_21 = arith.constant dense<0.000000e+00> : vector<16x16xf32>
    %75 = tpu.matmul %74, %8, %cst_21 {dimension_numbers = #tpu.dot_dimension_numbers<[1], [0], [0], [1], [0, 0, 1, 1], [], []>} : vector<16x8xf32>, vector<8x16xf32>, vector<16x16xf32> -> vector<16x16xf32>
    %76 = vector.extract_strided_slice %75 {offsets = [0, 0], sizes = [1, 16], strides = [1, 1]} : vector<16x16xf32> to vector<1x16xf32>
    %77 = vector.extract_strided_slice %75 {offsets = [1, 0], sizes = [1, 16], strides = [1, 1]} : vector<16x16xf32> to vector<1x16xf32>
    %78 = vector.extract_strided_slice %75 {offsets = [2, 0], sizes = [1, 16], strides = [1, 1]} : vector<16x16xf32> to vector<1x16xf32>
    %79 = vector.extract_strided_slice %75 {offsets = [3, 0], sizes = [1, 16], strides = [1, 1]} : vector<16x16xf32> to vector<1x16xf32>
    %80 = vector.extract_strided_slice %75 {offsets = [4, 0], sizes = [1, 16], strides = [1, 1]} : vector<16x16xf32> to vector<1x16xf32>
    %81 = vector.extract_strided_slice %75 {offsets = [5, 0], sizes = [1, 16], strides = [1, 1]} : vector<16x16xf32> to vector<1x16xf32>
    %82 = vector.extract_strided_slice %75 {offsets = [6, 0], sizes = [1, 16], strides = [1, 1]} : vector<16x16xf32> to vector<1x16xf32>
    %83 = vector.extract_strided_slice %75 {offsets = [7, 0], sizes = [1, 16], strides = [1, 1]} : vector<16x16xf32> to vector<1x16xf32>
    %84 = vector.extract_strided_slice %75 {offsets = [8, 0], sizes = [1, 16], strides = [1, 1]} : vector<16x16xf32> to vector<1x16xf32>
    %85 = vector.extract_strided_slice %75 {offsets = [9, 0], sizes = [1, 16], strides = [1, 1]} : vector<16x16xf32> to vector<1x16xf32>
    %86 = vector.extract_strided_slice %75 {offsets = [10, 0], sizes = [1, 16], strides = [1, 1]} : vector<16x16xf32> to vector<1x16xf32>
    %87 = vector.extract_strided_slice %75 {offsets = [11, 0], sizes = [1, 16], strides = [1, 1]} : vector<16x16xf32> to vector<1x16xf32>
    %88 = vector.extract_strided_slice %75 {offsets = [12, 0], sizes = [1, 16], strides = [1, 1]} : vector<16x16xf32> to vector<1x16xf32>
    %89 = vector.extract_strided_slice %75 {offsets = [13, 0], sizes = [1, 16], strides = [1, 1]} : vector<16x16xf32> to vector<1x16xf32>
    %90 = vector.extract_strided_slice %75 {offsets = [14, 0], sizes = [1, 16], strides = [1, 1]} : vector<16x16xf32> to vector<1x16xf32>
    %91 = vector.extract_strided_slice %75 {offsets = [15, 0], sizes = [1, 16], strides = [1, 1]} : vector<16x16xf32> to vector<1x16xf32>
    %92 = tpu.concatenate %76, %77, %78, %79, %80, %81, %82, %83, %84, %85, %86, %87, %88, %89, %90, %91 in 1 : vector<1x16xf32>, vector<1x16xf32>, vector<1x16xf32>, vector<1x16xf32>, vector<1x16xf32>, vector<1x16xf32>, vector<1x16xf32>, vector<1x16xf32>, vector<1x16xf32>, vector<1x16xf32>, vector<1x16xf32>, vector<1x16xf32>, vector<1x16xf32>, vector<1x16xf32>, vector<1x16xf32>, vector<1x16xf32> -> vector<1x256xf32>
    %93 = vector.extract_strided_slice %6 {offsets = [4, 0, 0], sizes = [1, 8, 8], strides = [1, 1, 1]} : vector<8x8x8xf32> to vector<1x8x8xf32>
    %94 = vector.shape_cast %93 : vector<1x8x8xf32> to vector<8x8xf32>
    %cst_22 = arith.constant dense<0.000000e+00> : vector<16x8xf32>
    %95 = tpu.matmul %7, %94, %cst_22 {dimension_numbers = #tpu.dot_dimension_numbers<[1], [0], [0], [1], [0, 0, 1, 1], [], []>} : vector<16x8xf32>, vector<8x8xf32>, vector<16x8xf32> -> vector<16x8xf32>
    %cst_23 = arith.constant dense<0.000000e+00> : vector<16x16xf32>
    %96 = tpu.matmul %95, %8, %cst_23 {dimension_numbers = #tpu.dot_dimension_numbers<[1], [0], [0], [1], [0, 0, 1, 1], [], []>} : vector<16x8xf32>, vector<8x16xf32>, vector<16x16xf32> -> vector<16x16xf32>
    %97 = vector.extract_strided_slice %96 {offsets = [0, 0], sizes = [1, 16], strides = [1, 1]} : vector<16x16xf32> to vector<1x16xf32>
    %98 = vector.extract_strided_slice %96 {offsets = [1, 0], sizes = [1, 16], strides = [1, 1]} : vector<16x16xf32> to vector<1x16xf32>
    %99 = vector.extract_strided_slice %96 {offsets = [2, 0], sizes = [1, 16], strides = [1, 1]} : vector<16x16xf32> to vector<1x16xf32>
    %100 = vector.extract_strided_slice %96 {offsets = [3, 0], sizes = [1, 16], strides = [1, 1]} : vector<16x16xf32> to vector<1x16xf32>
    %101 = vector.extract_strided_slice %96 {offsets = [4, 0], sizes = [1, 16], strides = [1, 1]} : vector<16x16xf32> to vector<1x16xf32>
    %102 = vector.extract_strided_slice %96 {offsets = [5, 0], sizes = [1, 16], strides = [1, 1]} : vector<16x16xf32> to vector<1x16xf32>
    %103 = vector.extract_strided_slice %96 {offsets = [6, 0], sizes = [1, 16], strides = [1, 1]} : vector<16x16xf32> to vector<1x16xf32>
    %104 = vector.extract_strided_slice %96 {offsets = [7, 0], sizes = [1, 16], strides = [1, 1]} : vector<16x16xf32> to vector<1x16xf32>
    %105 = vector.extract_strided_slice %96 {offsets = [8, 0], sizes = [1, 16], strides = [1, 1]} : vector<16x16xf32> to vector<1x16xf32>
    %106 = vector.extract_strided_slice %96 {offsets = [9, 0], sizes = [1, 16], strides = [1, 1]} : vector<16x16xf32> to vector<1x16xf32>
    %107 = vector.extract_strided_slice %96 {offsets = [10, 0], sizes = [1, 16], strides = [1, 1]} : vector<16x16xf32> to vector<1x16xf32>
    %108 = vector.extract_strided_slice %96 {offsets = [11, 0], sizes = [1, 16], strides = [1, 1]} : vector<16x16xf32> to vector<1x16xf32>
    %109 = vector.extract_strided_slice %96 {offsets = [12, 0], sizes = [1, 16], strides = [1, 1]} : vector<16x16xf32> to vector<1x16xf32>
    %110 = vector.extract_strided_slice %96 {offsets = [13, 0], sizes = [1, 16], strides = [1, 1]} : vector<16x16xf32> to vector<1x16xf32>
    %111 = vector.extract_strided_slice %96 {offsets = [14, 0], sizes = [1, 16], strides = [1, 1]} : vector<16x16xf32> to vector<1x16xf32>
    %112 = vector.extract_strided_slice %96 {offsets = [15, 0], sizes = [1, 16], strides = [1, 1]} : vector<16x16xf32> to vector<1x16xf32>
    %113 = tpu.concatenate %97, %98, %99, %100, %101, %102, %103, %104, %105, %106, %107, %108, %109, %110, %111, %112 in 1 : vector<1x16xf32>, vector<1x16xf32>, vector<1x16xf32>, vector<1x16xf32>, vector<1x16xf32>, vector<1x16xf32>, vector<1x16xf32>, vector<1x16xf32>, vector<1x16xf32>, vector<1x16xf32>, vector<1x16xf32>, vector<1x16xf32>, vector<1x16xf32>, vector<1x16xf32>, vector<1x16xf32>, vector<1x16xf32> -> vector<1x256xf32>
    %114 = vector.extract_strided_slice %6 {offsets = [5, 0, 0], sizes = [1, 8, 8], strides = [1, 1, 1]} : vector<8x8x8xf32> to vector<1x8x8xf32>
    %115 = vector.shape_cast %114 : vector<1x8x8xf32> to vector<8x8xf32>
    %cst_24 = arith.constant dense<0.000000e+00> : vector<16x8xf32>
    %116 = tpu.matmul %7, %115, %cst_24 {dimension_numbers = #tpu.dot_dimension_numbers<[1], [0], [0], [1], [0, 0, 1, 1], [], []>} : vector<16x8xf32>, vector<8x8xf32>, vector<16x8xf32> -> vector<16x8xf32>
    %cst_25 = arith.constant dense<0.000000e+00> : vector<16x16xf32>
    %117 = tpu.matmul %116, %8, %cst_25 {dimension_numbers = #tpu.dot_dimension_numbers<[1], [0], [0], [1], [0, 0, 1, 1], [], []>} : vector<16x8xf32>, vector<8x16xf32>, vector<16x16xf32> -> vector<16x16xf32>
    %118 = vector.extract_strided_slice %117 {offsets = [0, 0], sizes = [1, 16], strides = [1, 1]} : vector<16x16xf32> to vector<1x16xf32>
    %119 = vector.extract_strided_slice %117 {offsets = [1, 0], sizes = [1, 16], strides = [1, 1]} : vector<16x16xf32> to vector<1x16xf32>
    %120 = vector.extract_strided_slice %117 {offsets = [2, 0], sizes = [1, 16], strides = [1, 1]} : vector<16x16xf32> to vector<1x16xf32>
    %121 = vector.extract_strided_slice %117 {offsets = [3, 0], sizes = [1, 16], strides = [1, 1]} : vector<16x16xf32> to vector<1x16xf32>
    %122 = vector.extract_strided_slice %117 {offsets = [4, 0], sizes = [1, 16], strides = [1, 1]} : vector<16x16xf32> to vector<1x16xf32>
    %123 = vector.extract_strided_slice %117 {offsets = [5, 0], sizes = [1, 16], strides = [1, 1]} : vector<16x16xf32> to vector<1x16xf32>
    %124 = vector.extract_strided_slice %117 {offsets = [6, 0], sizes = [1, 16], strides = [1, 1]} : vector<16x16xf32> to vector<1x16xf32>
    %125 = vector.extract_strided_slice %117 {offsets = [7, 0], sizes = [1, 16], strides = [1, 1]} : vector<16x16xf32> to vector<1x16xf32>
    %126 = vector.extract_strided_slice %117 {offsets = [8, 0], sizes = [1, 16], strides = [1, 1]} : vector<16x16xf32> to vector<1x16xf32>
    %127 = vector.extract_strided_slice %117 {offsets = [9, 0], sizes = [1, 16], strides = [1, 1]} : vector<16x16xf32> to vector<1x16xf32>
    %128 = vector.extract_strided_slice %117 {offsets = [10, 0], sizes = [1, 16], strides = [1, 1]} : vector<16x16xf32> to vector<1x16xf32>
    %129 = vector.extract_strided_slice %117 {offsets = [11, 0], sizes = [1, 16], strides = [1, 1]} : vector<16x16xf32> to vector<1x16xf32>
    %130 = vector.extract_strided_slice %117 {offsets = [12, 0], sizes = [1, 16], strides = [1, 1]} : vector<16x16xf32> to vector<1x16xf32>
    %131 = vector.extract_strided_slice %117 {offsets = [13, 0], sizes = [1, 16], strides = [1, 1]} : vector<16x16xf32> to vector<1x16xf32>
    %132 = vector.extract_strided_slice %117 {offsets = [14, 0], sizes = [1, 16], strides = [1, 1]} : vector<16x16xf32> to vector<1x16xf32>
    %133 = vector.extract_strided_slice %117 {offsets = [15, 0], sizes = [1, 16], strides = [1, 1]} : vector<16x16xf32> to vector<1x16xf32>
    %134 = tpu.concatenate %118, %119, %120, %121, %122, %123, %124, %125, %126, %127, %128, %129, %130, %131, %132, %133 in 1 : vector<1x16xf32>, vector<1x16xf32>, vector<1x16xf32>, vector<1x16xf32>, vector<1x16xf32>, vector<1x16xf32>, vector<1x16xf32>, vector<1x16xf32>, vector<1x16xf32>, vector<1x16xf32>, vector<1x16xf32>, vector<1x16xf32>, vector<1x16xf32>, vector<1x16xf32>, vector<1x16xf32>, vector<1x16xf32> -> vector<1x256xf32>
    %135 = vector.extract_strided_slice %6 {offsets = [6, 0, 0], sizes = [1, 8, 8], strides = [1, 1, 1]} : vector<8x8x8xf32> to vector<1x8x8xf32>
    %136 = vector.shape_cast %135 : vector<1x8x8xf32> to vector<8x8xf32>
    %cst_26 = arith.constant dense<0.000000e+00> : vector<16x8xf32>
    %137 = tpu.matmul %7, %136, %cst_26 {dimension_numbers = #tpu.dot_dimension_numbers<[1], [0], [0], [1], [0, 0, 1, 1], [], []>} : vector<16x8xf32>, vector<8x8xf32>, vector<16x8xf32> -> vector<16x8xf32>
    %cst_27 = arith.constant dense<0.000000e+00> : vector<16x16xf32>
    %138 = tpu.matmul %137, %8, %cst_27 {dimension_numbers = #tpu.dot_dimension_numbers<[1], [0], [0], [1], [0, 0, 1, 1], [], []>} : vector<16x8xf32>, vector<8x16xf32>, vector<16x16xf32> -> vector<16x16xf32>
    %139 = vector.extract_strided_slice %138 {offsets = [0, 0], sizes = [1, 16], strides = [1, 1]} : vector<16x16xf32> to vector<1x16xf32>
    %140 = vector.extract_strided_slice %138 {offsets = [1, 0], sizes = [1, 16], strides = [1, 1]} : vector<16x16xf32> to vector<1x16xf32>
    %141 = vector.extract_strided_slice %138 {offsets = [2, 0], sizes = [1, 16], strides = [1, 1]} : vector<16x16xf32> to vector<1x16xf32>
    %142 = vector.extract_strided_slice %138 {offsets = [3, 0], sizes = [1, 16], strides = [1, 1]} : vector<16x16xf32> to vector<1x16xf32>
    %143 = vector.extract_strided_slice %138 {offsets = [4, 0], sizes = [1, 16], strides = [1, 1]} : vector<16x16xf32> to vector<1x16xf32>
    %144 = vector.extract_strided_slice %138 {offsets = [5, 0], sizes = [1, 16], strides = [1, 1]} : vector<16x16xf32> to vector<1x16xf32>
    %145 = vector.extract_strided_slice %138 {offsets = [6, 0], sizes = [1, 16], strides = [1, 1]} : vector<16x16xf32> to vector<1x16xf32>
    %146 = vector.extract_strided_slice %138 {offsets = [7, 0], sizes = [1, 16], strides = [1, 1]} : vector<16x16xf32> to vector<1x16xf32>
    %147 = vector.extract_strided_slice %138 {offsets = [8, 0], sizes = [1, 16], strides = [1, 1]} : vector<16x16xf32> to vector<1x16xf32>
    %148 = vector.extract_strided_slice %138 {offsets = [9, 0], sizes = [1, 16], strides = [1, 1]} : vector<16x16xf32> to vector<1x16xf32>
    %149 = vector.extract_strided_slice %138 {offsets = [10, 0], sizes = [1, 16], strides = [1, 1]} : vector<16x16xf32> to vector<1x16xf32>
    %150 = vector.extract_strided_slice %138 {offsets = [11, 0], sizes = [1, 16], strides = [1, 1]} : vector<16x16xf32> to vector<1x16xf32>
    %151 = vector.extract_strided_slice %138 {offsets = [12, 0], sizes = [1, 16], strides = [1, 1]} : vector<16x16xf32> to vector<1x16xf32>
    %152 = vector.extract_strided_slice %138 {offsets = [13, 0], sizes = [1, 16], strides = [1, 1]} : vector<16x16xf32> to vector<1x16xf32>
    %153 = vector.extract_strided_slice %138 {offsets = [14, 0], sizes = [1, 16], strides = [1, 1]} : vector<16x16xf32> to vector<1x16xf32>
    %154 = vector.extract_strided_slice %138 {offsets = [15, 0], sizes = [1, 16], strides = [1, 1]} : vector<16x16xf32> to vector<1x16xf32>
    %155 = tpu.concatenate %139, %140, %141, %142, %143, %144, %145, %146, %147, %148, %149, %150, %151, %152, %153, %154 in 1 : vector<1x16xf32>, vector<1x16xf32>, vector<1x16xf32>, vector<1x16xf32>, vector<1x16xf32>, vector<1x16xf32>, vector<1x16xf32>, vector<1x16xf32>, vector<1x16xf32>, vector<1x16xf32>, vector<1x16xf32>, vector<1x16xf32>, vector<1x16xf32>, vector<1x16xf32>, vector<1x16xf32>, vector<1x16xf32> -> vector<1x256xf32>
    %156 = vector.extract_strided_slice %6 {offsets = [7, 0, 0], sizes = [1, 8, 8], strides = [1, 1, 1]} : vector<8x8x8xf32> to vector<1x8x8xf32>
    %157 = vector.shape_cast %156 : vector<1x8x8xf32> to vector<8x8xf32>
    %cst_28 = arith.constant dense<0.000000e+00> : vector<16x8xf32>
    %158 = tpu.matmul %7, %157, %cst_28 {dimension_numbers = #tpu.dot_dimension_numbers<[1], [0], [0], [1], [0, 0, 1, 1], [], []>} : vector<16x8xf32>, vector<8x8xf32>, vector<16x8xf32> -> vector<16x8xf32>
    %cst_29 = arith.constant dense<0.000000e+00> : vector<16x16xf32>
    %159 = tpu.matmul %158, %8, %cst_29 {dimension_numbers = #tpu.dot_dimension_numbers<[1], [0], [0], [1], [0, 0, 1, 1], [], []>} : vector<16x8xf32>, vector<8x16xf32>, vector<16x16xf32> -> vector<16x16xf32>
    %160 = vector.extract_strided_slice %159 {offsets = [0, 0], sizes = [1, 16], strides = [1, 1]} : vector<16x16xf32> to vector<1x16xf32>
    %161 = vector.extract_strided_slice %159 {offsets = [1, 0], sizes = [1, 16], strides = [1, 1]} : vector<16x16xf32> to vector<1x16xf32>
    %162 = vector.extract_strided_slice %159 {offsets = [2, 0], sizes = [1, 16], strides = [1, 1]} : vector<16x16xf32> to vector<1x16xf32>
    %163 = vector.extract_strided_slice %159 {offsets = [3, 0], sizes = [1, 16], strides = [1, 1]} : vector<16x16xf32> to vector<1x16xf32>
    %164 = vector.extract_strided_slice %159 {offsets = [4, 0], sizes = [1, 16], strides = [1, 1]} : vector<16x16xf32> to vector<1x16xf32>
    %165 = vector.extract_strided_slice %159 {offsets = [5, 0], sizes = [1, 16], strides = [1, 1]} : vector<16x16xf32> to vector<1x16xf32>
    %166 = vector.extract_strided_slice %159 {offsets = [6, 0], sizes = [1, 16], strides = [1, 1]} : vector<16x16xf32> to vector<1x16xf32>
    %167 = vector.extract_strided_slice %159 {offsets = [7, 0], sizes = [1, 16], strides = [1, 1]} : vector<16x16xf32> to vector<1x16xf32>
    %168 = vector.extract_strided_slice %159 {offsets = [8, 0], sizes = [1, 16], strides = [1, 1]} : vector<16x16xf32> to vector<1x16xf32>
    %169 = vector.extract_strided_slice %159 {offsets = [9, 0], sizes = [1, 16], strides = [1, 1]} : vector<16x16xf32> to vector<1x16xf32>
    %170 = vector.extract_strided_slice %159 {offsets = [10, 0], sizes = [1, 16], strides = [1, 1]} : vector<16x16xf32> to vector<1x16xf32>
    %171 = vector.extract_strided_slice %159 {offsets = [11, 0], sizes = [1, 16], strides = [1, 1]} : vector<16x16xf32> to vector<1x16xf32>
    %172 = vector.extract_strided_slice %159 {offsets = [12, 0], sizes = [1, 16], strides = [1, 1]} : vector<16x16xf32> to vector<1x16xf32>
    %173 = vector.extract_strided_slice %159 {offsets = [13, 0], sizes = [1, 16], strides = [1, 1]} : vector<16x16xf32> to vector<1x16xf32>
    %174 = vector.extract_strided_slice %159 {offsets = [14, 0], sizes = [1, 16], strides = [1, 1]} : vector<16x16xf32> to vector<1x16xf32>
    %175 = vector.extract_strided_slice %159 {offsets = [15, 0], sizes = [1, 16], strides = [1, 1]} : vector<16x16xf32> to vector<1x16xf32>
    %176 = tpu.concatenate %160, %161, %162, %163, %164, %165, %166, %167, %168, %169, %170, %171, %172, %173, %174, %175 in 1 : vector<1x16xf32>, vector<1x16xf32>, vector<1x16xf32>, vector<1x16xf32>, vector<1x16xf32>, vector<1x16xf32>, vector<1x16xf32>, vector<1x16xf32>, vector<1x16xf32>, vector<1x16xf32>, vector<1x16xf32>, vector<1x16xf32>, vector<1x16xf32>, vector<1x16xf32>, vector<1x16xf32>, vector<1x16xf32> -> vector<1x256xf32>
    %177 = tpu.concatenate %29, %50, %71, %92, %113, %134, %155, %176 in 0 : vector<1x256xf32>, vector<1x256xf32>, vector<1x256xf32>, vector<1x256xf32>, vector<1x256xf32>, vector<1x256xf32>, vector<1x256xf32>, vector<1x256xf32> -> vector<8x256xf32>
    %178 = vector.extract_strided_slice %2 {offsets = [0, 239], sizes = [4, 17], strides = [1, 1]} : vector<4x256xf32> to vector<4x17xf32>
    %179 = vector.extract_strided_slice %2 {offsets = [0, 0], sizes = [4, 239], strides = [1, 1]} : vector<4x256xf32> to vector<4x239xf32>
    %180 = tpu.concatenate %178, %179 in 1 : vector<4x17xf32>, vector<4x239xf32> -> vector<4x256xf32>
    %181 = vector.extract_strided_slice %0 {offsets = [0, 0], sizes = [1, 256], strides = [1, 1]} : vector<9x256xf32> to vector<1x256xf32>
    %182 = vector.broadcast %181 : vector<1x256xf32> to vector<4x256xf32>
    %183 = arith.mulf %180, %182 : vector<4x256xf32>
    %184 = arith.truncf %183 : vector<4x256xf32> to vector<4x256xbf16>
    %c0_30 = arith.constant 0 : index
    %c0_31 = arith.constant 0 : index
    %185 = vector.load %arg16[%c0_30, %c0_31] : memref<216x256xbf16, #tpu.memory_space<vmem>>, vector<4x256xbf16>
    tpu.vector_store %arg16[%c0_30, %c0_31], %184 {strides = array<i32>} : memref<216x256xbf16, #tpu.memory_space<vmem>>, vector<4x256xbf16>,
    %186 = vector.extract_strided_slice %4 {offsets = [0, 239], sizes = [4, 17], strides = [1, 1]} : vector<4x256xf32> to vector<4x17xf32>
    %187 = vector.extract_strided_slice %4 {offsets = [0, 0], sizes = [4, 239], strides = [1, 1]} : vector<4x256xf32> to vector<4x239xf32>
    %188 = tpu.concatenate %186, %187 in 1 : vector<4x17xf32>, vector<4x239xf32> -> vector<4x256xf32>
    %189 = vector.extract_strided_slice %0 {offsets = [0, 0], sizes = [1, 256], strides = [1, 1]} : vector<9x256xf32> to vector<1x256xf32>
    %190 = vector.broadcast %189 : vector<1x256xf32> to vector<4x256xf32>
    %191 = arith.mulf %188, %190 : vector<4x256xf32>
    %192 = arith.truncf %191 : vector<4x256xf32> to vector<4x256xbf16>
    %c4 = arith.constant 4 : index
    %c0_32 = arith.constant 0 : index
    %193 = vector.load %arg16[%c4, %c0_32] : memref<216x256xbf16, #tpu.memory_space<vmem>>, vector<4x256xbf16>
    tpu.vector_store %arg16[%c4, %c0_32], %192 {strides = array<i32>} : memref<216x256xbf16, #tpu.memory_space<vmem>>, vector<4x256xbf16>,
    %194 = vector.extract_strided_slice %2 {offsets = [0, 240], sizes = [4, 16], strides = [1, 1]} : vector<4x256xf32> to vector<4x16xf32>
    %195 = vector.extract_strided_slice %2 {offsets = [0, 0], sizes = [4, 240], strides = [1, 1]} : vector<4x256xf32> to vector<4x240xf32>
    %196 = tpu.concatenate %194, %195 in 1 : vector<4x16xf32>, vector<4x240xf32> -> vector<4x256xf32>
    %197 = vector.extract_strided_slice %0 {offsets = [1, 0], sizes = [1, 256], strides = [1, 1]} : vector<9x256xf32> to vector<1x256xf32>
    %198 = vector.broadcast %197 : vector<1x256xf32> to vector<4x256xf32>
    %199 = arith.mulf %196, %198 : vector<4x256xf32>
    %200 = arith.truncf %199 : vector<4x256xf32> to vector<4x256xbf16>
    %c8 = arith.constant 8 : index
    %c0_33 = arith.constant 0 : index
    %201 = vector.load %arg16[%c8, %c0_33] : memref<216x256xbf16, #tpu.memory_space<vmem>>, vector<4x256xbf16>
    tpu.vector_store %arg16[%c8, %c0_33], %200 {strides = array<i32>} : memref<216x256xbf16, #tpu.memory_space<vmem>>, vector<4x256xbf16>,
    %202 = vector.extract_strided_slice %4 {offsets = [0, 240], sizes = [4, 16], strides = [1, 1]} : vector<4x256xf32> to vector<4x16xf32>
    %203 = vector.extract_strided_slice %4 {offsets = [0, 0], sizes = [4, 240], strides = [1, 1]} : vector<4x256xf32> to vector<4x240xf32>
    %204 = tpu.concatenate %202, %203 in 1 : vector<4x16xf32>, vector<4x240xf32> -> vector<4x256xf32>
    %205 = vector.extract_strided_slice %0 {offsets = [1, 0], sizes = [1, 256], strides = [1, 1]} : vector<9x256xf32> to vector<1x256xf32>
    %206 = vector.broadcast %205 : vector<1x256xf32> to vector<4x256xf32>
    %207 = arith.mulf %204, %206 : vector<4x256xf32>
    %208 = arith.truncf %207 : vector<4x256xf32> to vector<4x256xbf16>
    %c12 = arith.constant 12 : index
    %c0_34 = arith.constant 0 : index
    %209 = vector.load %arg16[%c12, %c0_34] : memref<216x256xbf16, #tpu.memory_space<vmem>>, vector<4x256xbf16>
    tpu.vector_store %arg16[%c12, %c0_34], %208 {strides = array<i32>} : memref<216x256xbf16, #tpu.memory_space<vmem>>, vector<4x256xbf16>,
    %210 = vector.extract_strided_slice %2 {offsets = [0, 241], sizes = [4, 15], strides = [1, 1]} : vector<4x256xf32> to vector<4x15xf32>
    %211 = vector.extract_strided_slice %2 {offsets = [0, 0], sizes = [4, 241], strides = [1, 1]} : vector<4x256xf32> to vector<4x241xf32>
    %212 = tpu.concatenate %210, %211 in 1 : vector<4x15xf32>, vector<4x241xf32> -> vector<4x256xf32>
    %213 = vector.extract_strided_slice %0 {offsets = [2, 0], sizes = [1, 256], strides = [1, 1]} : vector<9x256xf32> to vector<1x256xf32>
    %214 = vector.broadcast %213 : vector<1x256xf32> to vector<4x256xf32>
    %215 = arith.mulf %212, %214 : vector<4x256xf32>
    %216 = arith.truncf %215 : vector<4x256xf32> to vector<4x256xbf16>
    %c16 = arith.constant 16 : index
    %c0_35 = arith.constant 0 : index
    %217 = vector.load %arg16[%c16, %c0_35] : memref<216x256xbf16, #tpu.memory_space<vmem>>, vector<4x256xbf16>
    tpu.vector_store %arg16[%c16, %c0_35], %216 {strides = array<i32>} : memref<216x256xbf16, #tpu.memory_space<vmem>>, vector<4x256xbf16>,
    %218 = vector.extract_strided_slice %4 {offsets = [0, 241], sizes = [4, 15], strides = [1, 1]} : vector<4x256xf32> to vector<4x15xf32>
    %219 = vector.extract_strided_slice %4 {offsets = [0, 0], sizes = [4, 241], strides = [1, 1]} : vector<4x256xf32> to vector<4x241xf32>
    %220 = tpu.concatenate %218, %219 in 1 : vector<4x15xf32>, vector<4x241xf32> -> vector<4x256xf32>
    %221 = vector.extract_strided_slice %0 {offsets = [2, 0], sizes = [1, 256], strides = [1, 1]} : vector<9x256xf32> to vector<1x256xf32>
    %222 = vector.broadcast %221 : vector<1x256xf32> to vector<4x256xf32>
    %223 = arith.mulf %220, %222 : vector<4x256xf32>
    %224 = arith.truncf %223 : vector<4x256xf32> to vector<4x256xbf16>
    %c20 = arith.constant 20 : index
    %c0_36 = arith.constant 0 : index
    %225 = vector.load %arg16[%c20, %c0_36] : memref<216x256xbf16, #tpu.memory_space<vmem>>, vector<4x256xbf16>
    tpu.vector_store %arg16[%c20, %c0_36], %224 {strides = array<i32>} : memref<216x256xbf16, #tpu.memory_space<vmem>>, vector<4x256xbf16>,
    %226 = vector.extract_strided_slice %2 {offsets = [0, 255], sizes = [4, 1], strides = [1, 1]} : vector<4x256xf32> to vector<4x1xf32>
    %227 = vector.extract_strided_slice %2 {offsets = [0, 0], sizes = [4, 255], strides = [1, 1]} : vector<4x256xf32> to vector<4x255xf32>
    %228 = tpu.concatenate %226, %227 in 1 : vector<4x1xf32>, vector<4x255xf32> -> vector<4x256xf32>
    %229 = vector.extract_strided_slice %0 {offsets = [3, 0], sizes = [1, 256], strides = [1, 1]} : vector<9x256xf32> to vector<1x256xf32>
    %230 = vector.broadcast %229 : vector<1x256xf32> to vector<4x256xf32>
    %231 = arith.mulf %228, %230 : vector<4x256xf32>
    %232 = arith.truncf %231 : vector<4x256xf32> to vector<4x256xbf16>
    %c24 = arith.constant 24 : index
    %c0_37 = arith.constant 0 : index
    %233 = vector.load %arg16[%c24, %c0_37] : memref<216x256xbf16, #tpu.memory_space<vmem>>, vector<4x256xbf16>
    tpu.vector_store %arg16[%c24, %c0_37], %232 {strides = array<i32>} : memref<216x256xbf16, #tpu.memory_space<vmem>>, vector<4x256xbf16>,
    %234 = vector.extract_strided_slice %4 {offsets = [0, 255], sizes = [4, 1], strides = [1, 1]} : vector<4x256xf32> to vector<4x1xf32>
    %235 = vector.extract_strided_slice %4 {offsets = [0, 0], sizes = [4, 255], strides = [1, 1]} : vector<4x256xf32> to vector<4x255xf32>
    %236 = tpu.concatenate %234, %235 in 1 : vector<4x1xf32>, vector<4x255xf32> -> vector<4x256xf32>
    %237 = vector.extract_strided_slice %0 {offsets = [3, 0], sizes = [1, 256], strides = [1, 1]} : vector<9x256xf32> to vector<1x256xf32>
    %238 = vector.broadcast %237 : vector<1x256xf32> to vector<4x256xf32>
    %239 = arith.mulf %236, %238 : vector<4x256xf32>
    %240 = arith.truncf %239 : vector<4x256xf32> to vector<4x256xbf16>
    %c28 = arith.constant 28 : index
    %c0_38 = arith.constant 0 : index
    %241 = vector.load %arg16[%c28, %c0_38] : memref<216x256xbf16, #tpu.memory_space<vmem>>, vector<4x256xbf16>
    tpu.vector_store %arg16[%c28, %c0_38], %240 {strides = array<i32>} : memref<216x256xbf16, #tpu.memory_space<vmem>>, vector<4x256xbf16>,
    %242 = arith.truncf %2 : vector<4x256xf32> to vector<4x256xbf16>
    %c32 = arith.constant 32 : index
    %c0_39 = arith.constant 0 : index
    %243 = vector.load %arg16[%c32, %c0_39] : memref<216x256xbf16, #tpu.memory_space<vmem>>, vector<4x256xbf16>
    tpu.vector_store %arg16[%c32, %c0_39], %242 {strides = array<i32>} : memref<216x256xbf16, #tpu.memory_space<vmem>>, vector<4x256xbf16>,
    %244 = arith.truncf %4 : vector<4x256xf32> to vector<4x256xbf16>
    %c36 = arith.constant 36 : index
    %c0_40 = arith.constant 0 : index
    %245 = vector.load %arg16[%c36, %c0_40] : memref<216x256xbf16, #tpu.memory_space<vmem>>, vector<4x256xbf16>
    tpu.vector_store %arg16[%c36, %c0_40], %244 {strides = array<i32>} : memref<216x256xbf16, #tpu.memory_space<vmem>>, vector<4x256xbf16>,
    %246 = vector.extract_strided_slice %2 {offsets = [0, 1], sizes = [4, 255], strides = [1, 1]} : vector<4x256xf32> to vector<4x255xf32>
    %247 = vector.extract_strided_slice %2 {offsets = [0, 0], sizes = [4, 1], strides = [1, 1]} : vector<4x256xf32> to vector<4x1xf32>
    %248 = tpu.concatenate %246, %247 in 1 : vector<4x255xf32>, vector<4x1xf32> -> vector<4x256xf32>
    %249 = vector.extract_strided_slice %0 {offsets = [5, 0], sizes = [1, 256], strides = [1, 1]} : vector<9x256xf32> to vector<1x256xf32>
    %250 = vector.broadcast %249 : vector<1x256xf32> to vector<4x256xf32>
    %251 = arith.mulf %248, %250 : vector<4x256xf32>
    %252 = arith.truncf %251 : vector<4x256xf32> to vector<4x256xbf16>
    %c40 = arith.constant 40 : index
    %c0_41 = arith.constant 0 : index
    %253 = vector.load %arg16[%c40, %c0_41] : memref<216x256xbf16, #tpu.memory_space<vmem>>, vector<4x256xbf16>
    tpu.vector_store %arg16[%c40, %c0_41], %252 {strides = array<i32>} : memref<216x256xbf16, #tpu.memory_space<vmem>>, vector<4x256xbf16>,
    %254 = vector.extract_strided_slice %4 {offsets = [0, 1], sizes = [4, 255], strides = [1, 1]} : vector<4x256xf32> to vector<4x255xf32>
    %255 = vector.extract_strided_slice %4 {offsets = [0, 0], sizes = [4, 1], strides = [1, 1]} : vector<4x256xf32> to vector<4x1xf32>
    %256 = tpu.concatenate %254, %255 in 1 : vector<4x255xf32>, vector<4x1xf32> -> vector<4x256xf32>
    %257 = vector.extract_strided_slice %0 {offsets = [5, 0], sizes = [1, 256], strides = [1, 1]} : vector<9x256xf32> to vector<1x256xf32>
    %258 = vector.broadcast %257 : vector<1x256xf32> to vector<4x256xf32>
    %259 = arith.mulf %256, %258 : vector<4x256xf32>
    %260 = arith.truncf %259 : vector<4x256xf32> to vector<4x256xbf16>
    %c44 = arith.constant 44 : index
    %c0_42 = arith.constant 0 : index
    %261 = vector.load %arg16[%c44, %c0_42] : memref<216x256xbf16, #tpu.memory_space<vmem>>, vector<4x256xbf16>
    tpu.vector_store %arg16[%c44, %c0_42], %260 {strides = array<i32>} : memref<216x256xbf16, #tpu.memory_space<vmem>>, vector<4x256xbf16>,
    %262 = vector.extract_strided_slice %2 {offsets = [0, 15], sizes = [4, 241], strides = [1, 1]} : vector<4x256xf32> to vector<4x241xf32>
    %263 = vector.extract_strided_slice %2 {offsets = [0, 0], sizes = [4, 15], strides = [1, 1]} : vector<4x256xf32> to vector<4x15xf32>
    %264 = tpu.concatenate %262, %263 in 1 : vector<4x241xf32>, vector<4x15xf32> -> vector<4x256xf32>
    %265 = vector.extract_strided_slice %0 {offsets = [6, 0], sizes = [1, 256], strides = [1, 1]} : vector<9x256xf32> to vector<1x256xf32>
    %266 = vector.broadcast %265 : vector<1x256xf32> to vector<4x256xf32>
    %267 = arith.mulf %264, %266 : vector<4x256xf32>
    %268 = arith.truncf %267 : vector<4x256xf32> to vector<4x256xbf16>
    %c48 = arith.constant 48 : index
    %c0_43 = arith.constant 0 : index
    %269 = vector.load %arg16[%c48, %c0_43] : memref<216x256xbf16, #tpu.memory_space<vmem>>, vector<4x256xbf16>
    tpu.vector_store %arg16[%c48, %c0_43], %268 {strides = array<i32>} : memref<216x256xbf16, #tpu.memory_space<vmem>>, vector<4x256xbf16>,
    %270 = vector.extract_strided_slice %4 {offsets = [0, 15], sizes = [4, 241], strides = [1, 1]} : vector<4x256xf32> to vector<4x241xf32>
    %271 = vector.extract_strided_slice %4 {offsets = [0, 0], sizes = [4, 15], strides = [1, 1]} : vector<4x256xf32> to vector<4x15xf32>
    %272 = tpu.concatenate %270, %271 in 1 : vector<4x241xf32>, vector<4x15xf32> -> vector<4x256xf32>
    %273 = vector.extract_strided_slice %0 {offsets = [6, 0], sizes = [1, 256], strides = [1, 1]} : vector<9x256xf32> to vector<1x256xf32>
    %274 = vector.broadcast %273 : vector<1x256xf32> to vector<4x256xf32>
    %275 = arith.mulf %272, %274 : vector<4x256xf32>
    %276 = arith.truncf %275 : vector<4x256xf32> to vector<4x256xbf16>
    %c52 = arith.constant 52 : index
    %c0_44 = arith.constant 0 : index
    %277 = vector.load %arg16[%c52, %c0_44] : memref<216x256xbf16, #tpu.memory_space<vmem>>, vector<4x256xbf16>
    tpu.vector_store %arg16[%c52, %c0_44], %276 {strides = array<i32>} : memref<216x256xbf16, #tpu.memory_space<vmem>>, vector<4x256xbf16>,
    %278 = vector.extract_strided_slice %2 {offsets = [0, 16], sizes = [4, 240], strides = [1, 1]} : vector<4x256xf32> to vector<4x240xf32>
    %279 = vector.extract_strided_slice %2 {offsets = [0, 0], sizes = [4, 16], strides = [1, 1]} : vector<4x256xf32> to vector<4x16xf32>
    %280 = tpu.concatenate %278, %279 in 1 : vector<4x240xf32>, vector<4x16xf32> -> vector<4x256xf32>
    %281 = vector.extract_strided_slice %0 {offsets = [7, 0], sizes = [1, 256], strides = [1, 1]} : vector<9x256xf32> to vector<1x256xf32>
    %282 = vector.broadcast %281 : vector<1x256xf32> to vector<4x256xf32>
    %283 = arith.mulf %280, %282 : vector<4x256xf32>
    %284 = arith.truncf %283 : vector<4x256xf32> to vector<4x256xbf16>
    %c56 = arith.constant 56 : index
    %c0_45 = arith.constant 0 : index
    %285 = vector.load %arg16[%c56, %c0_45] : memref<216x256xbf16, #tpu.memory_space<vmem>>, vector<4x256xbf16>
    tpu.vector_store %arg16[%c56, %c0_45], %284 {strides = array<i32>} : memref<216x256xbf16, #tpu.memory_space<vmem>>, vector<4x256xbf16>,
    %286 = vector.extract_strided_slice %4 {offsets = [0, 16], sizes = [4, 240], strides = [1, 1]} : vector<4x256xf32> to vector<4x240xf32>
    %287 = vector.extract_strided_slice %4 {offsets = [0, 0], sizes = [4, 16], strides = [1, 1]} : vector<4x256xf32> to vector<4x16xf32>
    %288 = tpu.concatenate %286, %287 in 1 : vector<4x240xf32>, vector<4x16xf32> -> vector<4x256xf32>
    %289 = vector.extract_strided_slice %0 {offsets = [7, 0], sizes = [1, 256], strides = [1, 1]} : vector<9x256xf32> to vector<1x256xf32>
    %290 = vector.broadcast %289 : vector<1x256xf32> to vector<4x256xf32>
    %291 = arith.mulf %288, %290 : vector<4x256xf32>
    %292 = arith.truncf %291 : vector<4x256xf32> to vector<4x256xbf16>
    %c60 = arith.constant 60 : index
    %c0_46 = arith.constant 0 : index
    %293 = vector.load %arg16[%c60, %c0_46] : memref<216x256xbf16, #tpu.memory_space<vmem>>, vector<4x256xbf16>
    tpu.vector_store %arg16[%c60, %c0_46], %292 {strides = array<i32>} : memref<216x256xbf16, #tpu.memory_space<vmem>>, vector<4x256xbf16>,
    %294 = vector.extract_strided_slice %2 {offsets = [0, 17], sizes = [4, 239], strides = [1, 1]} : vector<4x256xf32> to vector<4x239xf32>
    %295 = vector.extract_strided_slice %2 {offsets = [0, 0], sizes = [4, 17], strides = [1, 1]} : vector<4x256xf32> to vector<4x17xf32>
    %296 = tpu.concatenate %294, %295 in 1 : vector<4x239xf32>, vector<4x17xf32> -> vector<4x256xf32>
    %297 = vector.extract_strided_slice %0 {offsets = [8, 0], sizes = [1, 256], strides = [1, 1]} : vector<9x256xf32> to vector<1x256xf32>
    %298 = vector.broadcast %297 : vector<1x256xf32> to vector<4x256xf32>
    %299 = arith.mulf %296, %298 : vector<4x256xf32>
    %300 = arith.truncf %299 : vector<4x256xf32> to vector<4x256xbf16>
    %c64 = arith.constant 64 : index
    %c0_47 = arith.constant 0 : index
    %301 = vector.load %arg16[%c64, %c0_47] : memref<216x256xbf16, #tpu.memory_space<vmem>>, vector<4x256xbf16>
    tpu.vector_store %arg16[%c64, %c0_47], %300 {strides = array<i32>} : memref<216x256xbf16, #tpu.memory_space<vmem>>, vector<4x256xbf16>,
    %302 = vector.extract_strided_slice %4 {offsets = [0, 17], sizes = [4, 239], strides = [1, 1]} : vector<4x256xf32> to vector<4x239xf32>
    %303 = vector.extract_strided_slice %4 {offsets = [0, 0], sizes = [4, 17], strides = [1, 1]} : vector<4x256xf32> to vector<4x17xf32>
    %304 = tpu.concatenate %302, %303 in 1 : vector<4x239xf32>, vector<4x17xf32> -> vector<4x256xf32>
    %305 = vector.extract_strided_slice %0 {offsets = [8, 0], sizes = [1, 256], strides = [1, 1]} : vector<9x256xf32> to vector<1x256xf32>
    %306 = vector.broadcast %305 : vector<1x256xf32> to vector<4x256xf32>
    %307 = arith.mulf %304, %306 : vector<4x256xf32>
    %308 = arith.truncf %307 : vector<4x256xf32> to vector<4x256xbf16>
    %c68 = arith.constant 68 : index
    %c0_48 = arith.constant 0 : index
    %309 = vector.load %arg16[%c68, %c0_48] : memref<216x256xbf16, #tpu.memory_space<vmem>>, vector<4x256xbf16>
    tpu.vector_store %arg16[%c68, %c0_48], %308 {strides = array<i32>} : memref<216x256xbf16, #tpu.memory_space<vmem>>, vector<4x256xbf16>,
    %c0_49 = arith.constant 0 : index
    %c0_50 = arith.constant 0 : index
    %310 = vector.load %arg7[%c0_49, %c0_50] : memref<16x72xbf16, #tpu.memory_space<vmem>>, vector<16x72xbf16>
    %c0_51 = arith.constant 0 : index
    %c0_52 = arith.constant 0 : index
    %311 = vector.load %arg16[%c0_51, %c0_52] : memref<216x256xbf16, #tpu.memory_space<vmem>>, vector<72x256xbf16>
    %cst_53 = arith.constant dense<0.000000e+00> : vector<16x256xf32>
    %312 = tpu.matmul %310, %311, %cst_53 {dimension_numbers = #tpu.dot_dimension_numbers<[1], [0], [0], [1], [0, 0, 1, 1], [], []>} : vector<16x72xbf16>, vector<72x256xbf16>, vector<16x256xf32> -> vector<16x256xf32>
    %c0_54 = arith.constant 0 : index
    %c0_55 = arith.constant 0 : index
    %313 = vector.load %arg8[%c0_54, %c0_55] : memref<16x1xf32, #tpu.memory_space<vmem>>, vector<16x1xf32>
    %314 = vector.broadcast %313 : vector<16x1xf32> to vector<16x256xf32>
    %315 = arith.addf %312, %314 : vector<16x256xf32>
    %316 = vector.extract_strided_slice %2 {offsets = [0, 239], sizes = [4, 17], strides = [1, 1]} : vector<4x256xf32> to vector<4x17xf32>
    %317 = vector.extract_strided_slice %2 {offsets = [0, 0], sizes = [4, 239], strides = [1, 1]} : vector<4x256xf32> to vector<4x239xf32>
    %318 = tpu.concatenate %316, %317 in 1 : vector<4x17xf32>, vector<4x239xf32> -> vector<4x256xf32>
    %319 = vector.extract_strided_slice %0 {offsets = [0, 0], sizes = [1, 256], strides = [1, 1]} : vector<9x256xf32> to vector<1x256xf32>
    %320 = vector.broadcast %319 : vector<1x256xf32> to vector<4x256xf32>
    %321 = arith.mulf %318, %320 : vector<4x256xf32>
    %322 = arith.truncf %321 : vector<4x256xf32> to vector<4x256xbf16>
    %c0_56 = arith.constant 0 : index
    %c0_57 = arith.constant 0 : index
    %323 = vector.load %arg16[%c0_56, %c0_57] : memref<216x256xbf16, #tpu.memory_space<vmem>>, vector<4x256xbf16>
    tpu.vector_store %arg16[%c0_56, %c0_57], %322 {strides = array<i32>} : memref<216x256xbf16, #tpu.memory_space<vmem>>, vector<4x256xbf16>,
    %324 = vector.extract_strided_slice %315 {offsets = [0, 239], sizes = [16, 17], strides = [1, 1]} : vector<16x256xf32> to vector<16x17xf32>
    %325 = vector.extract_strided_slice %315 {offsets = [0, 0], sizes = [16, 239], strides = [1, 1]} : vector<16x256xf32> to vector<16x239xf32>
    %326 = tpu.concatenate %324, %325 in 1 : vector<16x17xf32>, vector<16x239xf32> -> vector<16x256xf32>
    %327 = vector.extract_strided_slice %0 {offsets = [0, 0], sizes = [1, 256], strides = [1, 1]} : vector<9x256xf32> to vector<1x256xf32>
    %328 = vector.broadcast %327 : vector<1x256xf32> to vector<16x256xf32>
    %329 = arith.mulf %326, %328 : vector<16x256xf32>
    %330 = arith.truncf %329 : vector<16x256xf32> to vector<16x256xbf16>
    %c4_58 = arith.constant 4 : index
    %c0_59 = arith.constant 0 : index
    %331 = vector.load %arg16[%c4_58, %c0_59] : memref<216x256xbf16, #tpu.memory_space<vmem>>, vector<16x256xbf16>
    tpu.vector_store %arg16[%c4_58, %c0_59], %330 {strides = array<i32>} : memref<216x256xbf16, #tpu.memory_space<vmem>>, vector<16x256xbf16>,
    %332 = vector.extract_strided_slice %4 {offsets = [0, 239], sizes = [4, 17], strides = [1, 1]} : vector<4x256xf32> to vector<4x17xf32>
    %333 = vector.extract_strided_slice %4 {offsets = [0, 0], sizes = [4, 239], strides = [1, 1]} : vector<4x256xf32> to vector<4x239xf32>
    %334 = tpu.concatenate %332, %333 in 1 : vector<4x17xf32>, vector<4x239xf32> -> vector<4x256xf32>
    %335 = vector.extract_strided_slice %0 {offsets = [0, 0], sizes = [1, 256], strides = [1, 1]} : vector<9x256xf32> to vector<1x256xf32>
    %336 = vector.broadcast %335 : vector<1x256xf32> to vector<4x256xf32>
    %337 = arith.mulf %334, %336 : vector<4x256xf32>
    %338 = arith.truncf %337 : vector<4x256xf32> to vector<4x256xbf16>
    %c20_60 = arith.constant 20 : index
    %c0_61 = arith.constant 0 : index
    %339 = vector.load %arg16[%c20_60, %c0_61] : memref<216x256xbf16, #tpu.memory_space<vmem>>, vector<4x256xbf16>
    tpu.vector_store %arg16[%c20_60, %c0_61], %338 {strides = array<i32>} : memref<216x256xbf16, #tpu.memory_space<vmem>>, vector<4x256xbf16>,
    %340 = vector.extract_strided_slice %2 {offsets = [0, 240], sizes = [4, 16], strides = [1, 1]} : vector<4x256xf32> to vector<4x16xf32>
    %341 = vector.extract_strided_slice %2 {offsets = [0, 0], sizes = [4, 240], strides = [1, 1]} : vector<4x256xf32> to vector<4x240xf32>
    %342 = tpu.concatenate %340, %341 in 1 : vector<4x16xf32>, vector<4x240xf32> -> vector<4x256xf32>
    %343 = vector.extract_strided_slice %0 {offsets = [1, 0], sizes = [1, 256], strides = [1, 1]} : vector<9x256xf32> to vector<1x256xf32>
    %344 = vector.broadcast %343 : vector<1x256xf32> to vector<4x256xf32>
    %345 = arith.mulf %342, %344 : vector<4x256xf32>
    %346 = arith.truncf %345 : vector<4x256xf32> to vector<4x256xbf16>
    %c24_62 = arith.constant 24 : index
    %c0_63 = arith.constant 0 : index
    %347 = vector.load %arg16[%c24_62, %c0_63] : memref<216x256xbf16, #tpu.memory_space<vmem>>, vector<4x256xbf16>
    tpu.vector_store %arg16[%c24_62, %c0_63], %346 {strides = array<i32>} : memref<216x256xbf16, #tpu.memory_space<vmem>>, vector<4x256xbf16>,
    %348 = vector.extract_strided_slice %315 {offsets = [0, 240], sizes = [16, 16], strides = [1, 1]} : vector<16x256xf32> to vector<16x16xf32>
    %349 = vector.extract_strided_slice %315 {offsets = [0, 0], sizes = [16, 240], strides = [1, 1]} : vector<16x256xf32> to vector<16x240xf32>
    %350 = tpu.concatenate %348, %349 in 1 : vector<16x16xf32>, vector<16x240xf32> -> vector<16x256xf32>
    %351 = vector.extract_strided_slice %0 {offsets = [1, 0], sizes = [1, 256], strides = [1, 1]} : vector<9x256xf32> to vector<1x256xf32>
    %352 = vector.broadcast %351 : vector<1x256xf32> to vector<16x256xf32>
    %353 = arith.mulf %350, %352 : vector<16x256xf32>
    %354 = arith.truncf %353 : vector<16x256xf32> to vector<16x256xbf16>
    %c28_64 = arith.constant 28 : index
    %c0_65 = arith.constant 0 : index
    %355 = vector.load %arg16[%c28_64, %c0_65] : memref<216x256xbf16, #tpu.memory_space<vmem>>, vector<16x256xbf16>
    tpu.vector_store %arg16[%c28_64, %c0_65], %354 {strides = array<i32>} : memref<216x256xbf16, #tpu.memory_space<vmem>>, vector<16x256xbf16>,
    %356 = vector.extract_strided_slice %4 {offsets = [0, 240], sizes = [4, 16], strides = [1, 1]} : vector<4x256xf32> to vector<4x16xf32>
    %357 = vector.extract_strided_slice %4 {offsets = [0, 0], sizes = [4, 240], strides = [1, 1]} : vector<4x256xf32> to vector<4x240xf32>
    %358 = tpu.concatenate %356, %357 in 1 : vector<4x16xf32>, vector<4x240xf32> -> vector<4x256xf32>
    %359 = vector.extract_strided_slice %0 {offsets = [1, 0], sizes = [1, 256], strides = [1, 1]} : vector<9x256xf32> to vector<1x256xf32>
    %360 = vector.broadcast %359 : vector<1x256xf32> to vector<4x256xf32>
    %361 = arith.mulf %358, %360 : vector<4x256xf32>
    %362 = arith.truncf %361 : vector<4x256xf32> to vector<4x256xbf16>
    %c44_66 = arith.constant 44 : index
    %c0_67 = arith.constant 0 : index
    %363 = vector.load %arg16[%c44_66, %c0_67] : memref<216x256xbf16, #tpu.memory_space<vmem>>, vector<4x256xbf16>
    tpu.vector_store %arg16[%c44_66, %c0_67], %362 {strides = array<i32>} : memref<216x256xbf16, #tpu.memory_space<vmem>>, vector<4x256xbf16>,
    %364 = vector.extract_strided_slice %2 {offsets = [0, 241], sizes = [4, 15], strides = [1, 1]} : vector<4x256xf32> to vector<4x15xf32>
    %365 = vector.extract_strided_slice %2 {offsets = [0, 0], sizes = [4, 241], strides = [1, 1]} : vector<4x256xf32> to vector<4x241xf32>
    %366 = tpu.concatenate %364, %365 in 1 : vector<4x15xf32>, vector<4x241xf32> -> vector<4x256xf32>
    %367 = vector.extract_strided_slice %0 {offsets = [2, 0], sizes = [1, 256], strides = [1, 1]} : vector<9x256xf32> to vector<1x256xf32>
    %368 = vector.broadcast %367 : vector<1x256xf32> to vector<4x256xf32>
    %369 = arith.mulf %366, %368 : vector<4x256xf32>
    %370 = arith.truncf %369 : vector<4x256xf32> to vector<4x256xbf16>
    %c48_68 = arith.constant 48 : index
    %c0_69 = arith.constant 0 : index
    %371 = vector.load %arg16[%c48_68, %c0_69] : memref<216x256xbf16, #tpu.memory_space<vmem>>, vector<4x256xbf16>
    tpu.vector_store %arg16[%c48_68, %c0_69], %370 {strides = array<i32>} : memref<216x256xbf16, #tpu.memory_space<vmem>>, vector<4x256xbf16>,
    %372 = vector.extract_strided_slice %315 {offsets = [0, 241], sizes = [16, 15], strides = [1, 1]} : vector<16x256xf32> to vector<16x15xf32>
    %373 = vector.extract_strided_slice %315 {offsets = [0, 0], sizes = [16, 241], strides = [1, 1]} : vector<16x256xf32> to vector<16x241xf32>
    %374 = tpu.concatenate %372, %373 in 1 : vector<16x15xf32>, vector<16x241xf32> -> vector<16x256xf32>
    %375 = vector.extract_strided_slice %0 {offsets = [2, 0], sizes = [1, 256], strides = [1, 1]} : vector<9x256xf32> to vector<1x256xf32>
    %376 = vector.broadcast %375 : vector<1x256xf32> to vector<16x256xf32>
    %377 = arith.mulf %374, %376 : vector<16x256xf32>
    %378 = arith.truncf %377 : vector<16x256xf32> to vector<16x256xbf16>
    %c52_70 = arith.constant 52 : index
    %c0_71 = arith.constant 0 : index
    %379 = vector.load %arg16[%c52_70, %c0_71] : memref<216x256xbf16, #tpu.memory_space<vmem>>, vector<16x256xbf16>
    tpu.vector_store %arg16[%c52_70, %c0_71], %378 {strides = array<i32>} : memref<216x256xbf16, #tpu.memory_space<vmem>>, vector<16x256xbf16>,
    %380 = vector.extract_strided_slice %4 {offsets = [0, 241], sizes = [4, 15], strides = [1, 1]} : vector<4x256xf32> to vector<4x15xf32>
    %381 = vector.extract_strided_slice %4 {offsets = [0, 0], sizes = [4, 241], strides = [1, 1]} : vector<4x256xf32> to vector<4x241xf32>
    %382 = tpu.concatenate %380, %381 in 1 : vector<4x15xf32>, vector<4x241xf32> -> vector<4x256xf32>
    %383 = vector.extract_strided_slice %0 {offsets = [2, 0], sizes = [1, 256], strides = [1, 1]} : vector<9x256xf32> to vector<1x256xf32>
    %384 = vector.broadcast %383 : vector<1x256xf32> to vector<4x256xf32>
    %385 = arith.mulf %382, %384 : vector<4x256xf32>
    %386 = arith.truncf %385 : vector<4x256xf32> to vector<4x256xbf16>
    %c68_72 = arith.constant 68 : index
    %c0_73 = arith.constant 0 : index
    %387 = vector.load %arg16[%c68_72, %c0_73] : memref<216x256xbf16, #tpu.memory_space<vmem>>, vector<4x256xbf16>
    tpu.vector_store %arg16[%c68_72, %c0_73], %386 {strides = array<i32>} : memref<216x256xbf16, #tpu.memory_space<vmem>>, vector<4x256xbf16>,
    %388 = vector.extract_strided_slice %2 {offsets = [0, 255], sizes = [4, 1], strides = [1, 1]} : vector<4x256xf32> to vector<4x1xf32>
    %389 = vector.extract_strided_slice %2 {offsets = [0, 0], sizes = [4, 255], strides = [1, 1]} : vector<4x256xf32> to vector<4x255xf32>
    %390 = tpu.concatenate %388, %389 in 1 : vector<4x1xf32>, vector<4x255xf32> -> vector<4x256xf32>
    %391 = vector.extract_strided_slice %0 {offsets = [3, 0], sizes = [1, 256], strides = [1, 1]} : vector<9x256xf32> to vector<1x256xf32>
    %392 = vector.broadcast %391 : vector<1x256xf32> to vector<4x256xf32>
    %393 = arith.mulf %390, %392 : vector<4x256xf32>
    %394 = arith.truncf %393 : vector<4x256xf32> to vector<4x256xbf16>
    %c72 = arith.constant 72 : index
    %c0_74 = arith.constant 0 : index
    %395 = vector.load %arg16[%c72, %c0_74] : memref<216x256xbf16, #tpu.memory_space<vmem>>, vector<4x256xbf16>
    tpu.vector_store %arg16[%c72, %c0_74], %394 {strides = array<i32>} : memref<216x256xbf16, #tpu.memory_space<vmem>>, vector<4x256xbf16>,
    %396 = vector.extract_strided_slice %315 {offsets = [0, 255], sizes = [16, 1], strides = [1, 1]} : vector<16x256xf32> to vector<16x1xf32>
    %397 = vector.extract_strided_slice %315 {offsets = [0, 0], sizes = [16, 255], strides = [1, 1]} : vector<16x256xf32> to vector<16x255xf32>
    %398 = tpu.concatenate %396, %397 in 1 : vector<16x1xf32>, vector<16x255xf32> -> vector<16x256xf32>
    %399 = vector.extract_strided_slice %0 {offsets = [3, 0], sizes = [1, 256], strides = [1, 1]} : vector<9x256xf32> to vector<1x256xf32>
    %400 = vector.broadcast %399 : vector<1x256xf32> to vector<16x256xf32>
    %401 = arith.mulf %398, %400 : vector<16x256xf32>
    %402 = arith.truncf %401 : vector<16x256xf32> to vector<16x256xbf16>
    %c76 = arith.constant 76 : index
    %c0_75 = arith.constant 0 : index
    %403 = vector.load %arg16[%c76, %c0_75] : memref<216x256xbf16, #tpu.memory_space<vmem>>, vector<16x256xbf16>
    tpu.vector_store %arg16[%c76, %c0_75], %402 {strides = array<i32>} : memref<216x256xbf16, #tpu.memory_space<vmem>>, vector<16x256xbf16>,
    %404 = vector.extract_strided_slice %4 {offsets = [0, 255], sizes = [4, 1], strides = [1, 1]} : vector<4x256xf32> to vector<4x1xf32>
    %405 = vector.extract_strided_slice %4 {offsets = [0, 0], sizes = [4, 255], strides = [1, 1]} : vector<4x256xf32> to vector<4x255xf32>
    %406 = tpu.concatenate %404, %405 in 1 : vector<4x1xf32>, vector<4x255xf32> -> vector<4x256xf32>
    %407 = vector.extract_strided_slice %0 {offsets = [3, 0], sizes = [1, 256], strides = [1, 1]} : vector<9x256xf32> to vector<1x256xf32>
    %408 = vector.broadcast %407 : vector<1x256xf32> to vector<4x256xf32>
    %409 = arith.mulf %406, %408 : vector<4x256xf32>
    %410 = arith.truncf %409 : vector<4x256xf32> to vector<4x256xbf16>
    %c92 = arith.constant 92 : index
    %c0_76 = arith.constant 0 : index
    %411 = vector.load %arg16[%c92, %c0_76] : memref<216x256xbf16, #tpu.memory_space<vmem>>, vector<4x256xbf16>
    tpu.vector_store %arg16[%c92, %c0_76], %410 {strides = array<i32>} : memref<216x256xbf16, #tpu.memory_space<vmem>>, vector<4x256xbf16>,
    %412 = arith.truncf %2 : vector<4x256xf32> to vector<4x256xbf16>
    %c96 = arith.constant 96 : index
    %c0_77 = arith.constant 0 : index
    %413 = vector.load %arg16[%c96, %c0_77] : memref<216x256xbf16, #tpu.memory_space<vmem>>, vector<4x256xbf16>
    tpu.vector_store %arg16[%c96, %c0_77], %412 {strides = array<i32>} : memref<216x256xbf16, #tpu.memory_space<vmem>>, vector<4x256xbf16>,
    %414 = arith.truncf %315 : vector<16x256xf32> to vector<16x256xbf16>
    %c100 = arith.constant 100 : index
    %c0_78 = arith.constant 0 : index
    %415 = vector.load %arg16[%c100, %c0_78] : memref<216x256xbf16, #tpu.memory_space<vmem>>, vector<16x256xbf16>
    tpu.vector_store %arg16[%c100, %c0_78], %414 {strides = array<i32>} : memref<216x256xbf16, #tpu.memory_space<vmem>>, vector<16x256xbf16>,
    %416 = arith.truncf %4 : vector<4x256xf32> to vector<4x256xbf16>
    %c116 = arith.constant 116 : index
    %c0_79 = arith.constant 0 : index
    %417 = vector.load %arg16[%c116, %c0_79] : memref<216x256xbf16, #tpu.memory_space<vmem>>, vector<4x256xbf16>
    tpu.vector_store %arg16[%c116, %c0_79], %416 {strides = array<i32>} : memref<216x256xbf16, #tpu.memory_space<vmem>>, vector<4x256xbf16>,
    %418 = vector.extract_strided_slice %2 {offsets = [0, 1], sizes = [4, 255], strides = [1, 1]} : vector<4x256xf32> to vector<4x255xf32>
    %419 = vector.extract_strided_slice %2 {offsets = [0, 0], sizes = [4, 1], strides = [1, 1]} : vector<4x256xf32> to vector<4x1xf32>
    %420 = tpu.concatenate %418, %419 in 1 : vector<4x255xf32>, vector<4x1xf32> -> vector<4x256xf32>
    %421 = vector.extract_strided_slice %0 {offsets = [5, 0], sizes = [1, 256], strides = [1, 1]} : vector<9x256xf32> to vector<1x256xf32>
    %422 = vector.broadcast %421 : vector<1x256xf32> to vector<4x256xf32>
    %423 = arith.mulf %420, %422 : vector<4x256xf32>
    %424 = arith.truncf %423 : vector<4x256xf32> to vector<4x256xbf16>
    %c120 = arith.constant 120 : index
    %c0_80 = arith.constant 0 : index
    %425 = vector.load %arg16[%c120, %c0_80] : memref<216x256xbf16, #tpu.memory_space<vmem>>, vector<4x256xbf16>
    tpu.vector_store %arg16[%c120, %c0_80], %424 {strides = array<i32>} : memref<216x256xbf16, #tpu.memory_space<vmem>>, vector<4x256xbf16>,
    %426 = vector.extract_strided_slice %315 {offsets = [0, 1], sizes = [16, 255], strides = [1, 1]} : vector<16x256xf32> to vector<16x255xf32>
    %427 = vector.extract_strided_slice %315 {offsets = [0, 0], sizes = [16, 1], strides = [1, 1]} : vector<16x256xf32> to vector<16x1xf32>
    %428 = tpu.concatenate %426, %427 in 1 : vector<16x255xf32>, vector<16x1xf32> -> vector<16x256xf32>
    %429 = vector.extract_strided_slice %0 {offsets = [5, 0], sizes = [1, 256], strides = [1, 1]} : vector<9x256xf32> to vector<1x256xf32>
    %430 = vector.broadcast %429 : vector<1x256xf32> to vector<16x256xf32>
    %431 = arith.mulf %428, %430 : vector<16x256xf32>
    %432 = arith.truncf %431 : vector<16x256xf32> to vector<16x256xbf16>
    %c124 = arith.constant 124 : index
    %c0_81 = arith.constant 0 : index
    %433 = vector.load %arg16[%c124, %c0_81] : memref<216x256xbf16, #tpu.memory_space<vmem>>, vector<16x256xbf16>
    tpu.vector_store %arg16[%c124, %c0_81], %432 {strides = array<i32>} : memref<216x256xbf16, #tpu.memory_space<vmem>>, vector<16x256xbf16>,
    %434 = vector.extract_strided_slice %4 {offsets = [0, 1], sizes = [4, 255], strides = [1, 1]} : vector<4x256xf32> to vector<4x255xf32>
    %435 = vector.extract_strided_slice %4 {offsets = [0, 0], sizes = [4, 1], strides = [1, 1]} : vector<4x256xf32> to vector<4x1xf32>
    %436 = tpu.concatenate %434, %435 in 1 : vector<4x255xf32>, vector<4x1xf32> -> vector<4x256xf32>
    %437 = vector.extract_strided_slice %0 {offsets = [5, 0], sizes = [1, 256], strides = [1, 1]} : vector<9x256xf32> to vector<1x256xf32>
    %438 = vector.broadcast %437 : vector<1x256xf32> to vector<4x256xf32>
    %439 = arith.mulf %436, %438 : vector<4x256xf32>
    %440 = arith.truncf %439 : vector<4x256xf32> to vector<4x256xbf16>
    %c140 = arith.constant 140 : index
    %c0_82 = arith.constant 0 : index
    %441 = vector.load %arg16[%c140, %c0_82] : memref<216x256xbf16, #tpu.memory_space<vmem>>, vector<4x256xbf16>
    tpu.vector_store %arg16[%c140, %c0_82], %440 {strides = array<i32>} : memref<216x256xbf16, #tpu.memory_space<vmem>>, vector<4x256xbf16>,
    %442 = vector.extract_strided_slice %2 {offsets = [0, 15], sizes = [4, 241], strides = [1, 1]} : vector<4x256xf32> to vector<4x241xf32>
    %443 = vector.extract_strided_slice %2 {offsets = [0, 0], sizes = [4, 15], strides = [1, 1]} : vector<4x256xf32> to vector<4x15xf32>
    %444 = tpu.concatenate %442, %443 in 1 : vector<4x241xf32>, vector<4x15xf32> -> vector<4x256xf32>
    %445 = vector.extract_strided_slice %0 {offsets = [6, 0], sizes = [1, 256], strides = [1, 1]} : vector<9x256xf32> to vector<1x256xf32>
    %446 = vector.broadcast %445 : vector<1x256xf32> to vector<4x256xf32>
    %447 = arith.mulf %444, %446 : vector<4x256xf32>
    %448 = arith.truncf %447 : vector<4x256xf32> to vector<4x256xbf16>
    %c144 = arith.constant 144 : index
    %c0_83 = arith.constant 0 : index
    %449 = vector.load %arg16[%c144, %c0_83] : memref<216x256xbf16, #tpu.memory_space<vmem>>, vector<4x256xbf16>
    tpu.vector_store %arg16[%c144, %c0_83], %448 {strides = array<i32>} : memref<216x256xbf16, #tpu.memory_space<vmem>>, vector<4x256xbf16>,
    %450 = vector.extract_strided_slice %315 {offsets = [0, 15], sizes = [16, 241], strides = [1, 1]} : vector<16x256xf32> to vector<16x241xf32>
    %451 = vector.extract_strided_slice %315 {offsets = [0, 0], sizes = [16, 15], strides = [1, 1]} : vector<16x256xf32> to vector<16x15xf32>
    %452 = tpu.concatenate %450, %451 in 1 : vector<16x241xf32>, vector<16x15xf32> -> vector<16x256xf32>
    %453 = vector.extract_strided_slice %0 {offsets = [6, 0], sizes = [1, 256], strides = [1, 1]} : vector<9x256xf32> to vector<1x256xf32>
    %454 = vector.broadcast %453 : vector<1x256xf32> to vector<16x256xf32>
    %455 = arith.mulf %452, %454 : vector<16x256xf32>
    %456 = arith.truncf %455 : vector<16x256xf32> to vector<16x256xbf16>
    %c148 = arith.constant 148 : index
    %c0_84 = arith.constant 0 : index
    %457 = vector.load %arg16[%c148, %c0_84] : memref<216x256xbf16, #tpu.memory_space<vmem>>, vector<16x256xbf16>
    tpu.vector_store %arg16[%c148, %c0_84], %456 {strides = array<i32>} : memref<216x256xbf16, #tpu.memory_space<vmem>>, vector<16x256xbf16>,
    %458 = vector.extract_strided_slice %4 {offsets = [0, 15], sizes = [4, 241], strides = [1, 1]} : vector<4x256xf32> to vector<4x241xf32>
    %459 = vector.extract_strided_slice %4 {offsets = [0, 0], sizes = [4, 15], strides = [1, 1]} : vector<4x256xf32> to vector<4x15xf32>
    %460 = tpu.concatenate %458, %459 in 1 : vector<4x241xf32>, vector<4x15xf32> -> vector<4x256xf32>
    %461 = vector.extract_strided_slice %0 {offsets = [6, 0], sizes = [1, 256], strides = [1, 1]} : vector<9x256xf32> to vector<1x256xf32>
    %462 = vector.broadcast %461 : vector<1x256xf32> to vector<4x256xf32>
    %463 = arith.mulf %460, %462 : vector<4x256xf32>
    %464 = arith.truncf %463 : vector<4x256xf32> to vector<4x256xbf16>
    %c164 = arith.constant 164 : index
    %c0_85 = arith.constant 0 : index
    %465 = vector.load %arg16[%c164, %c0_85] : memref<216x256xbf16, #tpu.memory_space<vmem>>, vector<4x256xbf16>
    tpu.vector_store %arg16[%c164, %c0_85], %464 {strides = array<i32>} : memref<216x256xbf16, #tpu.memory_space<vmem>>, vector<4x256xbf16>,
    %466 = vector.extract_strided_slice %2 {offsets = [0, 16], sizes = [4, 240], strides = [1, 1]} : vector<4x256xf32> to vector<4x240xf32>
    %467 = vector.extract_strided_slice %2 {offsets = [0, 0], sizes = [4, 16], strides = [1, 1]} : vector<4x256xf32> to vector<4x16xf32>
    %468 = tpu.concatenate %466, %467 in 1 : vector<4x240xf32>, vector<4x16xf32> -> vector<4x256xf32>
    %469 = vector.extract_strided_slice %0 {offsets = [7, 0], sizes = [1, 256], strides = [1, 1]} : vector<9x256xf32> to vector<1x256xf32>
    %470 = vector.broadcast %469 : vector<1x256xf32> to vector<4x256xf32>
    %471 = arith.mulf %468, %470 : vector<4x256xf32>
    %472 = arith.truncf %471 : vector<4x256xf32> to vector<4x256xbf16>
    %c168 = arith.constant 168 : index
    %c0_86 = arith.constant 0 : index
    %473 = vector.load %arg16[%c168, %c0_86] : memref<216x256xbf16, #tpu.memory_space<vmem>>, vector<4x256xbf16>
    tpu.vector_store %arg16[%c168, %c0_86], %472 {strides = array<i32>} : memref<216x256xbf16, #tpu.memory_space<vmem>>, vector<4x256xbf16>,
    %474 = vector.extract_strided_slice %315 {offsets = [0, 16], sizes = [16, 240], strides = [1, 1]} : vector<16x256xf32> to vector<16x240xf32>
    %475 = vector.extract_strided_slice %315 {offsets = [0, 0], sizes = [16, 16], strides = [1, 1]} : vector<16x256xf32> to vector<16x16xf32>
    %476 = tpu.concatenate %474, %475 in 1 : vector<16x240xf32>, vector<16x16xf32> -> vector<16x256xf32>
    %477 = vector.extract_strided_slice %0 {offsets = [7, 0], sizes = [1, 256], strides = [1, 1]} : vector<9x256xf32> to vector<1x256xf32>
    %478 = vector.broadcast %477 : vector<1x256xf32> to vector<16x256xf32>
    %479 = arith.mulf %476, %478 : vector<16x256xf32>
    %480 = arith.truncf %479 : vector<16x256xf32> to vector<16x256xbf16>
    %c172 = arith.constant 172 : index
    %c0_87 = arith.constant 0 : index
    %481 = vector.load %arg16[%c172, %c0_87] : memref<216x256xbf16, #tpu.memory_space<vmem>>, vector<16x256xbf16>
    tpu.vector_store %arg16[%c172, %c0_87], %480 {strides = array<i32>} : memref<216x256xbf16, #tpu.memory_space<vmem>>, vector<16x256xbf16>,
    %482 = vector.extract_strided_slice %4 {offsets = [0, 16], sizes = [4, 240], strides = [1, 1]} : vector<4x256xf32> to vector<4x240xf32>
    %483 = vector.extract_strided_slice %4 {offsets = [0, 0], sizes = [4, 16], strides = [1, 1]} : vector<4x256xf32> to vector<4x16xf32>
    %484 = tpu.concatenate %482, %483 in 1 : vector<4x240xf32>, vector<4x16xf32> -> vector<4x256xf32>
    %485 = vector.extract_strided_slice %0 {offsets = [7, 0], sizes = [1, 256], strides = [1, 1]} : vector<9x256xf32> to vector<1x256xf32>
    %486 = vector.broadcast %485 : vector<1x256xf32> to vector<4x256xf32>
    %487 = arith.mulf %484, %486 : vector<4x256xf32>
    %488 = arith.truncf %487 : vector<4x256xf32> to vector<4x256xbf16>
    %c188 = arith.constant 188 : index
    %c0_88 = arith.constant 0 : index
    %489 = vector.load %arg16[%c188, %c0_88] : memref<216x256xbf16, #tpu.memory_space<vmem>>, vector<4x256xbf16>
    tpu.vector_store %arg16[%c188, %c0_88], %488 {strides = array<i32>} : memref<216x256xbf16, #tpu.memory_space<vmem>>, vector<4x256xbf16>,
    %490 = vector.extract_strided_slice %2 {offsets = [0, 17], sizes = [4, 239], strides = [1, 1]} : vector<4x256xf32> to vector<4x239xf32>
    %491 = vector.extract_strided_slice %2 {offsets = [0, 0], sizes = [4, 17], strides = [1, 1]} : vector<4x256xf32> to vector<4x17xf32>
    %492 = tpu.concatenate %490, %491 in 1 : vector<4x239xf32>, vector<4x17xf32> -> vector<4x256xf32>
    %493 = vector.extract_strided_slice %0 {offsets = [8, 0], sizes = [1, 256], strides = [1, 1]} : vector<9x256xf32> to vector<1x256xf32>
    %494 = vector.broadcast %493 : vector<1x256xf32> to vector<4x256xf32>
    %495 = arith.mulf %492, %494 : vector<4x256xf32>
    %496 = arith.truncf %495 : vector<4x256xf32> to vector<4x256xbf16>
    %c192 = arith.constant 192 : index
    %c0_89 = arith.constant 0 : index
    %497 = vector.load %arg16[%c192, %c0_89] : memref<216x256xbf16, #tpu.memory_space<vmem>>, vector<4x256xbf16>
    tpu.vector_store %arg16[%c192, %c0_89], %496 {strides = array<i32>} : memref<216x256xbf16, #tpu.memory_space<vmem>>, vector<4x256xbf16>,
    %498 = vector.extract_strided_slice %315 {offsets = [0, 17], sizes = [16, 239], strides = [1, 1]} : vector<16x256xf32> to vector<16x239xf32>
    %499 = vector.extract_strided_slice %315 {offsets = [0, 0], sizes = [16, 17], strides = [1, 1]} : vector<16x256xf32> to vector<16x17xf32>
    %500 = tpu.concatenate %498, %499 in 1 : vector<16x239xf32>, vector<16x17xf32> -> vector<16x256xf32>
    %501 = vector.extract_strided_slice %0 {offsets = [8, 0], sizes = [1, 256], strides = [1, 1]} : vector<9x256xf32> to vector<1x256xf32>
    %502 = vector.broadcast %501 : vector<1x256xf32> to vector<16x256xf32>
    %503 = arith.mulf %500, %502 : vector<16x256xf32>
    %504 = arith.truncf %503 : vector<16x256xf32> to vector<16x256xbf16>
    %c196 = arith.constant 196 : index
    %c0_90 = arith.constant 0 : index
    %505 = vector.load %arg16[%c196, %c0_90] : memref<216x256xbf16, #tpu.memory_space<vmem>>, vector<16x256xbf16>
    tpu.vector_store %arg16[%c196, %c0_90], %504 {strides = array<i32>} : memref<216x256xbf16, #tpu.memory_space<vmem>>, vector<16x256xbf16>,
    %506 = vector.extract_strided_slice %4 {offsets = [0, 17], sizes = [4, 239], strides = [1, 1]} : vector<4x256xf32> to vector<4x239xf32>
    %507 = vector.extract_strided_slice %4 {offsets = [0, 0], sizes = [4, 17], strides = [1, 1]} : vector<4x256xf32> to vector<4x17xf32>
    %508 = tpu.concatenate %506, %507 in 1 : vector<4x239xf32>, vector<4x17xf32> -> vector<4x256xf32>
    %509 = vector.extract_strided_slice %0 {offsets = [8, 0], sizes = [1, 256], strides = [1, 1]} : vector<9x256xf32> to vector<1x256xf32>
    %510 = vector.broadcast %509 : vector<1x256xf32> to vector<4x256xf32>
    %511 = arith.mulf %508, %510 : vector<4x256xf32>
    %512 = arith.truncf %511 : vector<4x256xf32> to vector<4x256xbf16>
    %c212 = arith.constant 212 : index
    %c0_91 = arith.constant 0 : index
    %513 = vector.load %arg16[%c212, %c0_91] : memref<216x256xbf16, #tpu.memory_space<vmem>>, vector<4x256xbf16>
    tpu.vector_store %arg16[%c212, %c0_91], %512 {strides = array<i32>} : memref<216x256xbf16, #tpu.memory_space<vmem>>, vector<4x256xbf16>,
    %c0_92 = arith.constant 0 : index
    %c0_93 = arith.constant 0 : index
    %514 = vector.load %arg9[%c0_92, %c0_93] : memref<8x216xbf16, #tpu.memory_space<vmem>>, vector<8x216xbf16>
    %c0_94 = arith.constant 0 : index
    %c0_95 = arith.constant 0 : index
    %515 = vector.load %arg16[%c0_94, %c0_95] : memref<216x256xbf16, #tpu.memory_space<vmem>>, vector<216x256xbf16>
    %cst_96 = arith.constant dense<0.000000e+00> : vector<8x256xf32>
    %516 = tpu.matmul %514, %515, %cst_96 {dimension_numbers = #tpu.dot_dimension_numbers<[1], [0], [0], [1], [0, 0, 1, 1], [], []>} : vector<8x216xbf16>, vector<216x256xbf16>, vector<8x256xf32> -> vector<8x256xf32>
    %c0_97 = arith.constant 0 : index
    %c0_98 = arith.constant 0 : index
    %517 = vector.load %arg10[%c0_97, %c0_98] : memref<8x1xf32, #tpu.memory_space<vmem>>, vector<8x1xf32>
    %518 = vector.broadcast %517 : vector<8x1xf32> to vector<8x256xf32>
    %519 = arith.addf %516, %518 : vector<8x256xf32>
    %520 = vector.extract_strided_slice %519 {offsets = [0, 239], sizes = [8, 17], strides = [1, 1]} : vector<8x256xf32> to vector<8x17xf32>
    %521 = vector.extract_strided_slice %519 {offsets = [0, 0], sizes = [8, 239], strides = [1, 1]} : vector<8x256xf32> to vector<8x239xf32>
    %522 = tpu.concatenate %520, %521 in 1 : vector<8x17xf32>, vector<8x239xf32> -> vector<8x256xf32>
    %523 = vector.extract_strided_slice %0 {offsets = [0, 0], sizes = [1, 256], strides = [1, 1]} : vector<9x256xf32> to vector<1x256xf32>
    %524 = vector.broadcast %523 : vector<1x256xf32> to vector<8x256xf32>
    %525 = arith.mulf %522, %524 : vector<8x256xf32>
    %526 = arith.truncf %525 : vector<8x256xf32> to vector<8x256xbf16>
    %c0_99 = arith.constant 0 : index
    %c0_100 = arith.constant 0 : index
    %527 = vector.load %arg16[%c0_99, %c0_100] : memref<216x256xbf16, #tpu.memory_space<vmem>>, vector<8x256xbf16>
    tpu.vector_store %arg16[%c0_99, %c0_100], %526 {strides = array<i32>} : memref<216x256xbf16, #tpu.memory_space<vmem>>, vector<8x256xbf16>,
    %528 = vector.extract_strided_slice %177 {offsets = [0, 239], sizes = [8, 17], strides = [1, 1]} : vector<8x256xf32> to vector<8x17xf32>
    %529 = vector.extract_strided_slice %177 {offsets = [0, 0], sizes = [8, 239], strides = [1, 1]} : vector<8x256xf32> to vector<8x239xf32>
    %530 = tpu.concatenate %528, %529 in 1 : vector<8x17xf32>, vector<8x239xf32> -> vector<8x256xf32>
    %531 = vector.extract_strided_slice %0 {offsets = [0, 0], sizes = [1, 256], strides = [1, 1]} : vector<9x256xf32> to vector<1x256xf32>
    %532 = vector.broadcast %531 : vector<1x256xf32> to vector<8x256xf32>
    %533 = arith.mulf %530, %532 : vector<8x256xf32>
    %534 = arith.truncf %533 : vector<8x256xf32> to vector<8x256xbf16>
    %c8_101 = arith.constant 8 : index
    %c0_102 = arith.constant 0 : index
    %535 = vector.load %arg16[%c8_101, %c0_102] : memref<216x256xbf16, #tpu.memory_space<vmem>>, vector<8x256xbf16>
    tpu.vector_store %arg16[%c8_101, %c0_102], %534 {strides = array<i32>} : memref<216x256xbf16, #tpu.memory_space<vmem>>, vector<8x256xbf16>,
    %536 = vector.extract_strided_slice %519 {offsets = [0, 240], sizes = [8, 16], strides = [1, 1]} : vector<8x256xf32> to vector<8x16xf32>
    %537 = vector.extract_strided_slice %519 {offsets = [0, 0], sizes = [8, 240], strides = [1, 1]} : vector<8x256xf32> to vector<8x240xf32>
    %538 = tpu.concatenate %536, %537 in 1 : vector<8x16xf32>, vector<8x240xf32> -> vector<8x256xf32>
    %539 = vector.extract_strided_slice %0 {offsets = [1, 0], sizes = [1, 256], strides = [1, 1]} : vector<9x256xf32> to vector<1x256xf32>
    %540 = vector.broadcast %539 : vector<1x256xf32> to vector<8x256xf32>
    %541 = arith.mulf %538, %540 : vector<8x256xf32>
    %542 = arith.truncf %541 : vector<8x256xf32> to vector<8x256xbf16>
    %c16_103 = arith.constant 16 : index
    %c0_104 = arith.constant 0 : index
    %543 = vector.load %arg16[%c16_103, %c0_104] : memref<216x256xbf16, #tpu.memory_space<vmem>>, vector<8x256xbf16>
    tpu.vector_store %arg16[%c16_103, %c0_104], %542 {strides = array<i32>} : memref<216x256xbf16, #tpu.memory_space<vmem>>, vector<8x256xbf16>,
    %544 = vector.extract_strided_slice %177 {offsets = [0, 240], sizes = [8, 16], strides = [1, 1]} : vector<8x256xf32> to vector<8x16xf32>
    %545 = vector.extract_strided_slice %177 {offsets = [0, 0], sizes = [8, 240], strides = [1, 1]} : vector<8x256xf32> to vector<8x240xf32>
    %546 = tpu.concatenate %544, %545 in 1 : vector<8x16xf32>, vector<8x240xf32> -> vector<8x256xf32>
    %547 = vector.extract_strided_slice %0 {offsets = [1, 0], sizes = [1, 256], strides = [1, 1]} : vector<9x256xf32> to vector<1x256xf32>
    %548 = vector.broadcast %547 : vector<1x256xf32> to vector<8x256xf32>
    %549 = arith.mulf %546, %548 : vector<8x256xf32>
    %550 = arith.truncf %549 : vector<8x256xf32> to vector<8x256xbf16>
    %c24_105 = arith.constant 24 : index
    %c0_106 = arith.constant 0 : index
    %551 = vector.load %arg16[%c24_105, %c0_106] : memref<216x256xbf16, #tpu.memory_space<vmem>>, vector<8x256xbf16>
    tpu.vector_store %arg16[%c24_105, %c0_106], %550 {strides = array<i32>} : memref<216x256xbf16, #tpu.memory_space<vmem>>, vector<8x256xbf16>,
    %552 = vector.extract_strided_slice %519 {offsets = [0, 241], sizes = [8, 15], strides = [1, 1]} : vector<8x256xf32> to vector<8x15xf32>
    %553 = vector.extract_strided_slice %519 {offsets = [0, 0], sizes = [8, 241], strides = [1, 1]} : vector<8x256xf32> to vector<8x241xf32>
    %554 = tpu.concatenate %552, %553 in 1 : vector<8x15xf32>, vector<8x241xf32> -> vector<8x256xf32>
    %555 = vector.extract_strided_slice %0 {offsets = [2, 0], sizes = [1, 256], strides = [1, 1]} : vector<9x256xf32> to vector<1x256xf32>
    %556 = vector.broadcast %555 : vector<1x256xf32> to vector<8x256xf32>
    %557 = arith.mulf %554, %556 : vector<8x256xf32>
    %558 = arith.truncf %557 : vector<8x256xf32> to vector<8x256xbf16>
    %c32_107 = arith.constant 32 : index
    %c0_108 = arith.constant 0 : index
    %559 = vector.load %arg16[%c32_107, %c0_108] : memref<216x256xbf16, #tpu.memory_space<vmem>>, vector<8x256xbf16>
    tpu.vector_store %arg16[%c32_107, %c0_108], %558 {strides = array<i32>} : memref<216x256xbf16, #tpu.memory_space<vmem>>, vector<8x256xbf16>,
    %560 = vector.extract_strided_slice %177 {offsets = [0, 241], sizes = [8, 15], strides = [1, 1]} : vector<8x256xf32> to vector<8x15xf32>
    %561 = vector.extract_strided_slice %177 {offsets = [0, 0], sizes = [8, 241], strides = [1, 1]} : vector<8x256xf32> to vector<8x241xf32>
    %562 = tpu.concatenate %560, %561 in 1 : vector<8x15xf32>, vector<8x241xf32> -> vector<8x256xf32>
    %563 = vector.extract_strided_slice %0 {offsets = [2, 0], sizes = [1, 256], strides = [1, 1]} : vector<9x256xf32> to vector<1x256xf32>
    %564 = vector.broadcast %563 : vector<1x256xf32> to vector<8x256xf32>
    %565 = arith.mulf %562, %564 : vector<8x256xf32>
    %566 = arith.truncf %565 : vector<8x256xf32> to vector<8x256xbf16>
    %c40_109 = arith.constant 40 : index
    %c0_110 = arith.constant 0 : index
    %567 = vector.load %arg16[%c40_109, %c0_110] : memref<216x256xbf16, #tpu.memory_space<vmem>>, vector<8x256xbf16>
    tpu.vector_store %arg16[%c40_109, %c0_110], %566 {strides = array<i32>} : memref<216x256xbf16, #tpu.memory_space<vmem>>, vector<8x256xbf16>,
    %568 = vector.extract_strided_slice %519 {offsets = [0, 255], sizes = [8, 1], strides = [1, 1]} : vector<8x256xf32> to vector<8x1xf32>
    %569 = vector.extract_strided_slice %519 {offsets = [0, 0], sizes = [8, 255], strides = [1, 1]} : vector<8x256xf32> to vector<8x255xf32>
    %570 = tpu.concatenate %568, %569 in 1 : vector<8x1xf32>, vector<8x255xf32> -> vector<8x256xf32>
    %571 = vector.extract_strided_slice %0 {offsets = [3, 0], sizes = [1, 256], strides = [1, 1]} : vector<9x256xf32> to vector<1x256xf32>
    %572 = vector.broadcast %571 : vector<1x256xf32> to vector<8x256xf32>
    %573 = arith.mulf %570, %572 : vector<8x256xf32>
    %574 = arith.truncf %573 : vector<8x256xf32> to vector<8x256xbf16>
    %c48_111 = arith.constant 48 : index
    %c0_112 = arith.constant 0 : index
    %575 = vector.load %arg16[%c48_111, %c0_112] : memref<216x256xbf16, #tpu.memory_space<vmem>>, vector<8x256xbf16>
    tpu.vector_store %arg16[%c48_111, %c0_112], %574 {strides = array<i32>} : memref<216x256xbf16, #tpu.memory_space<vmem>>, vector<8x256xbf16>,
    %576 = vector.extract_strided_slice %177 {offsets = [0, 255], sizes = [8, 1], strides = [1, 1]} : vector<8x256xf32> to vector<8x1xf32>
    %577 = vector.extract_strided_slice %177 {offsets = [0, 0], sizes = [8, 255], strides = [1, 1]} : vector<8x256xf32> to vector<8x255xf32>
    %578 = tpu.concatenate %576, %577 in 1 : vector<8x1xf32>, vector<8x255xf32> -> vector<8x256xf32>
    %579 = vector.extract_strided_slice %0 {offsets = [3, 0], sizes = [1, 256], strides = [1, 1]} : vector<9x256xf32> to vector<1x256xf32>
    %580 = vector.broadcast %579 : vector<1x256xf32> to vector<8x256xf32>
    %581 = arith.mulf %578, %580 : vector<8x256xf32>
    %582 = arith.truncf %581 : vector<8x256xf32> to vector<8x256xbf16>
    %c56_113 = arith.constant 56 : index
    %c0_114 = arith.constant 0 : index
    %583 = vector.load %arg16[%c56_113, %c0_114] : memref<216x256xbf16, #tpu.memory_space<vmem>>, vector<8x256xbf16>
    tpu.vector_store %arg16[%c56_113, %c0_114], %582 {strides = array<i32>} : memref<216x256xbf16, #tpu.memory_space<vmem>>, vector<8x256xbf16>,
    %584 = arith.truncf %519 : vector<8x256xf32> to vector<8x256xbf16>
    %c64_115 = arith.constant 64 : index
    %c0_116 = arith.constant 0 : index
    %585 = vector.load %arg16[%c64_115, %c0_116] : memref<216x256xbf16, #tpu.memory_space<vmem>>, vector<8x256xbf16>
    tpu.vector_store %arg16[%c64_115, %c0_116], %584 {strides = array<i32>} : memref<216x256xbf16, #tpu.memory_space<vmem>>, vector<8x256xbf16>,
    %586 = arith.truncf %177 : vector<8x256xf32> to vector<8x256xbf16>
    %c72_117 = arith.constant 72 : index
    %c0_118 = arith.constant 0 : index
    %587 = vector.load %arg16[%c72_117, %c0_118] : memref<216x256xbf16, #tpu.memory_space<vmem>>, vector<8x256xbf16>
    tpu.vector_store %arg16[%c72_117, %c0_118], %586 {strides = array<i32>} : memref<216x256xbf16, #tpu.memory_space<vmem>>, vector<8x256xbf16>,
    %588 = vector.extract_strided_slice %519 {offsets = [0, 1], sizes = [8, 255], strides = [1, 1]} : vector<8x256xf32> to vector<8x255xf32>
    %589 = vector.extract_strided_slice %519 {offsets = [0, 0], sizes = [8, 1], strides = [1, 1]} : vector<8x256xf32> to vector<8x1xf32>
    %590 = tpu.concatenate %588, %589 in 1 : vector<8x255xf32>, vector<8x1xf32> -> vector<8x256xf32>
    %591 = vector.extract_strided_slice %0 {offsets = [5, 0], sizes = [1, 256], strides = [1, 1]} : vector<9x256xf32> to vector<1x256xf32>
    %592 = vector.broadcast %591 : vector<1x256xf32> to vector<8x256xf32>
    %593 = arith.mulf %590, %592 : vector<8x256xf32>
    %594 = arith.truncf %593 : vector<8x256xf32> to vector<8x256xbf16>
    %c80 = arith.constant 80 : index
    %c0_119 = arith.constant 0 : index
    %595 = vector.load %arg16[%c80, %c0_119] : memref<216x256xbf16, #tpu.memory_space<vmem>>, vector<8x256xbf16>
    tpu.vector_store %arg16[%c80, %c0_119], %594 {strides = array<i32>} : memref<216x256xbf16, #tpu.memory_space<vmem>>, vector<8x256xbf16>,
    %596 = vector.extract_strided_slice %177 {offsets = [0, 1], sizes = [8, 255], strides = [1, 1]} : vector<8x256xf32> to vector<8x255xf32>
    %597 = vector.extract_strided_slice %177 {offsets = [0, 0], sizes = [8, 1], strides = [1, 1]} : vector<8x256xf32> to vector<8x1xf32>
    %598 = tpu.concatenate %596, %597 in 1 : vector<8x255xf32>, vector<8x1xf32> -> vector<8x256xf32>
    %599 = vector.extract_strided_slice %0 {offsets = [5, 0], sizes = [1, 256], strides = [1, 1]} : vector<9x256xf32> to vector<1x256xf32>
    %600 = vector.broadcast %599 : vector<1x256xf32> to vector<8x256xf32>
    %601 = arith.mulf %598, %600 : vector<8x256xf32>
    %602 = arith.truncf %601 : vector<8x256xf32> to vector<8x256xbf16>
    %c88 = arith.constant 88 : index
    %c0_120 = arith.constant 0 : index
    %603 = vector.load %arg16[%c88, %c0_120] : memref<216x256xbf16, #tpu.memory_space<vmem>>, vector<8x256xbf16>
    tpu.vector_store %arg16[%c88, %c0_120], %602 {strides = array<i32>} : memref<216x256xbf16, #tpu.memory_space<vmem>>, vector<8x256xbf16>,
    %604 = vector.extract_strided_slice %519 {offsets = [0, 15], sizes = [8, 241], strides = [1, 1]} : vector<8x256xf32> to vector<8x241xf32>
    %605 = vector.extract_strided_slice %519 {offsets = [0, 0], sizes = [8, 15], strides = [1, 1]} : vector<8x256xf32> to vector<8x15xf32>
    %606 = tpu.concatenate %604, %605 in 1 : vector<8x241xf32>, vector<8x15xf32> -> vector<8x256xf32>
    %607 = vector.extract_strided_slice %0 {offsets = [6, 0], sizes = [1, 256], strides = [1, 1]} : vector<9x256xf32> to vector<1x256xf32>
    %608 = vector.broadcast %607 : vector<1x256xf32> to vector<8x256xf32>
    %609 = arith.mulf %606, %608 : vector<8x256xf32>
    %610 = arith.truncf %609 : vector<8x256xf32> to vector<8x256xbf16>
    %c96_121 = arith.constant 96 : index
    %c0_122 = arith.constant 0 : index
    %611 = vector.load %arg16[%c96_121, %c0_122] : memref<216x256xbf16, #tpu.memory_space<vmem>>, vector<8x256xbf16>
    tpu.vector_store %arg16[%c96_121, %c0_122], %610 {strides = array<i32>} : memref<216x256xbf16, #tpu.memory_space<vmem>>, vector<8x256xbf16>,
    %612 = vector.extract_strided_slice %177 {offsets = [0, 15], sizes = [8, 241], strides = [1, 1]} : vector<8x256xf32> to vector<8x241xf32>
    %613 = vector.extract_strided_slice %177 {offsets = [0, 0], sizes = [8, 15], strides = [1, 1]} : vector<8x256xf32> to vector<8x15xf32>
    %614 = tpu.concatenate %612, %613 in 1 : vector<8x241xf32>, vector<8x15xf32> -> vector<8x256xf32>
    %615 = vector.extract_strided_slice %0 {offsets = [6, 0], sizes = [1, 256], strides = [1, 1]} : vector<9x256xf32> to vector<1x256xf32>
    %616 = vector.broadcast %615 : vector<1x256xf32> to vector<8x256xf32>
    %617 = arith.mulf %614, %616 : vector<8x256xf32>
    %618 = arith.truncf %617 : vector<8x256xf32> to vector<8x256xbf16>
    %c104 = arith.constant 104 : index
    %c0_123 = arith.constant 0 : index
    %619 = vector.load %arg16[%c104, %c0_123] : memref<216x256xbf16, #tpu.memory_space<vmem>>, vector<8x256xbf16>
    tpu.vector_store %arg16[%c104, %c0_123], %618 {strides = array<i32>} : memref<216x256xbf16, #tpu.memory_space<vmem>>, vector<8x256xbf16>,
    %620 = vector.extract_strided_slice %519 {offsets = [0, 16], sizes = [8, 240], strides = [1, 1]} : vector<8x256xf32> to vector<8x240xf32>
    %621 = vector.extract_strided_slice %519 {offsets = [0, 0], sizes = [8, 16], strides = [1, 1]} : vector<8x256xf32> to vector<8x16xf32>
    %622 = tpu.concatenate %620, %621 in 1 : vector<8x240xf32>, vector<8x16xf32> -> vector<8x256xf32>
    %623 = vector.extract_strided_slice %0 {offsets = [7, 0], sizes = [1, 256], strides = [1, 1]} : vector<9x256xf32> to vector<1x256xf32>
    %624 = vector.broadcast %623 : vector<1x256xf32> to vector<8x256xf32>
    %625 = arith.mulf %622, %624 : vector<8x256xf32>
    %626 = arith.truncf %625 : vector<8x256xf32> to vector<8x256xbf16>
    %c112 = arith.constant 112 : index
    %c0_124 = arith.constant 0 : index
    %627 = vector.load %arg16[%c112, %c0_124] : memref<216x256xbf16, #tpu.memory_space<vmem>>, vector<8x256xbf16>
    tpu.vector_store %arg16[%c112, %c0_124], %626 {strides = array<i32>} : memref<216x256xbf16, #tpu.memory_space<vmem>>, vector<8x256xbf16>,
    %628 = vector.extract_strided_slice %177 {offsets = [0, 16], sizes = [8, 240], strides = [1, 1]} : vector<8x256xf32> to vector<8x240xf32>
    %629 = vector.extract_strided_slice %177 {offsets = [0, 0], sizes = [8, 16], strides = [1, 1]} : vector<8x256xf32> to vector<8x16xf32>
    %630 = tpu.concatenate %628, %629 in 1 : vector<8x240xf32>, vector<8x16xf32> -> vector<8x256xf32>
    %631 = vector.extract_strided_slice %0 {offsets = [7, 0], sizes = [1, 256], strides = [1, 1]} : vector<9x256xf32> to vector<1x256xf32>
    %632 = vector.broadcast %631 : vector<1x256xf32> to vector<8x256xf32>
    %633 = arith.mulf %630, %632 : vector<8x256xf32>
    %634 = arith.truncf %633 : vector<8x256xf32> to vector<8x256xbf16>
    %c120_125 = arith.constant 120 : index
    %c0_126 = arith.constant 0 : index
    %635 = vector.load %arg16[%c120_125, %c0_126] : memref<216x256xbf16, #tpu.memory_space<vmem>>, vector<8x256xbf16>
    tpu.vector_store %arg16[%c120_125, %c0_126], %634 {strides = array<i32>} : memref<216x256xbf16, #tpu.memory_space<vmem>>, vector<8x256xbf16>,
    %636 = vector.extract_strided_slice %519 {offsets = [0, 17], sizes = [8, 239], strides = [1, 1]} : vector<8x256xf32> to vector<8x239xf32>
    %637 = vector.extract_strided_slice %519 {offsets = [0, 0], sizes = [8, 17], strides = [1, 1]} : vector<8x256xf32> to vector<8x17xf32>
    %638 = tpu.concatenate %636, %637 in 1 : vector<8x239xf32>, vector<8x17xf32> -> vector<8x256xf32>
    %639 = vector.extract_strided_slice %0 {offsets = [8, 0], sizes = [1, 256], strides = [1, 1]} : vector<9x256xf32> to vector<1x256xf32>
    %640 = vector.broadcast %639 : vector<1x256xf32> to vector<8x256xf32>
    %641 = arith.mulf %638, %640 : vector<8x256xf32>
    %642 = arith.truncf %641 : vector<8x256xf32> to vector<8x256xbf16>
    %c128 = arith.constant 128 : index
    %c0_127 = arith.constant 0 : index
    %643 = vector.load %arg16[%c128, %c0_127] : memref<216x256xbf16, #tpu.memory_space<vmem>>, vector<8x256xbf16>
    tpu.vector_store %arg16[%c128, %c0_127], %642 {strides = array<i32>} : memref<216x256xbf16, #tpu.memory_space<vmem>>, vector<8x256xbf16>,
    %644 = vector.extract_strided_slice %177 {offsets = [0, 17], sizes = [8, 239], strides = [1, 1]} : vector<8x256xf32> to vector<8x239xf32>
    %645 = vector.extract_strided_slice %177 {offsets = [0, 0], sizes = [8, 17], strides = [1, 1]} : vector<8x256xf32> to vector<8x17xf32>
    %646 = tpu.concatenate %644, %645 in 1 : vector<8x239xf32>, vector<8x17xf32> -> vector<8x256xf32>
    %647 = vector.extract_strided_slice %0 {offsets = [8, 0], sizes = [1, 256], strides = [1, 1]} : vector<9x256xf32> to vector<1x256xf32>
    %648 = vector.broadcast %647 : vector<1x256xf32> to vector<8x256xf32>
    %649 = arith.mulf %646, %648 : vector<8x256xf32>
    %650 = arith.truncf %649 : vector<8x256xf32> to vector<8x256xbf16>
    %c136 = arith.constant 136 : index
    %c0_128 = arith.constant 0 : index
    %651 = vector.load %arg16[%c136, %c0_128] : memref<216x256xbf16, #tpu.memory_space<vmem>>, vector<8x256xbf16>
    tpu.vector_store %arg16[%c136, %c0_128], %650 {strides = array<i32>} : memref<216x256xbf16, #tpu.memory_space<vmem>>, vector<8x256xbf16>,
    %c0_129 = arith.constant 0 : index
    %c0_130 = arith.constant 0 : index
    %652 = vector.load %arg11[%c0_129, %c0_130] : memref<4x144xbf16, #tpu.memory_space<vmem>>, vector<4x144xbf16>
    %c0_131 = arith.constant 0 : index
    %c0_132 = arith.constant 0 : index
    %653 = vector.load %arg16[%c0_131, %c0_132] : memref<216x256xbf16, #tpu.memory_space<vmem>>, vector<144x256xbf16>
    %cst_133 = arith.constant dense<0.000000e+00> : vector<4x256xf32>
    %654 = tpu.matmul %652, %653, %cst_133 {dimension_numbers = #tpu.dot_dimension_numbers<[1], [0], [0], [1], [0, 0, 1, 1], [], []>} : vector<4x144xbf16>, vector<144x256xbf16>, vector<4x256xf32> -> vector<4x256xf32>
    %c0_134 = arith.constant 0 : index
    %c0_135 = arith.constant 0 : index
    %655 = vector.load %arg12[%c0_134, %c0_135] : memref<4x1xf32, #tpu.memory_space<vmem>>, vector<4x1xf32>
    %656 = vector.broadcast %655 : vector<4x1xf32> to vector<4x256xf32>
    %657 = arith.addf %654, %656 : vector<4x256xf32>
    %cst_136 = arith.constant 5.000000e-01 : f32
    %658 = vector.broadcast %cst_136 : f32 to vector<4x256xf32>
    %659 = arith.mulf %658, %657 : vector<4x256xf32>
    %cst_137 = arith.constant 0.707106769 : f32
    %660 = vector.broadcast %cst_137 : f32 to vector<4x256xf32>
    %661 = arith.mulf %657, %660 : vector<4x256xf32>
    %662 = math.erf %661 : vector<4x256xf32>
    %cst_138 = arith.constant 1.000000e+00 : f32
    %663 = vector.broadcast %cst_138 : f32 to vector<4x256xf32>
    %664 = arith.addf %663, %662 : vector<4x256xf32>
    %665 = arith.mulf %659, %664 : vector<4x256xf32>
    %666 = vector.extract_strided_slice %665 {offsets = [0, 239], sizes = [4, 17], strides = [1, 1]} : vector<4x256xf32> to vector<4x17xf32>
    %667 = vector.extract_strided_slice %665 {offsets = [0, 0], sizes = [4, 239], strides = [1, 1]} : vector<4x256xf32> to vector<4x239xf32>
    %668 = tpu.concatenate %666, %667 in 1 : vector<4x17xf32>, vector<4x239xf32> -> vector<4x256xf32>
    %669 = vector.extract_strided_slice %0 {offsets = [0, 0], sizes = [1, 256], strides = [1, 1]} : vector<9x256xf32> to vector<1x256xf32>
    %670 = vector.broadcast %669 : vector<1x256xf32> to vector<4x256xf32>
    %671 = arith.mulf %668, %670 : vector<4x256xf32>
    %672 = arith.truncf %671 : vector<4x256xf32> to vector<4x256xbf16>
    %c0_139 = arith.constant 0 : index
    %c0_140 = arith.constant 0 : index
    %673 = vector.load %arg16[%c0_139, %c0_140] : memref<216x256xbf16, #tpu.memory_space<vmem>>, vector<4x256xbf16>
    tpu.vector_store %arg16[%c0_139, %c0_140], %672 {strides = array<i32>} : memref<216x256xbf16, #tpu.memory_space<vmem>>, vector<4x256xbf16>,
    %674 = vector.extract_strided_slice %665 {offsets = [0, 240], sizes = [4, 16], strides = [1, 1]} : vector<4x256xf32> to vector<4x16xf32>
    %675 = vector.extract_strided_slice %665 {offsets = [0, 0], sizes = [4, 240], strides = [1, 1]} : vector<4x256xf32> to vector<4x240xf32>
    %676 = tpu.concatenate %674, %675 in 1 : vector<4x16xf32>, vector<4x240xf32> -> vector<4x256xf32>
    %677 = vector.extract_strided_slice %0 {offsets = [1, 0], sizes = [1, 256], strides = [1, 1]} : vector<9x256xf32> to vector<1x256xf32>
    %678 = vector.broadcast %677 : vector<1x256xf32> to vector<4x256xf32>
    %679 = arith.mulf %676, %678 : vector<4x256xf32>
    %680 = arith.truncf %679 : vector<4x256xf32> to vector<4x256xbf16>
    %c4_141 = arith.constant 4 : index
    %c0_142 = arith.constant 0 : index
    %681 = vector.load %arg16[%c4_141, %c0_142] : memref<216x256xbf16, #tpu.memory_space<vmem>>, vector<4x256xbf16>
    tpu.vector_store %arg16[%c4_141, %c0_142], %680 {strides = array<i32>} : memref<216x256xbf16, #tpu.memory_space<vmem>>, vector<4x256xbf16>,
    %682 = vector.extract_strided_slice %665 {offsets = [0, 241], sizes = [4, 15], strides = [1, 1]} : vector<4x256xf32> to vector<4x15xf32>
    %683 = vector.extract_strided_slice %665 {offsets = [0, 0], sizes = [4, 241], strides = [1, 1]} : vector<4x256xf32> to vector<4x241xf32>
    %684 = tpu.concatenate %682, %683 in 1 : vector<4x15xf32>, vector<4x241xf32> -> vector<4x256xf32>
    %685 = vector.extract_strided_slice %0 {offsets = [2, 0], sizes = [1, 256], strides = [1, 1]} : vector<9x256xf32> to vector<1x256xf32>
    %686 = vector.broadcast %685 : vector<1x256xf32> to vector<4x256xf32>
    %687 = arith.mulf %684, %686 : vector<4x256xf32>
    %688 = arith.truncf %687 : vector<4x256xf32> to vector<4x256xbf16>
    %c8_143 = arith.constant 8 : index
    %c0_144 = arith.constant 0 : index
    %689 = vector.load %arg16[%c8_143, %c0_144] : memref<216x256xbf16, #tpu.memory_space<vmem>>, vector<4x256xbf16>
    tpu.vector_store %arg16[%c8_143, %c0_144], %688 {strides = array<i32>} : memref<216x256xbf16, #tpu.memory_space<vmem>>, vector<4x256xbf16>,
    %690 = vector.extract_strided_slice %665 {offsets = [0, 255], sizes = [4, 1], strides = [1, 1]} : vector<4x256xf32> to vector<4x1xf32>
    %691 = vector.extract_strided_slice %665 {offsets = [0, 0], sizes = [4, 255], strides = [1, 1]} : vector<4x256xf32> to vector<4x255xf32>
    %692 = tpu.concatenate %690, %691 in 1 : vector<4x1xf32>, vector<4x255xf32> -> vector<4x256xf32>
    %693 = vector.extract_strided_slice %0 {offsets = [3, 0], sizes = [1, 256], strides = [1, 1]} : vector<9x256xf32> to vector<1x256xf32>
    %694 = vector.broadcast %693 : vector<1x256xf32> to vector<4x256xf32>
    %695 = arith.mulf %692, %694 : vector<4x256xf32>
    %696 = arith.truncf %695 : vector<4x256xf32> to vector<4x256xbf16>
    %c12_145 = arith.constant 12 : index
    %c0_146 = arith.constant 0 : index
    %697 = vector.load %arg16[%c12_145, %c0_146] : memref<216x256xbf16, #tpu.memory_space<vmem>>, vector<4x256xbf16>
    tpu.vector_store %arg16[%c12_145, %c0_146], %696 {strides = array<i32>} : memref<216x256xbf16, #tpu.memory_space<vmem>>, vector<4x256xbf16>,
    %698 = arith.truncf %665 : vector<4x256xf32> to vector<4x256xbf16>
    %c16_147 = arith.constant 16 : index
    %c0_148 = arith.constant 0 : index
    %699 = vector.load %arg16[%c16_147, %c0_148] : memref<216x256xbf16, #tpu.memory_space<vmem>>, vector<4x256xbf16>
    tpu.vector_store %arg16[%c16_147, %c0_148], %698 {strides = array<i32>} : memref<216x256xbf16, #tpu.memory_space<vmem>>, vector<4x256xbf16>,
    %700 = vector.extract_strided_slice %665 {offsets = [0, 1], sizes = [4, 255], strides = [1, 1]} : vector<4x256xf32> to vector<4x255xf32>
    %701 = vector.extract_strided_slice %665 {offsets = [0, 0], sizes = [4, 1], strides = [1, 1]} : vector<4x256xf32> to vector<4x1xf32>
    %702 = tpu.concatenate %700, %701 in 1 : vector<4x255xf32>, vector<4x1xf32> -> vector<4x256xf32>
    %703 = vector.extract_strided_slice %0 {offsets = [5, 0], sizes = [1, 256], strides = [1, 1]} : vector<9x256xf32> to vector<1x256xf32>
    %704 = vector.broadcast %703 : vector<1x256xf32> to vector<4x256xf32>
    %705 = arith.mulf %702, %704 : vector<4x256xf32>
    %706 = arith.truncf %705 : vector<4x256xf32> to vector<4x256xbf16>
    %c20_149 = arith.constant 20 : index
    %c0_150 = arith.constant 0 : index
    %707 = vector.load %arg16[%c20_149, %c0_150] : memref<216x256xbf16, #tpu.memory_space<vmem>>, vector<4x256xbf16>
    tpu.vector_store %arg16[%c20_149, %c0_150], %706 {strides = array<i32>} : memref<216x256xbf16, #tpu.memory_space<vmem>>, vector<4x256xbf16>,
    %708 = vector.extract_strided_slice %665 {offsets = [0, 15], sizes = [4, 241], strides = [1, 1]} : vector<4x256xf32> to vector<4x241xf32>
    %709 = vector.extract_strided_slice %665 {offsets = [0, 0], sizes = [4, 15], strides = [1, 1]} : vector<4x256xf32> to vector<4x15xf32>
    %710 = tpu.concatenate %708, %709 in 1 : vector<4x241xf32>, vector<4x15xf32> -> vector<4x256xf32>
    %711 = vector.extract_strided_slice %0 {offsets = [6, 0], sizes = [1, 256], strides = [1, 1]} : vector<9x256xf32> to vector<1x256xf32>
    %712 = vector.broadcast %711 : vector<1x256xf32> to vector<4x256xf32>
    %713 = arith.mulf %710, %712 : vector<4x256xf32>
    %714 = arith.truncf %713 : vector<4x256xf32> to vector<4x256xbf16>
    %c24_151 = arith.constant 24 : index
    %c0_152 = arith.constant 0 : index
    %715 = vector.load %arg16[%c24_151, %c0_152] : memref<216x256xbf16, #tpu.memory_space<vmem>>, vector<4x256xbf16>
    tpu.vector_store %arg16[%c24_151, %c0_152], %714 {strides = array<i32>} : memref<216x256xbf16, #tpu.memory_space<vmem>>, vector<4x256xbf16>,
    %716 = vector.extract_strided_slice %665 {offsets = [0, 16], sizes = [4, 240], strides = [1, 1]} : vector<4x256xf32> to vector<4x240xf32>
    %717 = vector.extract_strided_slice %665 {offsets = [0, 0], sizes = [4, 16], strides = [1, 1]} : vector<4x256xf32> to vector<4x16xf32>
    %718 = tpu.concatenate %716, %717 in 1 : vector<4x240xf32>, vector<4x16xf32> -> vector<4x256xf32>
    %719 = vector.extract_strided_slice %0 {offsets = [7, 0], sizes = [1, 256], strides = [1, 1]} : vector<9x256xf32> to vector<1x256xf32>
    %720 = vector.broadcast %719 : vector<1x256xf32> to vector<4x256xf32>
    %721 = arith.mulf %718, %720 : vector<4x256xf32>
    %722 = arith.truncf %721 : vector<4x256xf32> to vector<4x256xbf16>
    %c28_153 = arith.constant 28 : index
    %c0_154 = arith.constant 0 : index
    %723 = vector.load %arg16[%c28_153, %c0_154] : memref<216x256xbf16, #tpu.memory_space<vmem>>, vector<4x256xbf16>
    tpu.vector_store %arg16[%c28_153, %c0_154], %722 {strides = array<i32>} : memref<216x256xbf16, #tpu.memory_space<vmem>>, vector<4x256xbf16>,
    %724 = vector.extract_strided_slice %665 {offsets = [0, 17], sizes = [4, 239], strides = [1, 1]} : vector<4x256xf32> to vector<4x239xf32>
    %725 = vector.extract_strided_slice %665 {offsets = [0, 0], sizes = [4, 17], strides = [1, 1]} : vector<4x256xf32> to vector<4x17xf32>
    %726 = tpu.concatenate %724, %725 in 1 : vector<4x239xf32>, vector<4x17xf32> -> vector<4x256xf32>
    %727 = vector.extract_strided_slice %0 {offsets = [8, 0], sizes = [1, 256], strides = [1, 1]} : vector<9x256xf32> to vector<1x256xf32>
    %728 = vector.broadcast %727 : vector<1x256xf32> to vector<4x256xf32>
    %729 = arith.mulf %726, %728 : vector<4x256xf32>
    %730 = arith.truncf %729 : vector<4x256xf32> to vector<4x256xbf16>
    %c32_155 = arith.constant 32 : index
    %c0_156 = arith.constant 0 : index
    %731 = vector.load %arg16[%c32_155, %c0_156] : memref<216x256xbf16, #tpu.memory_space<vmem>>, vector<4x256xbf16>
    tpu.vector_store %arg16[%c32_155, %c0_156], %730 {strides = array<i32>} : memref<216x256xbf16, #tpu.memory_space<vmem>>, vector<4x256xbf16>,
    %c0_157 = arith.constant 0 : index
    %c0_158 = arith.constant 0 : index
    %732 = vector.load %arg13[%c0_157, %c0_158] : memref<4x36xbf16, #tpu.memory_space<vmem>>, vector<4x36xbf16>
    %c0_159 = arith.constant 0 : index
    %c0_160 = arith.constant 0 : index
    %733 = vector.load %arg16[%c0_159, %c0_160] : memref<216x256xbf16, #tpu.memory_space<vmem>>, vector<36x256xbf16>
    %cst_161 = arith.constant dense<0.000000e+00> : vector<4x256xf32>
    %734 = tpu.matmul %732, %733, %cst_161 {dimension_numbers = #tpu.dot_dimension_numbers<[1], [0], [0], [1], [0, 0, 1, 1], [], []>} : vector<4x36xbf16>, vector<36x256xbf16>, vector<4x256xf32> -> vector<4x256xf32>
    %c0_162 = arith.constant 0 : index
    %c0_163 = arith.constant 0 : index
    %735 = vector.load %arg14[%c0_162, %c0_163] : memref<4x1xf32, #tpu.memory_space<vmem>>, vector<4x1xf32>
    %736 = vector.broadcast %735 : vector<4x1xf32> to vector<4x256xf32>
    %737 = arith.addf %734, %736 : vector<4x256xf32>
    %c0_164 = arith.constant 0 : index
    %c0_165 = arith.constant 0 : index
    %c0_166 = arith.constant 0 : index
    %738 = vector.load %arg15[%c0_164, %c0_165, %c0_166] : memref<1x4x256xf32, #tpu.memory_space<vmem>>, vector<1x4x256xf32>
    %739 = vector.shape_cast %738 : vector<1x4x256xf32> to vector<4x256xf32>
    %740 = vector.shape_cast %737 : vector<4x256xf32> to vector<1x4x256xf32>
    tpu.vector_store %arg15[%c0_164, %c0_165, %c0_166], %740 {strides = array<i32>} : memref<1x4x256xf32, #tpu.memory_space<vmem>>, vector<1x4x256xf32>,
    return
  }
  func.func @transform_0(%arg0: i32) -> (i32, i32, i32) {
    %c0_i32 = arith.constant 0 : i32
    %c0_i32_0 = arith.constant 0 : i32
    %c0_i32_1 = arith.constant 0 : i32
    return %arg0, %c0_i32, %c0_i32_0 : i32, i32, i32
  }
  func.func @transform_1(%arg0: i32) -> (i32, i32, i32) {
    %c0_i32 = arith.constant 0 : i32
    %c0_i32_0 = arith.constant 0 : i32
    %c0_i32_1 = arith.constant 0 : i32
    return %arg0, %c0_i32, %c0_i32_0 : i32, i32, i32
  }
  func.func @transform_2(%arg0: i32) -> (i32, i32, i32, i32) {
    %c0_i32 = arith.constant 0 : i32
    %c0_i32_0 = arith.constant 0 : i32
    %c0_i32_1 = arith.constant 0 : i32
    %c0_i32_2 = arith.constant 0 : i32
    return %arg0, %c0_i32, %c0_i32_0, %c0_i32_1 : i32, i32, i32, i32
  }
  func.func @transform_3(%arg0: i32) -> (i32, i32) {
    %c0_i32 = arith.constant 0 : i32
    %c0_i32_0 = arith.constant 0 : i32
    %c0_i32_1 = arith.constant 0 : i32
    return %c0_i32, %c0_i32_0 : i32, i32
  }
  func.func @transform_4(%arg0: i32) -> (i32, i32) {
    %c0_i32 = arith.constant 0 : i32
    %c0_i32_0 = arith.constant 0 : i32
    %c0_i32_1 = arith.constant 0 : i32
    return %c0_i32, %c0_i32_0 : i32, i32
  }
  func.func @transform_5(%arg0: i32) -> (i32, i32) {
    %c0_i32 = arith.constant 0 : i32
    %c0_i32_0 = arith.constant 0 : i32
    %c0_i32_1 = arith.constant 0 : i32
    return %c0_i32, %c0_i32_0 : i32, i32
  }
  func.func @transform_6(%arg0: i32) -> (i32, i32) {
    %c0_i32 = arith.constant 0 : i32
    %c0_i32_0 = arith.constant 0 : i32
    %c0_i32_1 = arith.constant 0 : i32
    return %c0_i32, %c0_i32_0 : i32, i32
  }
  func.func @transform_7(%arg0: i32) -> (i32, i32) {
    %c0_i32 = arith.constant 0 : i32
    %c0_i32_0 = arith.constant 0 : i32
    %c0_i32_1 = arith.constant 0 : i32
    return %c0_i32, %c0_i32_0 : i32, i32
  }
  func.func @transform_8(%arg0: i32) -> (i32, i32) {
    %c0_i32 = arith.constant 0 : i32
    %c0_i32_0 = arith.constant 0 : i32
    %c0_i32_1 = arith.constant 0 : i32
    return %c0_i32, %c0_i32_0 : i32, i32
  }
  func.func @transform_9(%arg0: i32) -> (i32, i32) {
    %c0_i32 = arith.constant 0 : i32
    %c0_i32_0 = arith.constant 0 : i32
    %c0_i32_1 = arith.constant 0 : i32
    return %c0_i32, %c0_i32_0 : i32, i32
  }
  func.func @transform_10(%arg0: i32) -> (i32, i32) {
    %c0_i32 = arith.constant 0 : i32
    %c0_i32_0 = arith.constant 0 : i32
    %c0_i32_1 = arith.constant 0 : i32
    return %c0_i32, %c0_i32_0 : i32, i32
  }
  func.func @transform_11(%arg0: i32) -> (i32, i32) {
    %c0_i32 = arith.constant 0 : i32
    %c0_i32_0 = arith.constant 0 : i32
    %c0_i32_1 = arith.constant 0 : i32
    return %c0_i32, %c0_i32_0 : i32, i32
  }
  func.func @transform_12(%arg0: i32) -> (i32, i32) {
    %c0_i32 = arith.constant 0 : i32
    %c0_i32_0 = arith.constant 0 : i32
    %c0_i32_1 = arith.constant 0 : i32
    return %c0_i32, %c0_i32_0 : i32, i32
  }
  func.func @transform_13(%arg0: i32) -> (i32, i32) {
    %c0_i32 = arith.constant 0 : i32
    %c0_i32_0 = arith.constant 0 : i32
    %c0_i32_1 = arith.constant 0 : i32
    return %c0_i32, %c0_i32_0 : i32, i32
  }
  func.func @transform_14(%arg0: i32) -> (i32, i32, i32) {
    %c0_i32 = arith.constant 0 : i32
    %c0_i32_0 = arith.constant 0 : i32
    %c0_i32_1 = arith.constant 0 : i32
    return %arg0, %c0_i32, %c0_i32_0 : i32, i32, i32
  }
}

</mosaic_0001>

<bundles_post_ra>
// kernel: reconstruct_decoder_layer_forward.1
= control target key start
LH: loop header
LB: loop body
LE: loop exit
PB: predicated region body
PF: predicated region fallthrough
CT: control target
= control target key end

     0   :  { %s5021_s29 = smov 0   ;;  %s6235_s0 = inlined_call_operand.vmem [shape: f32[2,4,256], index: 0, kind: input, shape index: {}]   ;;  %s6236_s1 = inlined_call_operand.vmem [shape: f32[2,4,256], index: 1, kind: input, shape index: {}]   ;;  %s6237_s2 = inlined_call_operand.vmem [shape: f32[2,8,8,8], index: 2, kind: input, shape index: {}]   ;;  %s6238_s3 = inlined_call_operand.vmem [shape: f32[9,256], index: 3, kind: input, shape index: {}]   ;;  %s6239_s4 = inlined_call_operand.vmem [shape: f32[16,8], index: 4, kind: input, shape index: {}]   ;;  %s6240_s5 = inlined_call_operand.vmem [shape: f32[8,16], index: 5, kind: input, shape index: {}]   ;;  %s6241_s6 = inlined_call_operand.vmem [shape: bf16[16,72], index: 6, kind: input, shape index: {}]   ;;  %s6242_s7 = inlined_call_operand.vmem [shape: f32[16,1], index: 7, kind: input, shape index: {}]   ;;  %s6243_s8 = inlined_call_operand.vmem [shape: bf16[8,216], index: 8, kind: input, shape index: {}]   ;;  %s6244_s9 = inlined_call_operand.vmem [shape: f32[8,1], index: 9, kind: input, shape index: {}]   ;;  %s6245_s10 = inlined_call_operand.vmem [shape: bf16[4,144], index: 10, kind: input, shape index: {}]   ;;  %s6246_s11 = inlined_call_operand.vmem [shape: f32[4,1], index: 11, kind: input, shape index: {}]   ;;  %s6247_s12 = inlined_call_operand.vmem [shape: bf16[4,36], index: 12, kind: input, shape index: {}]   ;;  %s6248_s13 = inlined_call_operand.vmem [shape: f32[4,1], index: 13, kind: input, shape index: {}]   ;;  %s6249_s14 = inlined_call_operand.vmem [shape: f32[2,4,256], index: 14, kind: output, shape index: {}]  }
   0x1 LB: > { %s4460_s30 = sadd.s32 4294967295, %s4930_s29   ;;  %p4464_p0 = scmp.ge.s32.totalorder %s4930_s29, 1  ;;  %s4930_s29 = sphi %s5021_s29, %s24_s29  }
   0x2   : > { %p432_p1 = scmp.lt.s32.totalorder %s4930_s29, 3 }
   0x4   : > { %p433_p2 = pnand %p4464_p0, %p432_p1 }
   0x5   : > { %p488_p3 = scmp.lt.s32.totalorder (!%p433_p2), %s4460_s30, 1  ;;  %v5032_v0 = vld [vmem:[%s6239_s4] sm:$0xff] (!%p433_p2)  ;;  %vm526_vm0 = vcmask (!%p433_p2), 64512   ;;  %s4932_s25 = smov (!%p433_p2), 16   ;;  %v524_v6 = vld [vmem:[%s6239_s4 + $0x8] sm:$0xff] (!%p433_p2)  ;;  %v4940_v17 = vmov (!%p433_p2), 0   ;;  %v2439_v21 = vlaneseq (!%p433_p2) }
   0x6   : > { %436 = sbr.rel (%p433_p2) target bundleno = 1642 (0x66a), region = 76  ;;  %4762 = vmatprep.mubr.msk.f32.mxu1 (!%p433_p2), %vm526_vm0, %v5032_v0  ;;  %4772 = vmatprep.mubr.msk.f32.mxu0 (!%p433_p2), %vm526_vm0, %v5032_v0  ;;  %s4933_s26 = smov (!%p433_p2), 17   ;;  %v5170_v18 = vld [vmem:[%s6240_s5] sm:$0xff] (!%p433_p2)  ;;  %v2862_v20 = vld [vmem:[%s6242_s7 + $0x8] sm:$0xff] (!%p433_p2)  ;;  %vm2434_vm1 = vcmask (!%p433_p2), 138240   ;;  %vm747_vm2 = vcmask (!%p433_p2), 130048  }
   0x7   : > { %s4934_s18 = smov (!%p433_p2), 15   ;;  %s4935_s19 = smov (!%p433_p2), 1   ;;  %4862 = vset.pattern.permute.xlu0 (!%p433_p2), %v4940_v17  ;;  %4863 = vset.pattern.permute.xlu1 (!%p433_p2), %v4940_v17  ;;  %v2861_v19 = vld [vmem:[%s6242_s7] sm:$0xff] (!%p433_p2)  ;;  %v5181_v22 = vshrl.u32 (!%p433_p2), %v2439_v21, 7  ;;  %v5192_v25 = vld [vmem:[%s6238_s3 + $0x8] sm:$0xff] (!%p433_p2)  ;;  %vm2535_vm3 = vcmask (!%p433_p2), 121856  }
   0x8   : > { %s4937_s21 = smov (!%p433_p2), 113   ;;  %s4938_s22 = smov (!%p433_p2), 112   ;;  %v5187_v24 = vld [vmem:[%s6238_s3] sm:$0xff] (!%p433_p2)  ;;  %vm2585_vm4 = vcmask (!%p433_p2), 7168   ;;  %vm2655_vm5 = vcmask (!%p433_p2), 1039360   ;;  %vm2705_vm6 = vcmask (!%p433_p2), 924672  }
   0x9   : > { %v2441_v23 = vsub.s32 (!%p433_p2), 0, %v5181_v22  ;;  %v2492_v30 = vsub.s32 (!%p433_p2), 1, %v5181_v22  ;;  %v2542_v42 = vsub.s32 (!%p433_p2), 2, %v5181_v22  ;;  %v2592_v63 = vsub.s32 (!%p433_p2), 3, %v5181_v22  ;;  %s4944_s16 = smov (!%p433_p2), 80   ;;  %s4945_s27 = smov (!%p433_p2), 96  }
   0xa   : > { %vm759_vm7 = vcmask (!%p433_p2), 916480   ;;  %vm2804_vm8 = vcmask (!%p433_p2), 908288   ;;  %vm2415_vm9 = vcmask (!%p433_p2), 1043456   ;;  %vm2923_vm10 = vcmask (!%p433_p2), 588800  }
   0xb   : > { %v5195_v28 = vrot.slane (!%p433_p2), %v5187_v24, %v2441_v23  ;;  %v5198_v29 = vrot.slane (!%p433_p2), %v5192_v25, %v2441_v23  ;;  %v5206_v37 = vrot.slane (!%p433_p2), %v5187_v24, %v2492_v30  ;;  %v5209_v38 = vrot.slane (!%p433_p2), %v5192_v25, %v2492_v30 }
   0xc   : > { %v5224_v55 = vrot.slane (!%p433_p2), %v5187_v24, %v2542_v42  ;;  %v5229_v59 = vrot.slane (!%p433_p2), %v5192_v25, %v2542_v42  ;;  %vm2409_vm11 = vcmask (!%p433_p2), 1041408   ;;  %vm3014_vm12 = vcmask (!%p433_p2), 1045508  }
   0xd   : > { %s6253_s30 = smov (!%p488_p3, %s4460_s30), 1  ;;  %vm5374_vm13 = vmor %vm2409_vm11, %vm3014_vm12  ;;  %vm3541_vm14 = vcmask 719872   ;;  %vm749_vm15 = vcmask 261120   ;;  %vm755_vm12 = vcmask 654336  }
   0xe   : > { %s5038_s17 = sshll.u32 %s6253_s30, 3  ;;  %s4647_s24 = sshll.u32 %s6253_s30, 6 }
   0xf   : > { %s497_s20 = scalar_lea.vmem %s6236_s1, %s5038_s17  ;;  %s492_s23 = scalar_lea.vmem %s6235_s0, %s5038_s17 }
  0x10   : > { %v5048_v1 = vld [vmem:[%s497_s20] sm:$0xff]  ;;  %s5061_s15 = scalar_lea.vmem %s6237_s2, %s4647_s24  ;;  %s4936_s20 = smov 127  }
  0x11   : > { %2512 = vrot.lane.b32.xlu1 %v5048_v1, %s4932_s25  ;;  %2463 = vrot.lane.b32.xlu0 %v5048_v1, %s4933_s26  ;;  %v5056_v2 = vcombine.high %v5048_v1, %v5048_v1  ;;  %v5063_v3 = vld [vmem:[%s492_s23] sm:$0xff]  ;;  %v516_v5 = vld [vmem:[%s5061_s15 + $0x8] sm:$0xff]  ;;  %s4939_s23 = smov 111   ;;  %s4941_s24 = smov 32  }
  0x12   : > { %v515_v4 = vld [vmem:[%s5061_s15] sm:$0xff]  ;;  %4770 = vmatprep.subr.mxu0 %v516_v5  ;;  %v517_v7 = vld [vmem:[%s5061_s15 + $0x10] sm:$0xff]  ;;  %v5077_v8 = vcombine.high %v5063_v3, %v5063_v3  ;;  %v518_v9 = vld [vmem:[%s5061_s15 + $0x18] sm:$0xff]  ;;  %s4943_s30 = smov 64  }
  0x13   : > { %4760 = vmatprep.subr.mxu1 %v515_v4  ;;  %4771 = vmatpush3.msra.mxu0 %v516_v5  ;;  %v519_v10 = vld [vmem:[%s5061_s15 + $0x20] sm:$0xff]  ;;  %v520_v11 = vld [vmem:[%s5061_s15 + $0x28] sm:$0xff]  ;;  %v521_v12 = vld [vmem:[%s5061_s15 + $0x30] sm:$0xff]  ;;  %v4658_v14 = vpack.c.bf16 %v5056_v2, %v5048_v1 }
  0x14   : > { %4761 = vmatpush3.msra.mxu1 %v515_v4  ;;  %4773 = vmatmul.mubr.msk.f32.vlgmr.msra.gmra.mrb[0].mxu0 %vm526_vm0, %v524_v6  ;;  %v522_v13 = vld [vmem:[%s5061_s15 + $0x38] sm:$0xff]  ;;  %v4657_v15 = vpack.c.bf16 %v5077_v8, %v5063_v3  ;;  %s4942_s15 = smov 48  }
  0x15   : > { %2460 = vrot.lane.b32.xlu0 %v5056_v2, %s4933_s26  ;;  %2432 = vrot.lane.b32.xlu1 %v5063_v3, %s4933_s26  ;;  %v2648_v16 = vrot.slane %v4658_v14, 6 }
  0x16   : > { %4763 = vmatmul.mubr.msk.f32.vlgmr.msra.gmra.mrb[0].mxu1 %vm526_vm0, %v524_v6  ;;  %4780 = vmatprep.subr.mxu0 %v517_v7  ;;  %2639 = vst [vmem:[#allocation2 + $0x20] sm:$0x33] %v4657_v15  ;;  %3163 = vst [vmem:[#allocation2 + $0x60] sm:$0x33] %v4657_v15 }
  0x17   : > { %4782 = vmatprep.mubr.msk.f32.mxu0 %vm526_vm0, %v5032_v0  ;;  %4781 = vmatpush3.msra.mxu0 %v517_v7  ;;  %2650 = vst [vmem:[#allocation2 + $0x20] sm:$0xcc] %v2648_v16  ;;  %3185 = vst [vmem:[#allocation2 + $0x70] sm:$0xcc] %v2648_v16  ;;  %v5245_v7 = vrot.slane %v5187_v24, %v2592_v63 }
  0x18   : > { %4783 = vmatmul.mubr.msk.f32.vlgmr.msra.gmra.mrb[2].mxu0 %vm526_vm0, %v524_v6  ;;  %4790 = vmatprep.subr.mxu0 %v518_v9 }
  0x19   : > { %2509 = vrot.lane.b32.xlu1 %v5056_v2, %s4932_s25  ;;  %2429 = vrot.lane.b32.xlu0 %v5077_v8, %s4933_s26 }
  0x1a   : > { %4791 = vmatpush3.msra.mxu0 %v518_v9  ;;  %4792 = vmatprep.mubr.msk.f32.mxu0 %vm526_vm0, %v5032_v0 }
  0x1b   : > { %4800 = vmatprep.subr.mxu0 %v519_v10  ;;  %4765 = vmatprep.subr.mxu1 %v5170_v18 }
  0x1c   : > { %4793 = vmatmul.mubr.msk.f32.vlgmr.msra.gmra.mrb[4].mxu0 %vm526_vm0, %v524_v6  ;;  %4766 = vmatpush3.msra.mxu1 %v5170_v18 }
  0x1d   : > { %2484 = vrot.lane.b32.xlu1 %v5063_v3, %s4932_s25  ;;  %2481 = vrot.lane.b32.xlu0 %v5077_v8, %s4932_s25 }
  0x1e   : > { %4801 = vmatpush3.msra.mxu0 %v519_v10  ;;  %4802 = vmatprep.mubr.msk.f32.mxu0 %vm526_vm0, %v5032_v0 }
  0x1f   : > { %4810 = vmatprep.subr.mxu0 %v520_v11  ;;  %4775 = vmatprep.subr.mxu1 %v5170_v18 }
  0x20   : > { %4803 = vmatmul.mubr.msk.f32.vlgmr.msra.gmra.mrb[6].mxu0 %vm526_vm0, %v524_v6 }
  0x21   : > { %2562 = vrot.lane.b32.xlu1 %v5048_v1, %s4934_s18  ;;  %2559 = vrot.lane.b32.xlu0 %v5056_v2, %s4934_s18 }
  0x22   : > { %4811 = vmatpush3.msra.mxu0 %v520_v11  ;;  %4812 = vmatprep.mubr.msk.f32.mxu0 %vm526_vm0, %v5032_v0 }
  0x23   : > { %4820 = vmatprep.subr.mxu0 %v521_v12 }
  0x24   : > { %4813 = vmatmul.mubr.msk.f32.vlgmr.msra.gmra.mrb[8].mxu0 %vm526_vm0, %v524_v6 }
  0x25   : > { %2612 = vrot.lane.b32.xlu1 %v5048_v1, %s4935_s19  ;;  %2609 = vrot.lane.b32.xlu0 %v5056_v2, %s4935_s19 }
  0x26   : > { %4821 = vmatpush3.msra.mxu0 %v521_v12  ;;  %4822 = vmatprep.mubr.msk.f32.mxu0 %vm526_vm0, %v5032_v0 }
  0x27   : > { %4830 = vmatprep.subr.mxu0 %v522_v13 }
  0x28   : > { %4823 = vmatmul.mubr.msk.f32.vlgmr.msra.gmra.mrb[10].mxu0 %vm526_vm0, %v524_v6 }
  0x29   : > { %2533 = vrot.lane.b32.xlu1 %v5063_v3, %s4934_s18  ;;  %2530 = vrot.lane.b32.xlu0 %v5077_v8, %s4934_s18 }
  0x2a   : > { %4831 = vmatpush3.msra.mxu0 %v522_v13  ;;  %4832 = vmatprep.mubr.msk.f32.mxu0 %vm526_vm0, %v5032_v0 }
  0x2c   : > { %4833 = vmatmul.mubr.msk.f32.vlgmr.msra.gmra.mrb[12].mxu0 %vm526_vm0, %v524_v6 }
  0x2d   : > { %2583 = vrot.lane.b32.xlu1 %v5063_v3, %s4935_s19  ;;  %2580 = vrot.lane.b32.xlu0 %v5077_v8, %s4935_s19 }
  0x2e   : > { %2965 = vmatprep.mubr.bf16.mxu0 %v4940_v17 }
  0x31   : > { %2682 = vrot.lane.b32.xlu1 %v5056_v2, %s4936_s20  ;;  %2680 = vrot.lane.b32.xlu0 %v5048_v1, %s4936_s20 }
  0x35   : > { %2653 = vrot.lane.b32.xlu1 %v5077_v8, %s4936_s20  ;;  %2651 = vrot.lane.b32.xlu0 %v5063_v3, %s4936_s20 }
  0x39   : > { %2732 = vrot.lane.b32.xlu1 %v5056_v2, %s4937_s21  ;;  %2730 = vrot.lane.b32.xlu0 %v5048_v1, %s4937_s21 }
  0x3d   : > { %2781 = vrot.lane.b32.xlu1 %v5056_v2, %s4938_s22  ;;  %2779 = vrot.lane.b32.xlu0 %v5048_v1, %s4938_s22 }
  0x41   : > { %2703 = vrot.lane.b32.xlu1 %v5077_v8, %s4937_s21  ;;  %2701 = vrot.lane.b32.xlu0 %v5063_v3, %s4937_s21 }
  0x45   : > { %2753 = vrot.lane.b32.xlu1 %v5077_v8, %s4938_s22  ;;  %2751 = vrot.lane.b32.xlu0 %v5063_v3, %s4938_s22 }
  0x49   : > { %2831 = vrot.lane.b32.xlu1 %v5056_v2, %s4939_s23  ;;  %2829 = vrot.lane.b32.xlu0 %v5048_v1, %s4939_s23 }
  0x4d   : > { %2802 = vrot.lane.b32.xlu1 %v5077_v8, %s4939_s23  ;;  %2800 = vrot.lane.b32.xlu0 %v5063_v3, %s4939_s23  ;;  %v5248_v8 = vrot.slane %v5192_v25, %v2592_v63 }
  0x51   : > { %2865 = vperm.xlu0 %4862, %v2861_v19   ;;  %2870 = vperm.xlu1 %4863, %v2862_v20  }
  0x83   : > { %v2513_v26 = vpop.permute.xlu1 %2512  ;;  %v2464_v27 = vpop.permute.xlu0 %2463 }
  0x87   : > { %v2461_v31 = vpop.permute.xlu0 %2460  ;;  %v2433_v32 = vpop.permute.xlu1 %2432 }
  0x88   : > { %v2465_v33 = vsel %vm2434_vm1, %v2464_v27, %v2461_v31  ;;  %v2468_v34 = vsel %vm2434_vm1, %v2461_v31, %v2464_v27 }
  0x89   : > { %v2469_v35 = vmul.f32 %v2468_v34, %v5195_v28  ;;  %v2470_v36 = vmul.f32 %v2465_v33, %v5198_v29 }
  0x8b   : > { %v4650_v39 = vpack.c.bf16 %v2470_v36, %v2469_v35  ;;  %v2510_v40 = vpop.permute.xlu1 %2509  ;;  %v2430_v41 = vpop.permute.xlu0 %2429 }
  0x8c   : > { %v2514_v43 = vsel %vm747_vm2, %v2513_v26, %v2510_v40  ;;  %v2517_v44 = vsel %vm747_vm2, %v2510_v40, %v2513_v26  ;;  %v2435_v45 = vsel %vm2434_vm1, %v2433_v32, %v2430_v41  ;;  %v2438_v46 = vsel %vm2434_vm1, %v2430_v41, %v2433_v32 }
  0x8d   : > { %v5216_v47 = vrot.slane %v4650_v39, 6  ;;  %v2518_v48 = vmul.f32 %v2517_v44, %v5206_v37  ;;  %v2519_v49 = vmul.f32 %v2514_v43, %v5209_v38  ;;  %v2447_v50 = vmul.f32 %v5195_v28, %v2438_v46 }
  0x8e   : > { %v2448_v51 = vmul.f32 %v5198_v29, %v2435_v45  ;;  %v2663_v32 = vsub.s32 5, %v5181_v22 }
  0x8f   : > { %2480 = vst [vmem:[#allocation2] sm:$0xcc] %v5216_v47  ;;  %v4652_v52 = vpack.c.bf16 %v2519_v49, %v2518_v48  ;;  %v2485_v53 = vpop.permute.xlu1 %2484  ;;  %v2482_v54 = vpop.permute.xlu0 %2481 }
  0x90   : > { %v4649_v56 = vpack.c.bf16 %v2448_v51, %v2447_v50  ;;  %v2486_v57 = vsel %vm747_vm2, %v2485_v53, %v2482_v54  ;;  %v2489_v58 = vsel %vm747_vm2, %v2482_v54, %v2485_v53  ;;  %v5270_v46 = vrot.slane %v5187_v24, %v2663_v32 }
  0x91   : > { %v5231_v60 = vrot.slane %v4652_v52, 6  ;;  %v2498_v61 = vmul.f32 %v5206_v37, %v2489_v58  ;;  %v2499_v62 = vmul.f32 %v5209_v38, %v2486_v57  ;;  %v5273_v48 = vrot.slane %v5192_v25, %v2663_v32 }
  0x92   : > { %2457 = vst [vmem:[#allocation2] sm:$0x33] %v4649_v56  ;;  %v2713_v54 = vsub.s32 6, %v5181_v22 }
  0x93   : > { %2529 = vst [vmem:[#allocation2 + $0x8] sm:$0xcc] %v5231_v60  ;;  %v5237_v0 = vpack.c.bf16 %v2499_v62, %v2498_v61  ;;  %v2563_v1 = vpop.permute.xlu1 %2562  ;;  %v2560_v2 = vpop.permute.xlu0 %2559 }
  0x94   : > { %v2564_v3 = vsel %vm2535_vm3, %v2563_v1, %v2560_v2  ;;  %v2567_v4 = vsel %vm2535_vm3, %v2560_v2, %v2563_v1  ;;  %v5283_v2 = vrot.slane %v5187_v24, %v2713_v54 }
  0x95   : > { %2508 = vst [vmem:[#allocation2 + $0x8] sm:$0x33] %v5237_v0  ;;  %v2568_v5 = vmul.f32 %v2567_v4, %v5224_v55  ;;  %v2569_v6 = vmul.f32 %v2564_v3, %v5229_v59  ;;  %v2762_v3 = vsub.s32 7, %v5181_v22 }
  0x97   : > { %v4654_v9 = vpack.c.bf16 %v2569_v6, %v2568_v5  ;;  %v2613_v10 = vpop.permute.xlu1 %2612  ;;  %v2610_v11 = vpop.permute.xlu0 %2609 }
  0x98   : > { %v2614_v12 = vsel %vm2585_vm4, %v2613_v10, %v2610_v11  ;;  %v2617_v13 = vsel %vm2585_vm4, %v2610_v11, %v2613_v10 }
  0x99   : > { %v5252_v14 = vrot.slane %v4654_v9, 6  ;;  %v2618_v15 = vmul.f32 %v2617_v13, %v5245_v7  ;;  %v2619_v16 = vmul.f32 %v2614_v12, %v5248_v8  ;;  %v2852_v27 = vld [vmem:[#allocation2] sm:$0xff]  ;;  %v5289_v9 = vrot.slane %v5192_v25, %v2713_v54 }
  0x9b   : > { %2579 = vst [vmem:[#allocation2 + $0x10] sm:$0xcc] %v5252_v14  ;;  %v4656_v19 = vpack.c.bf16 %v2619_v16, %v2618_v15  ;;  %v2534_v20 = vpop.permute.xlu1 %2533  ;;  %v2531_v21 = vpop.permute.xlu0 %2530 }
  0x9c   : > { %v2536_v23 = vsel %vm2535_vm3, %v2534_v20, %v2531_v21  ;;  %v2539_v26 = vsel %vm2535_vm3, %v2531_v21, %v2534_v20  ;;  %v2853_v30 = vld [vmem:[#allocation2 + $0x8] sm:$0xff]  ;;  %v5294_v20 = vrot.slane %v5187_v24, %v2762_v3 }
  0x9d   : > { %v4866_v31 = vld [vmem:[#allocation2 + $0x4] ss:$8 sps:$4 sm:$0xff]   ;;  %v2627_v33 = vrot.slane %v4656_v19, 6  ;;  %v2548_v34 = vmul.f32 %v5224_v55, %v2539_v26  ;;  %v2549_v35 = vmul.f32 %v5229_v59, %v2536_v23  ;;  %v4526_v36 = vcombine.low %v2852_v27, %v2853_v30 }
  0x9e   : > { %2976 = vst [vmem:[#allocation2] sm:$0x33] %v4649_v56  ;;  %2933 = vmatprep.subr.bf16.mxu0 %v4866_v31  ;;  %v5301_v26 = vrot.slane %v5192_v25, %v2762_v3 }
  0x9f   : > { %2629 = vst [vmem:[#allocation2 + $0x18] sm:$0xcc] %v2627_v33  ;;  %3162 = vst [vmem:[#allocation2 + $0x58] sm:$0xcc] %v2627_v33  ;;  %v5262_v39 = vpack.c.bf16 %v2549_v35, %v2548_v34  ;;  %v2584_v40 = vpop.permute.xlu1 %2583  ;;  %v2581_v41 = vpop.permute.xlu0 %2580  ;;  %2934 = vmatpush1.bf16.msra.mxu0 %v4526_v36  ;;  %v2856_v36 = vld [vmem:[#allocation2 + $0x20] sm:$0xff] }
  0xa0   : > { %v2586_v42 = vsel %vm2585_vm4, %v2584_v40, %v2581_v41  ;;  %v2589_v43 = vsel %vm2585_vm4, %v2581_v41, %v2584_v40 }
  0xa1   : > { %2558 = vst [vmem:[#allocation2 + $0x10] sm:$0x33] %v5262_v39  ;;  %v2598_v44 = vmul.f32 %v5245_v7, %v2589_v43  ;;  %v2599_v45 = vmul.f32 %v5248_v8, %v2586_v42 }
  0xa3   : > { %v4655_v49 = vpack.c.bf16 %v2599_v45, %v2598_v44  ;;  %v2683_v50 = vpop.permute.xlu1 %2682  ;;  %v2681_v51 = vpop.permute.xlu0 %2680 }
  0xa4   : > { %v2684_v52 = vsel %vm2655_vm5, %v2681_v51, %v2683_v50  ;;  %v2688_v53 = vsel %vm2655_vm5, %v2683_v50, %v2681_v51 }
  0xa5   : > { %2608 = vst [vmem:[#allocation2 + $0x18] sm:$0x33] %v4655_v49  ;;  %3118 = vst [vmem:[#allocation2 + $0x48] sm:$0x33] %v4655_v49  ;;  %v2689_v56 = vmul.f32 %v2684_v52, %v5270_v46  ;;  %v2690_v57 = vmul.f32 %v2688_v53, %v5273_v48 }
  0xa7   : > { %v4660_v58 = vpack.c.bf16 %v2690_v57, %v2689_v56  ;;  %v2654_v61 = vpop.permute.xlu1 %2653  ;;  %v2652_v62 = vpop.permute.xlu0 %2651 }
  0xa8   : > { %v2656_v63 = vsel %vm2655_vm5, %v2652_v62, %v2654_v61  ;;  %v2660_v1 = vsel %vm2655_vm5, %v2654_v61, %v2652_v62  ;;  %v2854_v16 = vld [vmem:[#allocation2 + $0x10] sm:$0xff]  ;;  %v5324_v62 = vld [vmem:[%s6238_s3 + $0x18] ss:$0 sm:$0xff] }
  0xa9   : > { %v2698_v4 = vrot.slane %v4660_v58, 6  ;;  %v2669_v5 = vmul.f32 %v5270_v46, %v2656_v63  ;;  %v2670_v6 = vmul.f32 %v5273_v48, %v2660_v1 }
  0xab   : > { %2700 = vst [vmem:[#allocation2 + $0x28] sm:$0xcc] %v2698_v4  ;;  %3230 = vst [vmem:[#allocation2 + $0x88] sm:$0xcc] %v2698_v4  ;;  %v4659_v10 = vpack.c.bf16 %v2670_v6, %v2669_v5  ;;  %v2733_v11 = vpop.permute.xlu1 %2732  ;;  %v2731_v12 = vpop.permute.xlu0 %2730 }
  0xac   : > { %v2734_v13 = vsel %vm2705_vm6, %v2731_v12, %v2733_v11  ;;  %v2738_v15 = vsel %vm2705_vm6, %v2733_v11, %v2731_v12  ;;  %v2855_v19 = vld [vmem:[#allocation2 + $0x18] sm:$0xff] }
  0xad   : > { %v4868_v22 = vld [vmem:[#allocation2 + $0x14] ss:$8 sps:$4 sm:$0xff]   ;;  %2679 = vst [vmem:[#allocation2 + $0x28] sm:$0x33] %v4659_v10  ;;  %3186 = vst [vmem:[#allocation2 + $0x78] sm:$0x33] %v4659_v10  ;;  %v2739_v21 = vmul.f32 %v2734_v13, %v5283_v2  ;;  %v2740_v23 = vmul.f32 %v2738_v15, %v5289_v9  ;;  %v4528_v27 = vcombine.low %v2854_v16, %v2855_v19 }
  0xae   : > { %3027 = vst [vmem:[#allocation2 + $0x10] sm:$0xcc] %v5216_v47  ;;  %3028 = vst [vmem:[#allocation2 + $0x18] sm:$0x33] %v5237_v0  ;;  %2935 = vmatprep.subr.bf16.mxu0 %v4868_v22 }
  0xaf   : > { %v4662_v30 = vpack.c.bf16 %v2740_v23, %v2739_v21  ;;  %v2782_v31 = vpop.permute.xlu1 %2781  ;;  %v2780_v32 = vpop.permute.xlu0 %2779  ;;  %2936 = vmatpush1.bf16.msra.mxu0 %v4528_v27 }
  0xb0   : > { %v2783_v24 = vsel %vm759_vm7, %v2780_v32, %v2782_v31  ;;  %v2787_v33 = vsel %vm759_vm7, %v2782_v31, %v2780_v32 }
  0xb1   : > { %v2748_v34 = vrot.slane %v4662_v30, 6  ;;  %v2788_v35 = vmul.f32 %v2783_v24, %v5294_v20  ;;  %v2789_v47 = vmul.f32 %v2787_v33, %v5301_v26 }
  0xb3   : > { %2750 = vst [vmem:[#allocation2 + $0x30] sm:$0xcc] %v2748_v34  ;;  %3275 = vst [vmem:[#allocation2 + $0xa0] sm:$0xcc] %v2748_v34  ;;  %v4664_v25 = vpack.c.bf16 %v2789_v47, %v2788_v35  ;;  %v2704_v0 = vpop.permute.xlu1 %2703  ;;  %v2702_v40 = vpop.permute.xlu0 %2701  ;;  %v4875_v47 = vld [vmem:[%s6241_s6] sm:$0xff]  }
  0xb4   : > { %v2706_v41 = vsel %vm2705_vm6, %v2702_v40, %v2704_v0  ;;  %v2710_v42 = vsel %vm2705_vm6, %v2704_v0, %v2702_v40  ;;  %v2857_v43 = vld [vmem:[#allocation2 + $0x28] sm:$0xff] }
  0xb5   : > { %v4870_v44 = vld [vmem:[#allocation2 + $0x24] ss:$8 sps:$4 sm:$0xff]   ;;  %v2797_v45 = vrot.slane %v4664_v25, 6  ;;  %v2719_v49 = vmul.f32 %v5283_v2, %v2706_v41  ;;  %v2720_v50 = vmul.f32 %v5289_v9, %v2710_v42  ;;  %v4530_v51 = vcombine.low %v2856_v36, %v2857_v43 }
  0xb6   : > { %3072 = vst [vmem:[#allocation2 + $0x28] sm:$0xcc] %v5231_v60  ;;  %2937 = vmatprep.subr.bf16.mxu0 %v4870_v44  ;;  %v5319_v60 = vld [vmem:[%s6238_s3 + $0x10] ss:$0 sm:$0xff] }
  0xb7   : > { %2799 = vst [vmem:[#allocation2 + $0x38] sm:$0xcc] %v2797_v45  ;;  %3320 = vst [vmem:[#allocation2 + $0xb8] sm:$0xcc] %v2797_v45  ;;  %v4661_v52 = vpack.c.bf16 %v2720_v50, %v2719_v49  ;;  %v2754_v53 = vpop.permute.xlu1 %2753  ;;  %v2752_v54 = vpop.permute.xlu0 %2751  ;;  %2938 = vmatpush1.bf16.msra.mxu0 %v4530_v51 }
  0xb8   : > { %v2755_v56 = vsel %vm759_vm7, %v2752_v54, %v2754_v53  ;;  %v2759_v57 = vsel %vm759_vm7, %v2754_v53, %v2752_v54 }
  0xb9   : > { %2729 = vst [vmem:[#allocation2 + $0x30] sm:$0x33] %v4661_v52  ;;  %3231 = vst [vmem:[#allocation2 + $0x90] sm:$0x33] %v4661_v52  ;;  %v2768_v58 = vmul.f32 %v5294_v20, %v2755_v56  ;;  %v2769_v61 = vmul.f32 %v5301_v26, %v2759_v57 }
  0xbb   : > { %v4663_v63 = vpack.c.bf16 %v2769_v61, %v2768_v58  ;;  %v2832_v1 = vpop.permute.xlu1 %2831  ;;  %v2830_v3 = vpop.permute.xlu0 %2829 }
  0xbc   : > { %v2833_v4 = vsel %vm2804_vm8, %v2830_v3, %v2832_v1  ;;  %v2837_v5 = vsel %vm2804_vm8, %v2832_v1, %v2830_v3 }
  0xbd   : > { %2778 = vst [vmem:[#allocation2 + $0x38] sm:$0x33] %v4663_v63  ;;  %3276 = vst [vmem:[#allocation2 + $0xa8] sm:$0x33] %v4663_v63  ;;  %v2838_v6 = vmul.f32 %v5319_v60, %v2833_v4  ;;  %v2839_v10 = vmul.f32 %v5324_v62, %v2837_v5 }
  0xbf   : > { %v4666_v11 = vpack.c.bf16 %v2839_v10, %v2838_v6  ;;  %v2803_v12 = vpop.permute.xlu1 %2802  ;;  %v2801_v13 = vpop.permute.xlu0 %2800 }
  0xc0   : > { %v2805_v15 = vsel %vm2804_vm8, %v2801_v13, %v2803_v12  ;;  %v2809_v16 = vsel %vm2804_vm8, %v2803_v12, %v2801_v13  ;;  %v2858_v27 = vld [vmem:[#allocation2 + $0x30] sm:$0xff] }
  0xc1   : > { %v2847_v19 = vrot.slane %v4666_v11, 6  ;;  %v2818_v22 = vmul.f32 %v5319_v60, %v2805_v15  ;;  %v2819_v21 = vmul.f32 %v5324_v62, %v2809_v16 }
  0xc3   : > { %2849 = vst [vmem:[#allocation2 + $0x40] sm:$0xcc] %v2847_v19  ;;  %3365 = vst [vmem:[#allocation2 + $0xd0] sm:$0xcc] %v2847_v19  ;;  %v4665_v23 = vpack.c.bf16 %v2819_v21, %v2818_v22 }
  0xc4   : > { %v2859_v30 = vld [vmem:[#allocation2 + $0x38] sm:$0xff] }
  0xc5   : > { %v4872_v31 = vld [vmem:[#allocation2 + $0x34] ss:$8 sps:$4 sm:$0xff]   ;;  %2828 = vst [vmem:[#allocation2 + $0x40] sm:$0x33] %v4665_v23  ;;  %3321 = vst [vmem:[#allocation2 + $0xc0] sm:$0x33] %v4665_v23  ;;  %v4532_v32 = vcombine.low %v2858_v27, %v2859_v30 }
  0xc6   : > { %3073 = vst [vmem:[#allocation2 + $0x30] sm:$0x33] %v5262_v39  ;;  %2939 = vmatprep.subr.bf16.mxu0 %v4872_v31 }
  0xc7   : > { %2940 = vmatpush1.bf16.msra.mxu0 %v4532_v32 }
  0xcc   : > { %v2860_v24 = vld [vmem:[#allocation2 + $0x40] sm:$0xff] }
  0xcd   : > { %v4535_v33 = vcombine.high %v2860_v24, %v2860_v24  ;;  %3117 = vst [vmem:[#allocation2 + $0x40] sm:$0xcc] %v5252_v14  ;;  %v4534_v34 = vcombine.low %v2860_v24, %v2860_v24 }
  0xcf   : > { %4536 = vmatprep.subr.msk.bf16.mxu0 %vm2415_vm9, %v4535_v33  ;;  %v2928_v35 = vsel %vm2415_vm9, %v4534_v34, 0 }
  0xd0   : > { %2942 = vmatpush1.bf16.msra.mxu0 %v2928_v35  ;;  %v2866_v54 = vpop.permute.xlu0 %2865  ;;  %v2871_v57 = vpop.permute.xlu1 %2870 }
  0xd3   : > { %4537 = vmatmul.mubr.msk.bf16.vlgmr.msra.gmra.mrb[16].mxu0 %vm2923_vm10, %v4875_v47  ;;  %vm753_vm10 = vcmask 523264  }
  0xe7   : > { %v4774_v36 = vpop.f32.mrb[0].mxu0 }
  0xe8   : > { %v834_v0 = vpop.f32.mrb[1].mxu0 }
  0xe9   : > { %v4764_v39 = vpop.f32.mrb[0].mxu1 }
  0xea   : > { %v599_v25 = vpop.f32.mrb[1].mxu1 }
  0xeb   : > { %4767 = vmatprep.mubr.msk.f32.mxu1 %vm526_vm0, %v599_v25  ;;  %v4784_v14 = vpop.f32.mrb[2].mxu0 }
  0xec   : > { %4768 = vmatmul.mubr.msk.f32.vlgmr.msra.gmra.mrb[2].mxu1 %vm526_vm0, %v4764_v39  ;;  %v1062_v40 = vpop.f32.mrb[3].mxu0 }
  0xed   : > { %4776 = vmatpush3.msra.mxu1 %v5170_v18  ;;  %4777 = vmatprep.mubr.msk.f32.mxu1 %vm526_vm0, %v834_v0 }
  0xee   : > { %4785 = vmatprep.subr.mxu1 %v5170_v18 }
  0xef   : > { %v4794_v41 = vpop.f32.mrb[4].mxu0 }
  0xf0   : > { %4778 = vmatmul.mubr.msk.f32.vlgmr.msra.gmra.mrb[4].mxu1 %vm526_vm0, %v4774_v36  ;;  %v1290_v42 = vpop.f32.mrb[5].mxu0 }
  0xf1   : > { %4786 = vmatpush3.msra.mxu1 %v5170_v18  ;;  %4787 = vmatprep.mubr.msk.f32.mxu1 %vm526_vm0, %v1062_v40 }
  0xf2   : > { %4795 = vmatprep.subr.mxu1 %v5170_v18 }
  0xf3   : > { %v4804_v43 = vpop.f32.mrb[6].mxu0 }
  0xf4   : > { %4788 = vmatmul.mubr.msk.f32.vlgmr.msra.gmra.mrb[6].mxu1 %vm526_vm0, %v4784_v14  ;;  %v1518_v44 = vpop.f32.mrb[7].mxu0  ;;  %v3394_v14 = vld [vmem:[%s6244_s9] sm:$0xff] }
  0xf5   : > { %4796 = vmatpush3.msra.mxu1 %v5170_v18  ;;  %4797 = vmatprep.mubr.msk.f32.mxu1 %vm526_vm0, %v1290_v42 }
  0xf6   : > { %4805 = vmatprep.subr.mxu1 %v5170_v18 }
  0xf7   : > { %v4814_v45 = vpop.f32.mrb[8].mxu0 }
  0xf8   : > { %4798 = vmatmul.mubr.msk.f32.vlgmr.msra.gmra.mrb[8].mxu1 %vm526_vm0, %v4794_v41  ;;  %v1746_v49 = vpop.f32.mrb[9].mxu0 }
  0xf9   : > { %4806 = vmatpush3.msra.mxu1 %v5170_v18  ;;  %4807 = vmatprep.mubr.msk.f32.mxu1 %vm526_vm0, %v1518_v44 }
  0xfa   : > { %4815 = vmatprep.subr.mxu1 %v5170_v18 }
  0xfb   : > { %v4824_v50 = vpop.f32.mrb[10].mxu0 }
  0xfc   : > { %4808 = vmatmul.mubr.msk.f32.vlgmr.msra.gmra.mrb[10].mxu1 %vm526_vm0, %v4804_v43  ;;  %v1974_v51 = vpop.f32.mrb[11].mxu0  ;;  %v5455_v43 = vld [vmem:[%s6243_s8] sm:$0xff] }
  0xfd   : > { %4816 = vmatpush3.msra.mxu1 %v5170_v18  ;;  %4817 = vmatprep.mubr.msk.f32.mxu1 %vm526_vm0, %v1746_v49 }
  0xfe   : > { %4825 = vmatprep.subr.mxu1 %v5170_v18 }
  0xff   : > { %v4834_v52 = vpop.f32.mrb[12].mxu0 }
 0x100   : > { %4818 = vmatmul.mubr.msk.f32.vlgmr.msra.gmra.mrb[12].mxu1 %vm526_vm0, %v4814_v45  ;;  %v2202_v53 = vpop.f32.mrb[13].mxu0  ;;  %v4557_v45 = vcombine.high %v5455_v43, %v5455_v43 }
 0x101   : > { %4826 = vmatpush3.msra.mxu1 %v5170_v18  ;;  %4827 = vmatprep.mubr.msk.f32.mxu1 %vm526_vm0, %v1974_v51 }
 0x102   : > { %4835 = vmatprep.subr.mxu1 %v5170_v18 }
 0x104   : > { %4828 = vmatmul.mubr.msk.f32.vlgmr.msra.gmra.mrb[14].mxu1 %vm526_vm0, %v4824_v50 }
 0x105   : > { %4836 = vmatpush3.msra.mxu1 %v5170_v18  ;;  %4837 = vmatprep.mubr.msk.f32.mxu1 %vm526_vm0, %v2202_v53 }
 0x108   : > { %4838 = vmatmul.mubr.msk.f32.vlgmr.msra.gmra.mrb[16].mxu1 %vm526_vm0, %v4834_v52  ;;  %vm751_vm0 = vcmask 392192  }
 0x109   : > { %4587 = vmatprep.mubr.msk.bf16.mxu1 %vm3541_vm14, %v4557_v45  ;;  %vm2406_vm14 = vcmask 1040384  }
 0x1a6   : > { %v2967_v56 = vpop.f32.mrb[16].mxu0 }
 0x1a7   : > { %v2968_v58 = vadd.f32 %v2967_v56, %v2866_v54  ;;  %v2969_v61 = vpop.f32.mrb[17].mxu0 }
 0x1a8   : > { %v2970_v63 = vadd.f32 %v2969_v61, %v2866_v54  ;;  %v2971_v1 = vpop.f32.mrb[18].mxu0 }
 0x1a9   : > { %v2972_v3 = vadd.f32 %v2971_v1, %v2871_v57  ;;  %v2973_v4 = vpop.f32.mrb[19].mxu0  ;;  %2987 = vrot.lane.b32.xlu0 %v2968_v58, %s4933_s26 }
 0x1aa   : > { %v2974_v5 = vadd.f32 %v2973_v4, %v2871_v57  ;;  %2979 = vrot.lane.b32.xlu1 %v2970_v63, %s4933_s26  ;;  %v4675_v18 = vpack.c.bf16 %v2970_v63, %v2968_v58 }
 0x1ac   : > { %v4676_v6 = vpack.c.bf16 %v2974_v5, %v2972_v3  ;;  %v3174_v10 = vrot.slane %v4675_v18, 6 }
 0x1ad   : > { %3035 = vrot.lane.b32.xlu0 %v2968_v58, %s4932_s25 }
 0x1ae   : > { %v3176_v12 = vrot.slane %v4676_v6, 6  ;;  %3029 = vrot.lane.b32.xlu1 %v2970_v63, %s4932_s25  ;;  %v3175_v13 = vrot.slane %v3174_v10, 4  ;;  %3182 = vst [vmem:[#allocation2 + $0x60] sm:$0xcc] %v3174_v10 }
 0x1b0   : > { %v5381_v15 = vsel %vm5374_vm13, %v3175_v13, %v3176_v12  ;;  %v3178_v16 = vrot.slane %v3176_v12, 4 }
 0x1b1   : > { %3080 = vrot.lane.b32.xlu0 %v2968_v58, %s4934_s18 }
 0x1b2   : > { %3074 = vrot.lane.b32.xlu1 %v2970_v63, %s4934_s18  ;;  %3184 = vst [vmem:[#allocation2 + $0x70] sm:$0x33] %v3178_v16 }
 0x1b5   : > { %2989 = vrot.lane.b32.xlu0 %v2972_v3, %s4933_s26 }
 0x1b6   : > { %2981 = vrot.lane.b32.xlu1 %v2974_v5, %s4933_s26 }
 0x1b9   : > { %3037 = vrot.lane.b32.xlu0 %v2972_v3, %s4932_s25 }
 0x1ba   : > { %3031 = vrot.lane.b32.xlu1 %v2974_v5, %s4932_s25 }
 0x1bd   : > { %3082 = vrot.lane.b32.xlu0 %v2972_v3, %s4934_s18 }
 0x1be   : > { %3119 = vrot.lane.b32.xlu1 %v2970_v63, %s4935_s19 }
 0x1bf   : > { %v5391_v19 = vpop.f32.mrb[2].mxu1 }
 0x1c0   : > { %v5393_v22 = vpop.f32.mrb[3].mxu1  ;;  %v719_v36 = vrot.slane %v5391_v19, 1  ;;  %v723_v40 = vrot.slane %v5391_v19, 2  ;;  %v743_v41 = vrot.slane %v5391_v19, 7  ;;  %v727_v42 = vrot.slane %v5391_v19, 3 }
 0x1c1   : > { %3125 = vrot.lane.b32.xlu0 %v2968_v58, %s4935_s19  ;;  %v690_v44 = vrot.slane %v5393_v22, 1  ;;  %v731_v49 = vrot.slane %v5391_v19, 4  ;;  %v694_v50 = vrot.slane %v5393_v22, 2  ;;  %v735_v51 = vrot.slane %v5391_v19, 5 }
 0x1c2   : > { %3076 = vrot.lane.b32.xlu1 %v2974_v5, %s4934_s18  ;;  %v698_v52 = vrot.slane %v5393_v22, 3  ;;  %v739_v53 = vrot.slane %v5391_v19, 6  ;;  %v702_v54 = vrot.slane %v5393_v22, 4  ;;  %v714_v56 = vrot.slane %v5393_v22, 7 }
 0x1c3   : > { %v5397_v21 = vpop.f32.mrb[4].mxu1  ;;  %v706_v57 = vrot.slane %v5393_v22, 5  ;;  %v710_v61 = vrot.slane %v5393_v22, 6 }
 0x1c4   : > { %v5399_v23 = vpop.f32.mrb[5].mxu1  ;;  %v970_v6 = vrot.slane %v5397_v21, 5  ;;  %v974_v12 = vrot.slane %v5397_v21, 6 }
 0x1c5   : > { %3127 = vrot.lane.b32.xlu0 %v2972_v3, %s4935_s19  ;;  %v925_v1 = vrot.slane %v5399_v23, 1  ;;  %v929_v4 = vrot.slane %v5399_v23, 2  ;;  %v933_v18 = vrot.slane %v5399_v23, 3  ;;  %v937_v10 = vrot.slane %v5399_v23, 4 }
 0x1c6   : > { %3121 = vrot.lane.b32.xlu1 %v2974_v5, %s4935_s19  ;;  %v941_v13 = vrot.slane %v5399_v23, 5 }
 0x1c7   : > { %v5403_v27 = vpop.f32.mrb[6].mxu1 }
 0x1c8   : > { %v5405_v30 = vpop.f32.mrb[7].mxu1 }
 0x1c9   : > { %3189 = vrot.lane.b32.xlu0 %v2970_v63, %s4936_s20 }
 0x1ca   : > { %3187 = vrot.lane.b32.xlu1 %v2968_v58, %s4936_s20 }
 0x1cb   : > { %v5409_v31 = vpop.f32.mrb[8].mxu1 }
 0x1cc   : > { %v5411_v32 = vpop.f32.mrb[9].mxu1 }
 0x1cd   : > { %3234 = vrot.lane.b32.xlu0 %v2970_v63, %s4937_s21 }
 0x1ce   : > { %3191 = vrot.lane.b32.xlu1 %v2972_v3, %s4936_s20 }
 0x1cf   : > { %v5419_v24 = vpop.f32.mrb[10].mxu1 }
 0x1d0   : > { %v5423_v33 = vpop.f32.mrb[11].mxu1 }
 0x1d1   : > { %3193 = vrot.lane.b32.xlu0 %v2974_v5, %s4936_s20  ;;  %v1609_v11 = vrot.slane %v5423_v33, 1 }
 0x1d2   : > { %3232 = vrot.lane.b32.xlu1 %v2968_v58, %s4937_s21 }
 0x1d3   : > { %v5427_v34 = vpop.f32.mrb[12].mxu1 }
 0x1d4   : > { %v5429_v35 = vpop.f32.mrb[13].mxu1 }
 0x1d5   : > { %3279 = vrot.lane.b32.xlu0 %v2970_v63, %s4938_s22 }
 0x1d6   : > { %3236 = vrot.lane.b32.xlu1 %v2972_v3, %s4937_s21 }
 0x1d7   : > { %v5433_v47 = vpop.f32.mrb[14].mxu1 }
 0x1d8   : > { %v5435_v39 = vpop.f32.mrb[15].mxu1 }
 0x1d9   : > { %3238 = vrot.lane.b32.xlu0 %v2974_v5, %s4937_s21 }
 0x1da   : > { %3277 = vrot.lane.b32.xlu1 %v2968_v58, %s4938_s22 }
 0x1db   : > { %v5439_v25 = vpop.f32.mrb[16].mxu1 }
 0x1dc   : > { %v5442_v0 = vpop.f32.mrb[17].mxu1 }
 0x1dd   : > { %3283 = vrot.lane.b32.xlu0 %v2974_v5, %s4938_s22 }
 0x1de   : > { %3281 = vrot.lane.b32.xlu1 %v2972_v3, %s4938_s22 }
 0x1e1   : > { %3324 = vrot.lane.b32.xlu0 %v2970_v63, %s4939_s23  ;;  %v958_v63 = vrot.slane %v5397_v21, 2 }
 0x1e2   : > { %3322 = vrot.lane.b32.xlu1 %v2968_v58, %s4939_s23  ;;  %v954_v58 = vrot.slane %v5397_v21, 1 }
 0x1e5   : > { %3328 = vrot.lane.b32.xlu0 %v2974_v5, %s4939_s23  ;;  %v966_v5 = vrot.slane %v5397_v21, 4 }
 0x1e6   : > { %3326 = vrot.lane.b32.xlu1 %v2972_v3, %s4939_s23  ;;  %v962_v3 = vrot.slane %v5397_v21, 3 }
 0x1e9   : > { %720 = vrot.lane.b32.xlu0 %v719_v36, %s4932_s25  ;;  %v978_v36 = vrot.slane %v5397_v21, 7 }
 0x1ea   : > { %3397 = vperm.xlu1 %4863, %v3394_v14  }
 0x1ed   : > { %724 = vrot.lane.b32.xlu0 %v723_v40, %s4941_s24  ;;  %v945_v40 = vrot.slane %v5399_v23, 6 }
 0x1ee   : > { %744 = vrot.lane.b32.xlu1 %v743_v41, %s4938_s22 }
 0x1f1   : > { %728 = vrot.lane.b32.xlu0 %v727_v42, %s4942_s15 }
 0x1f2   : > { %691 = vrot.lane.b32.xlu1 %v690_v44, %s4932_s25  ;;  %v1182_v44 = vrot.slane %v5403_v27, 1 }
 0x1f5   : > { %732 = vrot.lane.b32.xlu0 %v731_v49, %s4943_s30 }
 0x1f6   : > { %695 = vrot.lane.b32.xlu1 %v694_v50, %s4941_s24 }
 0x1f9   : > { %736 = vrot.lane.b32.xlu0 %v735_v51, %s4944_s16 }
 0x1fa   : > { %699 = vrot.lane.b32.xlu1 %v698_v52, %s4942_s15 }
 0x1fd   : > { %740 = vrot.lane.b32.xlu0 %v739_v53, %s4945_s27  ;;  %v949_v53 = vrot.slane %v5399_v23, 7 }
 0x1fe   : > { %703 = vrot.lane.b32.xlu1 %v702_v54, %s4943_s30 }
 0x201   : > { %715 = vrot.lane.b32.xlu0 %v714_v56, %s4938_s22 }
 0x202   : > { %707 = vrot.lane.b32.xlu1 %v706_v57, %s4944_s16  ;;  %v1186_v57 = vrot.slane %v5403_v27, 2 }
 0x205   : > { %955 = vrot.lane.b32.xlu0 %v954_v58, %s4932_s25 }
 0x206   : > { %711 = vrot.lane.b32.xlu1 %v710_v61, %s4945_s27 }
 0x209   : > { %959 = vrot.lane.b32.xlu0 %v958_v63, %s4941_s24 }
 0x20a   : > { %926 = vrot.lane.b32.xlu1 %v925_v1, %s4932_s25  ;;  %v1153_v1 = vrot.slane %v5405_v30, 1 }
 0x20d   : > { %963 = vrot.lane.b32.xlu0 %v962_v3, %s4942_s15 }
 0x20e   : > { %930 = vrot.lane.b32.xlu1 %v929_v4, %s4941_s24 }
 0x211   : > { %967 = vrot.lane.b32.xlu0 %v966_v5, %s4943_s30 }
 0x212   : > { %934 = vrot.lane.b32.xlu1 %v933_v18, %s4942_s15 }
 0x215   : > { %971 = vrot.lane.b32.xlu0 %v970_v6, %s4944_s16 }
 0x216   : > { %938 = vrot.lane.b32.xlu1 %v937_v10, %s4943_s30  ;;  %v1190_v10 = vrot.slane %v5403_v27, 3 }
 0x219   : > { %975 = vrot.lane.b32.xlu0 %v974_v12, %s4945_s27 }
 0x21a   : > { %942 = vrot.lane.b32.xlu1 %v941_v13, %s4944_s16 }
 0x21b   : > { %v2988_v16 = vpop.permute.xlu0 %2987 }
 0x21c   : > { %v2980_v14 = vpop.permute.xlu1 %2979 }
 0x21d   : > { %v2991_v41 = vsel %vm2434_vm1, %v2988_v16, %v2980_v14  ;;  %v2997_v42 = vsel %vm2434_vm1, %v2980_v14, %v2988_v16  ;;  %979 = vrot.lane.b32.xlu0 %v978_v36, %s4938_s22  ;;  %v1157_v36 = vrot.slane %v5405_v30, 2 }
 0x21e   : > { %v2999_v45 = vmul.f32 %v2997_v42, %v5195_v28  ;;  %v3000_v49 = vmul.f32 %v2991_v41, %v5198_v29  ;;  %946 = vrot.lane.b32.xlu1 %v945_v40, %s4945_s27 }
 0x21f   : > { %v3036_v50 = vpop.permute.xlu0 %3035 }
 0x220   : > { %v4667_v51 = vpack.c.bf16 %v3000_v49, %v2999_v45  ;;  %v3030_v52 = vpop.permute.xlu1 %3029  ;;  %v1194_v45 = vrot.slane %v5403_v27, 4 }
 0x221   : > { %v3039_v54 = vsel %vm747_vm2, %v3036_v50, %v3030_v52  ;;  %v3045_v56 = vsel %vm747_vm2, %v3030_v52, %v3036_v50  ;;  %1183 = vrot.lane.b32.xlu0 %v1182_v44, %s4932_s25  ;;  %v1161_v52 = vrot.slane %v5405_v30, 3 }
 0x222   : > { %v3016_v58 = vrot.slane %v4667_v51, 6  ;;  %v3047_v61 = vmul.f32 %v3045_v56, %v5206_v37  ;;  %v3048_v63 = vmul.f32 %v3039_v54, %v5209_v38  ;;  %950 = vrot.lane.b32.xlu1 %v949_v53, %s4938_s22 }
 0x223   : > { %v3081_v3 = vpop.permute.xlu0 %3080 }
 0x224   : > { %3024 = vst [vmem:[#allocation2] sm:$0xcc] %v3016_v58  ;;  %v4669_v4 = vpack.c.bf16 %v3048_v63, %v3047_v61  ;;  %v3075_v5 = vpop.permute.xlu1 %3074  ;;  %v1198_v63 = vrot.slane %v5403_v27, 5 }
 0x225   : > { %v3084_v18 = vsel %vm2535_vm3, %v3081_v3, %v3075_v5  ;;  %v3090_v6 = vsel %vm2535_vm3, %v3075_v5, %v3081_v3  ;;  %1187 = vrot.lane.b32.xlu0 %v1186_v57, %s4941_s24 }
 0x226   : > { %v5525_v12 = vrot.slane %v4669_v4, 6  ;;  %v3092_v13 = vmul.f32 %v3090_v6, %v5224_v55  ;;  %v3093_v16 = vmul.f32 %v3084_v18, %v5229_v59  ;;  %1154 = vrot.lane.b32.xlu1 %v1153_v1, %s4932_s25  ;;  %v3017_v1 = vrot.slane %v3016_v58, 4 }
 0x227   : > { %v2990_v14 = vpop.permute.xlu0 %2989 }
 0x228   : > { %3069 = vst [vmem:[#allocation2 + $0x18] sm:$0xcc] %v5525_v12  ;;  %v4671_v40 = vpack.c.bf16 %v3093_v16, %v3092_v13  ;;  %v2982_v41 = vpop.permute.xlu1 %2981 }
 0x229   : > { %v2992_v42 = vsel %vm2434_vm1, %v2990_v14, %v2982_v41  ;;  %v2998_v44 = vsel %vm2434_vm1, %v2982_v41, %v2990_v14  ;;  %1191 = vrot.lane.b32.xlu0 %v1190_v10, %s4942_s15 }
 0x22a   : > { %v5536_v49 = vrot.slane %v4671_v40, 6  ;;  %v3001_v50 = vmul.f32 %v2998_v44, %v5195_v28  ;;  %v3002_v51 = vmul.f32 %v2992_v42, %v5198_v29  ;;  %1158 = vrot.lane.b32.xlu1 %v1157_v36, %s4941_s24  ;;  %v1165_v36 = vrot.slane %v5405_v30, 4 }
 0x22b   : > { %v3038_v53 = vpop.permute.xlu0 %3037  ;;  %v3367_v14 = vld [vmem:[#allocation2] sm:$0xff]  ;;  %v1202_v44 = vrot.slane %v5403_v27, 6 }
 0x22c   : > { %3114 = vst [vmem:[#allocation2 + $0x30] sm:$0xcc] %v5536_v49  ;;  %v4668_v54 = vpack.c.bf16 %v3002_v51, %v3001_v50  ;;  %v3032_v56 = vpop.permute.xlu1 %3031 }
 0x22d   : > { %v3040_v57 = vsel %vm747_vm2, %v3038_v53, %v3032_v56  ;;  %v3046_v61 = vsel %vm747_vm2, %v3032_v56, %v3038_v53  ;;  %1195 = vrot.lane.b32.xlu0 %v1194_v45, %s4943_s30  ;;  %v1169_v53 = vrot.slane %v5405_v30, 5 }
 0x22e   : > { %v3018_v3 = vrot.slane %v4668_v54, 6  ;;  %v3049_v4 = vmul.f32 %v3046_v61, %v5206_v37  ;;  %v3050_v5 = vmul.f32 %v3040_v57, %v5209_v38  ;;  %1162 = vrot.lane.b32.xlu1 %v1161_v52, %s4942_s15 }
 0x22f   : > { %v3083_v18 = vpop.permute.xlu0 %3082 }
 0x230   : > { %v3019_v6 = vsel %vm5374_vm13, %v3017_v1, %v3018_v3  ;;  %v3020_v10 = vrot.slane %v3018_v3, 4  ;;  %v4670_v13 = vpack.c.bf16 %v3050_v5, %v3049_v4  ;;  %v3120_v16 = vpop.permute.xlu1 %3119  ;;  %v1206_v5 = vrot.slane %v5403_v27, 7 }
 0x231   : > { %1199 = vrot.lane.b32.xlu0 %v1198_v63, %s4944_s16  ;;  %v4559_v58 = vcombine.high %v3367_v14, %v3019_v6  ;;  %v4558_v40 = vcombine.low %v3367_v14, %v3019_v6 }
 0x232   : > { %3026 = vst [vmem:[#allocation2 + $0x10] sm:$0x33] %v3020_v10  ;;  %v3063_v41 = vrot.slane %v4670_v13, 6  ;;  %1166 = vrot.lane.b32.xlu1 %v1165_v36, %s4943_s30  ;;  %v1173_v13 = vrot.slane %v5405_v30, 6 }
 0x233   : > { %v3126_v42 = vpop.permute.xlu0 %3125  ;;  %3551 = vmatprep.subr.bf16.mxu1 %v4559_v58 }
 0x234   : > { %v3065_v45 = vrot.slane %v3063_v41, 4  ;;  %v3129_v50 = vsel %vm2585_vm4, %v3126_v42, %v3120_v16  ;;  %v3135_v51 = vsel %vm2585_vm4, %v3120_v16, %v3126_v42  ;;  %v3077_v52 = vpop.permute.xlu1 %3076  ;;  %3552 = vmatpush1.bf16.msra.mxu1 %v4558_v40  ;;  %v1410_v16 = vrot.slane %v5409_v31, 1 }
 0x235   : > { %v3137_v54 = vmul.f32 %v3135_v51, %v5245_v7  ;;  %v3138_v56 = vmul.f32 %v3129_v50, %v5248_v8  ;;  %v3085_v57 = vsel %vm2535_vm3, %v3083_v18, %v3077_v52  ;;  %v3091_v61 = vsel %vm2535_vm3, %v3077_v52, %v3083_v18  ;;  %1203 = vrot.lane.b32.xlu0 %v1202_v44, %s4945_s27 }
 0x236   : > { %3071 = vst [vmem:[#allocation2 + $0x28] sm:$0x33] %v3065_v45  ;;  %v3094_v63 = vmul.f32 %v3091_v61, %v5224_v55  ;;  %v3095_v1 = vmul.f32 %v3085_v57, %v5229_v59  ;;  %1170 = vrot.lane.b32.xlu1 %v1169_v53, %s4944_s16  ;;  %v3062_v50 = vrot.slane %v5525_v12, 4  ;;  %v3107_v51 = vrot.slane %v5536_v49, 4 }
 0x237   : > { %v4673_v3 = vpack.c.bf16 %v3138_v56, %v3137_v54  ;;  %v3128_v4 = vpop.permute.xlu0 %3127  ;;  %v1177_v53 = vrot.slane %v5405_v30, 7  ;;  %v1414_v61 = vrot.slane %v5409_v31, 2 }
 0x238   : > { %v4672_v6 = vpack.c.bf16 %v3095_v1, %v3094_v63  ;;  %v3122_v10 = vpop.permute.xlu1 %3121  ;;  %v1434_v63 = vrot.slane %v5409_v31, 7  ;;  %v3064_v1 = vsel %vm5374_vm13, %v3062_v50, %v3063_v41  ;;  %v1381_v50 = vrot.slane %v5411_v32, 1 }
 0x239   : > { %v5570_v18 = vrot.slane %v4673_v3, 6  ;;  %v3130_v36 = vsel %vm2585_vm4, %v3128_v4, %v3122_v10  ;;  %v3136_v14 = vsel %vm2585_vm4, %v3122_v10, %v3128_v4  ;;  %1207 = vrot.lane.b32.xlu0 %v1206_v5, %s4938_s22  ;;  %v4876_v58 = vld [vmem:[#allocation2 + $0x14] ss:$8 sps:$4 sm:$0xff]   ;;  %v4878_v40 = vld [vmem:[#allocation2 + $0x10] ss:$8 sps:$4 sm:$0xff]  }
 0x23a   : > { %v3108_v42 = vrot.slane %v4672_v6, 6  ;;  %v3139_v44 = vmul.f32 %v3136_v14, %v5245_v7  ;;  %v3140_v45 = vmul.f32 %v3130_v36, %v5248_v8  ;;  %1174 = vrot.lane.b32.xlu1 %v1173_v13, %s4945_s27  ;;  %3553 = vmatprep.subr.bf16.mxu1 %v4876_v58  ;;  %v3373_v14 = vld [vmem:[#allocation2 + $0x30] sm:$0xff] }
 0x23b   : > { %3159 = vst [vmem:[#allocation2 + $0x48] sm:$0xcc] %v5570_v18  ;;  %v3190_v52 = vpop.permute.xlu0 %3189  ;;  %3554 = vmatpush1.bf16.msra.mxu1 %v4878_v40 }
 0x23c   : > { %v3110_v54 = vrot.slane %v3108_v42, 4  ;;  %v4674_v56 = vpack.c.bf16 %v3140_v45, %v3139_v44  ;;  %v3188_v57 = vpop.permute.xlu1 %3187  ;;  %v3109_v12 = vsel %vm5374_vm13, %v3107_v51, %v3108_v42 }
 0x23d   : > { %v3195_v49 = vsel %vm2655_vm5, %v3188_v57, %v3190_v52  ;;  %v3203_v3 = vsel %vm2655_vm5, %v3190_v52, %v3188_v57  ;;  %1411 = vrot.lane.b32.xlu0 %v1410_v16, %s4932_s25  ;;  %v3372_v4 = vld [vmem:[#allocation2 + $0x28] sm:$0xff]  ;;  %v4565_v44 = vcombine.high %v3373_v14, %v3109_v12  ;;  %v1418_v16 = vrot.slane %v5409_v31, 3 }
 0x23e   : > { %3116 = vst [vmem:[#allocation2 + $0x40] sm:$0x33] %v3110_v54  ;;  %v3153_v5 = vrot.slane %v4674_v56, 6  ;;  %v3205_v6 = vmul.f32 %v3195_v49, %v5270_v46  ;;  %v3206_v10 = vmul.f32 %v3203_v3, %v5273_v48  ;;  %1178 = vrot.lane.b32.xlu1 %v1177_v53, %s4938_s22  ;;  %v4563_v13 = vcombine.high %v3064_v1, %v3372_v4 }
 0x23f   : > { %v3235_v41 = vpop.permute.xlu0 %3234  ;;  %v4562_v36 = vcombine.low %v3064_v1, %v3372_v4  ;;  %v4564_v56 = vcombine.low %v3373_v14, %v3109_v12  ;;  %v1422_v57 = vrot.slane %v5409_v31, 4  ;;  %v1385_v12 = vrot.slane %v5411_v32, 2 }
 0x240   : > { %v3155_v58 = vrot.slane %v3153_v5, 4  ;;  %v4677_v40 = vpack.c.bf16 %v3206_v10, %v3205_v6  ;;  %v3192_v42 = vpop.permute.xlu1 %3191  ;;  %3555 = vmatprep.subr.bf16.mxu1 %v4563_v13  ;;  %v3152_v10 = vrot.slane %v5570_v18, 4 }
 0x241   : > { %1415 = vrot.lane.b32.xlu0 %v1414_v61, %s4941_s24  ;;  %3556 = vmatpush1.bf16.msra.mxu1 %v4562_v36 }
 0x242   : > { %3161 = vst [vmem:[#allocation2 + $0x58] sm:$0x33] %v3155_v58  ;;  %v5596_v45 = vrot.slane %v4677_v40, 6  ;;  %1435 = vrot.lane.b32.xlu1 %v1434_v63, %s4938_s22  ;;  %3557 = vmatprep.subr.bf16.mxu1 %v4565_v44  ;;  %v3154_v40 = vsel %vm5374_vm13, %v3152_v10, %v3153_v5  ;;  %v1426_v44 = vrot.slane %v5409_v31, 5 }
 0x243   : > { %v3194_v51 = vpop.permute.xlu0 %3193 }
 0x244   : > { %3227 = vst [vmem:[#allocation2 + $0x78] sm:$0xcc] %v5596_v45  ;;  %v3196_v52 = vsel %vm2655_vm5, %v3192_v42, %v3194_v51  ;;  %v3204_v53 = vsel %vm2655_vm5, %v3194_v51, %v3192_v42  ;;  %v3233_v54 = vpop.permute.xlu1 %3232 }
 0x245   : > { %v3207_v61 = vmul.f32 %v3196_v52, %v5270_v46  ;;  %v3208_v1 = vmul.f32 %v3204_v53, %v5273_v48  ;;  %v3240_v63 = vsel %vm2705_vm6, %v3233_v54, %v3235_v41  ;;  %v3248_v49 = vsel %vm2705_vm6, %v3235_v41, %v3233_v54  ;;  %1419 = vrot.lane.b32.xlu0 %v1418_v16, %s4942_s15  ;;  %v4879_v3 = vld [vmem:[#allocation2 + $0x44] ss:$8 sps:$4 sm:$0xff]   ;;  %v4881_v41 = vld [vmem:[#allocation2 + $0x40] ss:$8 sps:$4 sm:$0xff]  }
 0x246   : > { %v3250_v4 = vmul.f32 %v3240_v63, %v5283_v2  ;;  %v3251_v6 = vmul.f32 %v3248_v49, %v5289_v9  ;;  %1382 = vrot.lane.b32.xlu1 %v1381_v50, %s4932_s25  ;;  %3558 = vmatpush1.bf16.msra.mxu1 %v4564_v56  ;;  %v3379_v50 = vld [vmem:[#allocation2 + $0x60] sm:$0xff]  ;;  %v1389_v52 = vrot.slane %v5411_v32, 3 }
 0x247   : > { %v4678_v13 = vpack.c.bf16 %v3208_v1, %v3207_v61  ;;  %v3280_v36 = vpop.permute.xlu0 %3279  ;;  %3559 = vmatprep.subr.bf16.mxu1 %v4879_v3  ;;  %v4571_v1 = vcombine.high %v3379_v50, %v5381_v15 }
 0x248   : > { %v4679_v14 = vpack.c.bf16 %v3251_v6, %v3250_v4  ;;  %v3237_v58 = vpop.permute.xlu1 %3236 }
 0x249   : > { %v3221_v42 = vrot.slane %v4678_v13, 6  ;;  %1423 = vrot.lane.b32.xlu0 %v1422_v57, %s4943_s30  ;;  %v3378_v16 = vld [vmem:[#allocation2 + $0x58] sm:$0xff] }
 0x24a   : > { %v3264_v51 = vrot.slane %v4679_v14, 6  ;;  %1386 = vrot.lane.b32.xlu1 %v1385_v12, %s4941_s24  ;;  %3560 = vmatpush1.bf16.msra.mxu1 %v4881_v41  ;;  %v4569_v18 = vcombine.high %v3154_v40, %v3378_v16  ;;  %v4568_v53 = vcombine.low %v3154_v40, %v3378_v16  ;;  %v1430_v14 = vrot.slane %v5409_v31, 6 }
 0x24b   : > { %v3223_v54 = vrot.slane %v3221_v42, 4  ;;  %v3239_v56 = vpop.permute.xlu0 %3238  ;;  %v1393_v40 = vrot.slane %v5411_v32, 4 }
 0x24c   : > { %3272 = vst [vmem:[#allocation2 + $0x90] sm:$0xcc] %v3264_v51  ;;  %v3241_v5 = vsel %vm2705_vm6, %v3237_v58, %v3239_v56  ;;  %v3249_v61 = vsel %vm2705_vm6, %v3239_v56, %v3237_v58  ;;  %v3278_v57 = vpop.permute.xlu1 %3277  ;;  %3561 = vmatprep.subr.bf16.mxu1 %v4569_v18  ;;  %v3265_v16 = vrot.slane %v3264_v51, 4 }
 0x24d   : > { %3229 = vst [vmem:[#allocation2 + $0x88] sm:$0x33] %v3223_v54  ;;  %v3252_v63 = vmul.f32 %v3241_v5, %v5283_v2  ;;  %v3253_v49 = vmul.f32 %v3249_v61, %v5289_v9  ;;  %v3285_v3 = vsel %vm759_vm7, %v3278_v57, %v3280_v36  ;;  %v3293_v4 = vsel %vm759_vm7, %v3280_v36, %v3278_v57 }
 0x24e   : > { %1427 = vrot.lane.b32.xlu0 %v1426_v44, %s4944_s16  ;;  %v3295_v6 = vmul.f32 %v3285_v3, %v5294_v20  ;;  %v3296_v12 = vmul.f32 %v3293_v4, %v5301_v26  ;;  %1390 = vrot.lane.b32.xlu1 %v1389_v52, %s4942_s15  ;;  %v4570_v36 = vcombine.low %v3379_v50, %v5381_v15  ;;  %v4882_v52 = vld [vmem:[#allocation2 + $0x74] ss:$8 sps:$4 sm:$0xff]   ;;  %v1405_v57 = vrot.slane %v5411_v32, 7  ;;  %v4884_v3 = vld [vmem:[#allocation2 + $0x70] ss:$8 sps:$4 sm:$0xff]  }
 0x24f   : > { %3562 = vmatpush1.bf16.msra.mxu1 %v4568_v53  ;;  %v4680_v10 = vpack.c.bf16 %v3253_v49, %v3252_v63  ;;  %v3284_v13 = vpop.permute.xlu0 %3283  ;;  %v3220_v53 = vrot.slane %v5596_v45, 4  ;;  %v1397_v49 = vrot.slane %v5411_v32, 5 }
 0x250   : > { %3563 = vmatprep.subr.bf16.mxu1 %v4571_v1  ;;  %v4681_v58 = vpack.c.bf16 %v3296_v12, %v3295_v6  ;;  %v3282_v41 = vpop.permute.xlu1 %3281 }
 0x251   : > { %v3266_v44 = vrot.slane %v4680_v10, 6  ;;  %v3286_v18 = vsel %vm759_vm7, %v3282_v41, %v3284_v13  ;;  %v3294_v54 = vsel %vm759_vm7, %v3284_v13, %v3282_v41  ;;  %v3222_v1 = vsel %vm5374_vm13, %v3220_v53, %v3221_v42 }
 0x252   : > { %1431 = vrot.lane.b32.xlu0 %v1430_v14, %s4945_s27  ;;  %v3309_v56 = vrot.slane %v4681_v58, 6  ;;  %v3297_v5 = vmul.f32 %v3286_v18, %v5294_v20  ;;  %v3298_v61 = vmul.f32 %v3294_v54, %v5301_v26  ;;  %1394 = vrot.lane.b32.xlu1 %v1393_v40, %s4943_s30  ;;  %v1638_v10 = vrot.slane %v5419_v24, 1 }
 0x253   : > { %3564 = vmatpush1.bf16.msra.mxu1 %v4570_v36  ;;  %v3267_v15 = vsel %vm5374_vm13, %v3265_v16, %v3266_v44  ;;  %v3268_v50 = vrot.slane %v3266_v44, 4  ;;  %v3325_v51 = vpop.permute.xlu0 %3324  ;;  %v3385_v40 = vld [vmem:[#allocation2 + $0x90] sm:$0xff]  ;;  %v1401_v16 = vrot.slane %v5411_v32, 6 }
 0x254   : > { %3565 = vmatprep.subr.bf16.mxu1 %v4882_v52  ;;  %3317 = vst [vmem:[#allocation2 + $0xa8] sm:$0xcc] %v3309_v56  ;;  %v4682_v45 = vpack.c.bf16 %v3298_v61, %v3297_v5  ;;  %v3323_v63 = vpop.permute.xlu1 %3322  ;;  %v3384_v4 = vld [vmem:[#allocation2 + $0x88] sm:$0xff]  ;;  %v3310_v14 = vrot.slane %v3309_v56, 4  ;;  %v1642_v61 = vrot.slane %v5419_v24, 2 }
 0x255   : > { %3274 = vst [vmem:[#allocation2 + $0xa0] sm:$0x33] %v3268_v50  ;;  %v3330_v6 = vsel %vm2804_vm8, %v3323_v63, %v3325_v51  ;;  %v3338_v12 = vsel %vm2804_vm8, %v3325_v51, %v3323_v63  ;;  %v4575_v13 = vcombine.high %v3222_v1, %v3384_v4  ;;  %v4574_v53 = vcombine.low %v3222_v1, %v3384_v4 }
 0x256   : > { %1406 = vrot.lane.b32.xlu0 %v1405_v57, %s4938_s22  ;;  %v3311_v58 = vrot.slane %v4682_v45, 6  ;;  %v3340_v42 = vmul.f32 %v5319_v60, %v3330_v6  ;;  %v3341_v41 = vmul.f32 %v5324_v62, %v3338_v12  ;;  %1398 = vrot.lane.b32.xlu1 %v1397_v49, %s4944_s16  ;;  %v4577_v50 = vcombine.high %v3385_v40, %v3267_v15 }
 0x257   : > { %3566 = vmatpush1.bf16.msra.mxu1 %v4884_v3  ;;  %v3329_v36 = vpop.permute.xlu0 %3328  ;;  %v1658_v1 = vrot.slane %v5419_v24, 6  ;;  %v4576_v3 = vcombine.low %v3385_v40, %v3267_v15  ;;  %v1662_v15 = vrot.slane %v5419_v24, 7 }
 0x258   : > { %3567 = vmatprep.subr.bf16.mxu1 %v4575_v13  ;;  %v3312_v44 = vsel %vm5374_vm13, %v3310_v14, %v3311_v58  ;;  %v3313_v18 = vrot.slane %v3311_v58, 4  ;;  %v4683_v54 = vpack.c.bf16 %v3341_v41, %v3340_v42  ;;  %v3327_v52 = vpop.permute.xlu1 %3326 }
 0x259   : > { %v3331_v56 = vsel %vm2804_vm8, %v3327_v52, %v3329_v36  ;;  %v3339_v5 = vsel %vm2804_vm8, %v3329_v36, %v3327_v52  ;;  %v1650_v36 = vrot.slane %v5419_v24, 4  ;;  %v1654_v52 = vrot.slane %v5419_v24, 5 }
 0x25a   : > { %1639 = vrot.lane.b32.xlu0 %v1638_v10, %s4932_s25  ;;  %3319 = vst [vmem:[#allocation2 + $0xb8] sm:$0x33] %v3313_v18  ;;  %v3354_v51 = vrot.slane %v4683_v54, 6  ;;  %v3342_v57 = vmul.f32 %v5319_v60, %v3331_v56  ;;  %v3343_v45 = vmul.f32 %v5324_v62, %v3339_v5  ;;  %1402 = vrot.lane.b32.xlu1 %v1401_v16, %s4945_s27  ;;  %v1646_v62 = vrot.slane %v5419_v24, 3 }
 0x25b   : > { %3568 = vmatpush1.bf16.msra.mxu1 %v4574_v53  ;;  %v5665_v63 = vpop.permute.xlu0 %720 }
 0x25c   : > { %3569 = vmatprep.subr.bf16.mxu1 %v4577_v50  ;;  %3362 = vst [vmem:[#allocation2 + $0xc0] sm:$0xcc] %v3354_v51  ;;  %v4684_v49 = vpack.c.bf16 %v3343_v45, %v3342_v57  ;;  %v4887_v4 = vld [vmem:[#allocation2 + $0xa4] ss:$8 sps:$4 sm:$0xff]   ;;  %v3355_v6 = vrot.slane %v3354_v51, 4  ;;  %v1629_v57 = vrot.slane %v5423_v33, 6 }
 0x25d   : > { %v4885_v14 = vld [vmem:[#allocation2 + $0xa0] ss:$8 sps:$4 sm:$0xff]   ;;  %v1617_v45 = vrot.slane %v5423_v33, 3 }
 0x25e   : > { %1643 = vrot.lane.b32.xlu0 %v1642_v61, %s4941_s24  ;;  %v3356_v12 = vrot.slane %v4684_v49, 6  ;;  %1659 = vrot.lane.b32.xlu1 %v1658_v1, %s4945_s27 }
 0x25f   : > { %3570 = vmatpush1.bf16.msra.mxu1 %v4576_v3  ;;  %v5669_v60 = vpop.permute.xlu0 %724  ;;  %v4556_v3 = vcombine.low %v5455_v43, %v5455_v43  ;;  %v1866_v43 = vrot.slane %v5427_v34, 1 }
 0x260   : > { %3571 = vmatprep.subr.bf16.mxu1 %v4887_v4  ;;  %v3357_v10 = vsel %vm5374_vm13, %v3355_v6, %v3356_v12  ;;  %v3358_v13 = vrot.slane %v3356_v12, 4  ;;  %v1633_v6 = vrot.slane %v5423_v33, 7  ;;  %v1621_v12 = vrot.slane %v5423_v33, 4 }
 0x261   : > { %v3390_v58 = vld [vmem:[#allocation2 + $0xb8] sm:$0xff]  ;;  %vm757_vm13 = vcmask 785408  }
 0x262   : > { %1647 = vrot.lane.b32.xlu0 %v1646_v62, %s4942_s15  ;;  %3364 = vst [vmem:[#allocation2 + $0xd0] sm:$0x33] %v3358_v13  ;;  %1663 = vrot.lane.b32.xlu1 %v1662_v15, %s4938_s22  ;;  %v4580_v42 = vcombine.low %v3312_v44, %v3390_v58  ;;  %v4581_v41 = vcombine.high %v3312_v44, %v3390_v58  ;;  %v1613_v44 = vrot.slane %v5423_v33, 2  ;;  %v1625_v13 = vrot.slane %v5423_v33, 5 }
 0x263   : > { %3572 = vmatpush1.bf16.msra.mxu1 %v4885_v14  ;;  %v5677_v40 = vpop.permute.xlu0 %728  ;;  %v3391_v16 = vld [vmem:[#allocation2 + $0xc0] sm:$0xff]  ;;  %v1870_v58 = vrot.slane %v5427_v34, 2 }
 0x264   : > { %3573 = vmatprep.subr.bf16.mxu1 %v4581_v41  ;;  %v4583_v18 = vcombine.high %v3391_v16, %v3357_v10  ;;  %v4582_v53 = vcombine.low %v3391_v16, %v3357_v10  ;;  %v1874_v16 = vrot.slane %v5427_v34, 3 }
 0x266   : > { %1651 = vrot.lane.b32.xlu0 %v1650_v36, %s4943_s30  ;;  %1610 = vrot.lane.b32.xlu1 %v1609_v11, %s4932_s25  ;;  %v1886_v11 = vrot.slane %v5427_v34, 6 }
 0x267   : > { %3574 = vmatpush1.bf16.msra.mxu1 %v4580_v42  ;;  %v5683_v54 = vpop.permute.xlu0 %732  ;;  %v1882_v42 = vrot.slane %v5427_v34, 5 }
 0x268   : > { %3575 = vmatprep.subr.bf16.mxu1 %v4583_v18 }
 0x269   : > { %v5687_v56 = vpop.permute.xlu1 %3397  ;;  %v3393_v5 = vld [vmem:[#allocation2 + $0xd0] sm:$0xff] }
 0x26a   : > { %1655 = vrot.lane.b32.xlu0 %v1654_v52, %s4944_s16  ;;  %1614 = vrot.lane.b32.xlu1 %v1613_v44, %s4941_s24  ;;  %v4585_v61 = vcombine.high %v3393_v5, %v3393_v5  ;;  %v4584_v50 = vcombine.low %v3393_v5, %v3393_v5  ;;  %v1878_v44 = vrot.slane %v5427_v34, 4 }
 0x26b   : > { %3576 = vmatpush1.bf16.msra.mxu1 %v4582_v53  ;;  %v5691_v51 = vpop.permute.xlu0 %736  ;;  %v1890_v53 = vrot.slane %v5427_v34, 7 }
 0x26c   : > { %4586 = vmatprep.subr.msk.bf16.mxu1 %vm2415_vm9, %v4585_v61  ;;  %v3546_v1 = vsel %vm2415_vm9, %v4584_v50, 0  ;;  %v1853_v50 = vrot.slane %v5429_v35, 5 }
 0x26d   : > { %v5697_v49 = vpop.permute.xlu1 %744 }
 0x26e   : > { %1630 = vrot.lane.b32.xlu0 %v1629_v57, %s4945_s27  ;;  %1618 = vrot.lane.b32.xlu1 %v1617_v45, %s4942_s15  ;;  %v1837_v57 = vrot.slane %v5429_v35, 1 }
 0x26f   : > { %3578 = vmatpush1.bf16.msra.mxu1 %v3546_v1  ;;  %v5703_v4 = vpop.permute.xlu0 %740 }
 0x271   : > { %v5707_v62 = vpop.permute.xlu1 %691 }
 0x272   : > { %1634 = vrot.lane.b32.xlu0 %v1633_v6, %s4938_s22  ;;  %3584 = vmatmul.mubr.bf16.vlgmr.msra.gmra.mrb[20].mxu1 %v4556_v3  ;;  %v1857_v3 = vrot.slane %v5429_v35, 6  ;;  %v1841_v6 = vrot.slane %v5429_v35, 2 }
 0x273   : > { %1622 = vrot.lane.b32.xlu1 %v1621_v12, %s4943_s30  ;;  %v5711_v10 = vpop.permute.xlu0 %715 }
 0x275   : > { %v5715_v14 = vpop.permute.xlu1 %695 }
 0x276   : > { %1867 = vrot.lane.b32.xlu0 %v1866_v43, %s4932_s25  ;;  %v761_v43 = vsel %vm747_vm2, %v5391_v19, %v5665_v63  ;;  %v1845_v63 = vrot.slane %v5429_v35, 3 }
 0x277   : > { %1626 = vrot.lane.b32.xlu1 %v1625_v13, %s4944_s16  ;;  %v956_v15 = vpop.permute.xlu0 %955 }
 0x278   : > { %v989_v13 = vsel %vm747_vm2, %v5397_v21, %v956_v15 }
 0x279   : > { %v5721_v41 = vpop.permute.xlu1 %699 }
 0x27a   : > { %1871 = vrot.lane.b32.xlu0 %v1870_v58, %s4941_s24  ;;  %v762_v58 = vsel %vm749_vm15, %v761_v43, %v5669_v60  ;;  %v2098_v43 = vrot.slane %v5433_v47, 2 }
 0x27b   : > { %1883 = vrot.lane.b32.xlu1 %v1882_v42, %s4944_s16  ;;  %v960_v36 = vpop.permute.xlu0 %959 }
 0x27c   : > { %v990_v42 = vsel %vm749_vm15, %v989_v13, %v960_v36  ;;  %v2106_v13 = vrot.slane %v5433_v47, 4 }
 0x27d   : > { %v5727_v18 = vpop.permute.xlu1 %703 }
 0x27e   : > { %1875 = vrot.lane.b32.xlu0 %v1874_v16, %s4942_s15 }
 0x27f   : > { %1887 = vrot.lane.b32.xlu1 %v1886_v11, %s4945_s27  ;;  %v964_v52 = vpop.permute.xlu0 %963  ;;  %v1861_v11 = vrot.slane %v5429_v35, 7 }
 0x280   : > { %v991_v19 = vsel %vm751_vm0, %v990_v42, %v964_v52 }
 0x281   : > { %v5733_v5 = vpop.permute.xlu1 %707 }
 0x282   : > { %1879 = vrot.lane.b32.xlu0 %v1878_v44, %s4943_s30  ;;  %v763_v44 = vsel %vm751_vm0, %v762_v58, %v5677_v40 }
 0x283   : > { %1891 = vrot.lane.b32.xlu1 %v1890_v53, %s4938_s22  ;;  %v968_v61 = vpop.permute.xlu0 %967  ;;  %v764_v21 = vsel %vm753_vm10, %v763_v44, %v5683_v54  ;;  %v2094_v54 = vrot.slane %v5433_v47, 1 }
 0x284   : > { %v992_v15 = vsel %vm753_vm10, %v991_v19, %v968_v61  ;;  %v765_v36 = vsel %vm755_vm12, %v764_v21, %v5691_v51  ;;  %v2077_v19 = vrot.slane %v5435_v39, 4 }
 0x285   : > { %v5739_v45 = vpop.permute.xlu1 %711  ;;  %v766_v40 = vsel %vm757_vm13, %v765_v36, %v5703_v4 }
 0x286   : > { %1854 = vrot.lane.b32.xlu0 %v1853_v50, %s4944_s16  ;;  %v767_v51 = vsel %vm759_vm7, %v766_v40, %v5697_v49  ;;  %v2110_v49 = vrot.slane %v5433_v47, 5 }
 0x287   : > { %1838 = vrot.lane.b32.xlu1 %v1837_v57, %s4932_s25  ;;  %v972_v1 = vpop.permute.xlu0 %971  ;;  %v1849_v57 = vrot.slane %v5429_v35, 4 }
 0x288   : > { %v993_v53 = vsel %vm755_vm12, %v992_v15, %v972_v1  ;;  %v2114_v15 = vrot.slane %v5433_v47, 6 }
 0x289   : > { %v927_v12 = vpop.permute.xlu1 %926 }
 0x28a   : > { %1858 = vrot.lane.b32.xlu0 %v1857_v3, %s4945_s27  ;;  %v982_v21 = vsel %vm747_vm2, %v5399_v23, %v927_v12 }
 0x28b   : > { %1842 = vrot.lane.b32.xlu1 %v1841_v6, %s4941_s24  ;;  %v976_v16 = vpop.permute.xlu0 %975 }
 0x28c   : > { %v994_v52 = vsel %vm757_vm13, %v993_v53, %v976_v16  ;;  %v2102_v16 = vrot.slane %v5433_v47, 3 }
 0x28d   : > { %v931_v60 = vpop.permute.xlu1 %930 }
 0x28e   : > { %1862 = vrot.lane.b32.xlu0 %v1861_v11, %s4938_s22  ;;  %v983_v53 = vsel %vm749_vm15, %v982_v21, %v931_v60 }
 0x28f   : > { %1846 = vrot.lane.b32.xlu1 %v1845_v63, %s4942_s15  ;;  %v980_v50 = vpop.permute.xlu0 %979  ;;  %v748_v63 = vsel %vm747_vm2, %v5393_v22, %v5707_v62 }
 0x290   : > { %v995_v61 = vsel %vm759_vm7, %v994_v52, %v980_v50  ;;  %v750_v36 = vsel %vm749_vm15, %v748_v63, %v5715_v14  ;;  %v2081_v14 = vrot.slane %v5435_v39, 5 }
 0x291   : > { %v2367_v3 = vrot.slane %v995_v61, 7  ;;  %v935_v6 = vpop.permute.xlu1 %934  ;;  %v752_v52 = vsel %vm751_vm0, %v750_v36, %v5721_v41 }
 0x292   : > { %2095 = vrot.lane.b32.xlu0 %v2094_v54, %s4932_s25  ;;  %v984_v50 = vsel %vm751_vm0, %v983_v53, %v935_v6  ;;  %v754_v22 = vsel %vm753_vm10, %v752_v52, %v5727_v18  ;;  %v2118_v54 = vrot.slane %v5433_v47, 7 }
 0x293   : > { %1850 = vrot.lane.b32.xlu1 %v1849_v57, %s4943_s30  ;;  %v5779_v4 = vsel %vm2406_vm14, %v767_v51, %v2367_v3  ;;  %v1184_v1 = vpop.permute.xlu0 %1183  ;;  %v756_v12 = vsel %vm755_vm12, %v754_v22, %v5733_v5  ;;  %v2085_v5 = vrot.slane %v5435_v39, 6  ;;  %v2326_v22 = vrot.slane %v5439_v25, 2 }
 0x294   : > { %v758_v41 = vsel %vm757_vm13, %v756_v12, %v5739_v45  ;;  %v2301_v12 = vrot.slane %v5442_v0, 3 }
 0x295   : > { %v939_v58 = vpop.permute.xlu1 %938  ;;  %v760_v51 = vsel %vm759_vm7, %v758_v41, %v5711_v10  ;;  %v2305_v41 = vrot.slane %v5442_v0, 4 }
 0x296   : > { %2099 = vrot.lane.b32.xlu0 %v2098_v43, %s4941_s24  ;;  %v985_v23 = vsel %vm753_vm10, %v984_v50, %v939_v58  ;;  %v2065_v43 = vrot.slane %v5435_v39, 1  ;;  %v1217_v58 = vsel %vm747_vm2, %v5403_v27, %v1184_v1 }
 0x297   : > { %2107 = vrot.lane.b32.xlu1 %v2106_v13, %s4943_s30  ;;  %v1188_v42 = vpop.permute.xlu0 %1187 }
 0x299   : > { %v943_v11 = vpop.permute.xlu1 %942 }
 0x29a   : > { %2103 = vrot.lane.b32.xlu0 %v2102_v16, %s4942_s15  ;;  %v986_v60 = vsel %vm755_vm12, %v985_v23, %v943_v11  ;;  %v1218_v16 = vsel %vm749_vm15, %v1217_v58, %v1188_v42  ;;  %v2089_v11 = vrot.slane %v5435_v39, 7  ;;  %v2322_v42 = vrot.slane %v5439_v25, 1 }
 0x29b   : > { %2111 = vrot.lane.b32.xlu1 %v2110_v49, %s4944_s16  ;;  %v1192_v44 = vpop.permute.xlu0 %1191  ;;  %v2330_v23 = vrot.slane %v5439_v25, 3 }
 0x29c   : > { %v1219_v10 = vsel %vm751_vm0, %v1218_v16, %v1192_v44  ;;  %v2073_v44 = vrot.slane %v5435_v39, 3 }
 0x29d   : > { %v947_v40 = vpop.permute.xlu1 %946 }
 0x29e   : > { %2078 = vrot.lane.b32.xlu0 %v2077_v19, %s4943_s30  ;;  %v987_v61 = vsel %vm757_vm13, %v986_v60, %v947_v40  ;;  %v2069_v19 = vrot.slane %v5435_v39, 2  ;;  %v2334_v60 = vrot.slane %v5439_v25, 4 }
 0x29f   : > { %2115 = vrot.lane.b32.xlu1 %v2114_v15, %s4945_s27  ;;  %v1196_v62 = vpop.permute.xlu0 %1195 }
 0x2a0   : > { %v1220_v63 = vsel %vm753_vm10, %v1219_v10, %v1196_v62 }
 0x2a1   : > { %v951_v57 = vpop.permute.xlu1 %950 }
 0x2a2   : > { %2082 = vrot.lane.b32.xlu0 %v2081_v14, %s4944_s16  ;;  %v988_v18 = vsel %vm759_vm7, %v987_v61, %v951_v57  ;;  %v2338_v57 = vrot.slane %v5439_v25, 5 }
 0x2a3   : > { %2119 = vrot.lane.b32.xlu1 %v2118_v54, %s4938_s22  ;;  %v2366_v3 = vrot.slane %v988_v18, 7  ;;  %v1200_v6 = vpop.permute.xlu0 %1199 }
 0x2a4   : > { %v1221_v15 = vsel %vm755_vm12, %v1220_v63, %v1200_v6  ;;  %v2313_v63 = vrot.slane %v5442_v0, 6 }
 0x2a5   : > { %v5823_v45 = vsel %vm2406_vm14, %v760_v51, %v2366_v3  ;;  %v1155_v13 = vpop.permute.xlu1 %1154  ;;  %vm2412_vm14 = vcmask 1042432  }
 0x2a6   : > { %2086 = vrot.lane.b32.xlu0 %v2085_v5, %s4945_s27  ;;  %v1210_v61 = vsel %vm747_vm2, %v5405_v30, %v1155_v13  ;;  %v2293_v30 = vrot.slane %v5442_v0, 1 }
 0x2a7   : > { %2066 = vrot.lane.b32.xlu1 %v2065_v43, %s4932_s25  ;;  %v1204_v49 = vpop.permute.xlu0 %1203  ;;  %v2309_v43 = vrot.slane %v5442_v0, 5 }
 0x2a8   : > { %v1222_v27 = vsel %vm757_vm13, %v1221_v15, %v1204_v49  ;;  %v2297_v15 = vrot.slane %v5442_v0, 2 }
 0x2a9   : > { %v1159_v21 = vpop.permute.xlu1 %1158 }
 0x2aa   : > { %2090 = vrot.lane.b32.xlu0 %v2089_v11, %s4938_s22  ;;  %v1211_v18 = vsel %vm749_vm15, %v1210_v61, %v1159_v21 }
 0x2ab   : > { %2070 = vrot.lane.b32.xlu1 %v2069_v19, %s4941_s24  ;;  %v1208_v1 = vpop.permute.xlu0 %1207 }
 0x2ac   : > { %v1223_v36 = vsel %vm759_vm7, %v1222_v27, %v1208_v1 }
 0x2ad   : > { %v2373_v53 = vrot.slane %v1223_v36, 6  ;;  %v1163_v40 = vpop.permute.xlu1 %1162 }
 0x2ae   : > { %2323 = vrot.lane.b32.xlu0 %v2322_v42, %s4932_s25  ;;  %v1212_v6 = vsel %vm751_vm0, %v1211_v18, %v1163_v40 }
 0x2af   : > { %2074 = vrot.lane.b32.xlu1 %v2073_v44, %s4942_s15  ;;  %v2411_v52 = vsel %vm2409_vm11, %v5779_v4, %v2373_v53  ;;  %v1412_v50 = vpop.permute.xlu0 %1411  ;;  %v2317_v53 = vrot.slane %v5442_v0, 7 }
 0x2b0   : > { %v1445_v11 = vsel %vm747_vm2, %v5409_v31, %v1412_v50  ;;  %v2342_v50 = vrot.slane %v5439_v25, 6 }
 0x2b1   : > { %v1167_v62 = vpop.permute.xlu1 %1166 }
 0x2b2   : > { %2327 = vrot.lane.b32.xlu0 %v2326_v22, %s4941_s24  ;;  %v1213_v5 = vsel %vm753_vm10, %v1212_v6, %v1167_v62 }
 0x2b3   : > { %2331 = vrot.lane.b32.xlu1 %v2330_v23, %s4942_s15  ;;  %v1416_v14 = vpop.permute.xlu0 %1415 }
 0x2b4   : > { %v1446_v21 = vsel %vm749_vm15, %v1445_v11, %v1416_v14  ;;  %v2346_v14 = vrot.slane %v5439_v25, 7 }
 0x2b5   : > { %v1171_v54 = vpop.permute.xlu1 %1170 }
 0x2b6   : > { %2302 = vrot.lane.b32.xlu0 %v2301_v12, %s4942_s15  ;;  %v1214_v58 = vsel %vm755_vm12, %v1213_v5, %v1171_v54 }
 0x2b7   : > { %2335 = vrot.lane.b32.xlu1 %v2334_v60, %s4943_s30  ;;  %v1420_v4 = vpop.permute.xlu0 %1419 }
 0x2b8   : > { %v1447_v27 = vsel %vm751_vm0, %v1446_v21, %v1420_v4 }
 0x2b9   : > { %v1175_v3 = vpop.permute.xlu1 %1174 }
 0x2ba   : > { %2306 = vrot.lane.b32.xlu0 %v2305_v41, %s4943_s30  ;;  %v1215_v13 = vsel %vm757_vm13, %v1214_v58, %v1175_v3 }
 0x2bb   : > { %2339 = vrot.lane.b32.xlu1 %v2338_v57, %s4944_s16  ;;  %v1424_v51 = vpop.permute.xlu0 %1423 }
 0x2bc   : > { %v1448_v36 = vsel %vm753_vm10, %v1447_v27, %v1424_v51 }
 0x2bd   : > { %v1179_v16 = vpop.permute.xlu1 %1178 }
 0x2be   : > { %2310 = vrot.lane.b32.xlu0 %v2309_v43, %s4944_s16  ;;  %v1216_v49 = vsel %vm759_vm7, %v1215_v13, %v1179_v16 }
 0x2bf   : > { %2294 = vrot.lane.b32.xlu1 %v2293_v30, %s4932_s25  ;;  %v2372_v10 = vrot.slane %v1216_v49, 6 }
 0x2c0   : > { %v1428_v19 = vpop.permute.xlu0 %1427 }
 0x2c1   : > { %v2410_v1 = vsel %vm2409_vm11, %v5823_v45, %v2372_v10  ;;  %v1436_v42 = vpop.permute.xlu1 %1435  ;;  %v1449_v31 = vsel %vm755_vm12, %v1448_v36, %v1428_v19 }
 0x2c2   : > { %2314 = vrot.lane.b32.xlu0 %v2313_v63, %s4945_s27 }
 0x2c3   : > { %2298 = vrot.lane.b32.xlu1 %v2297_v15, %s4941_s24 }
 0x2c4   : > { %v1432_v44 = vpop.permute.xlu0 %1431 }
 0x2c5   : > { %v1450_v40 = vsel %vm757_vm13, %v1449_v31, %v1432_v44  ;;  %v1383_v23 = vpop.permute.xlu1 %1382 }
 0x2c6   : > { %v1451_v22 = vsel %vm759_vm7, %v1450_v40, %v1436_v42  ;;  %2318 = vrot.lane.b32.xlu0 %v2317_v53, %s4938_s22  ;;  %v1438_v18 = vsel %vm747_vm2, %v5411_v32, %v1383_v23 }
 0x2c7   : > { %v2379_v45 = vrot.slane %v1451_v22, 5  ;;  %2343 = vrot.lane.b32.xlu1 %v2342_v50, %s4945_s27 }
 0x2c8   : > { %v1407_v62 = vpop.permute.xlu0 %1406 }
 0x2c9   : > { %v2414_v12 = vsel %vm2412_vm14, %v2411_v52, %v2379_v45  ;;  %v1387_v60 = vpop.permute.xlu1 %1386 }
 0x2ca   : > { %v1439_v6 = vsel %vm749_vm15, %v1438_v18, %v1387_v60 }
 0x2cb   : > { %2347 = vrot.lane.b32.xlu1 %v2346_v14, %s4938_s22 }
 0x2cc   : > { %v1640_v54 = vpop.permute.xlu0 %1639 }
 0x2cd   : > { %v1391_v4 = vpop.permute.xlu1 %1390  ;;  %v1673_v52 = vsel %vm747_vm2, %v5419_v24, %v1640_v54 }
 0x2ce   : > { %v1440_v5 = vsel %vm751_vm0, %v1439_v6, %v1391_v4 }
 0x2d0   : > { %v1644_v41 = vpop.permute.xlu0 %1643 }
 0x2d1   : > { %v1395_v61 = vpop.permute.xlu1 %1394  ;;  %v1674_v58 = vsel %vm749_vm15, %v1673_v52, %v1644_v41 }
 0x2d2   : > { %v1441_v43 = vsel %vm753_vm10, %v1440_v5, %v1395_v61 }
 0x2d4   : > { %v1648_v57 = vpop.permute.xlu0 %1647 }
 0x2d5   : > { %v1399_v3 = vpop.permute.xlu1 %1398  ;;  %v1675_v16 = vsel %vm751_vm0, %v1674_v58, %v1648_v57 }
 0x2d6   : > { %v1442_v30 = vsel %vm755_vm12, %v1441_v43, %v1399_v3 }
 0x2d8   : > { %v1652_v51 = vpop.permute.xlu0 %1651 }
 0x2d9   : > { %v1403_v13 = vpop.permute.xlu1 %1402  ;;  %v1676_v49 = vsel %vm753_vm10, %v1675_v16, %v1652_v51 }
 0x2da   : > { %v1443_v32 = vsel %vm757_vm13, %v1442_v30, %v1403_v13 }
 0x2db   : > { %v1444_v11 = vsel %vm759_vm7, %v1443_v32, %v1407_v62 }
 0x2dc   : > { %v1656_v10 = vpop.permute.xlu0 %1655  ;;  %v2378_v19 = vrot.slane %v1444_v11, 5 }
 0x2dd   : > { %v1677_v63 = vsel %vm755_vm12, %v1676_v49, %v1656_v10  ;;  %v1660_v24 = vpop.permute.xlu1 %1659 }
 0x2de   : > { %v2413_v21 = vsel %vm2412_vm14, %v2410_v1, %v2378_v19  ;;  %v1678_v27 = vsel %vm757_vm13, %v1677_v63, %v1660_v24  ;;  %vm2418_vm14 = vcmask 1044480  }
 0x2e0   : > { %v1631_v15 = vpop.permute.xlu0 %1630 }
 0x2e1   : > { %v1664_v42 = vpop.permute.xlu1 %1663 }
 0x2e2   : > { %v1679_v36 = vsel %vm759_vm7, %v1678_v27, %v1664_v42 }
 0x2e3   : > { %v2385_v31 = vrot.slane %v1679_v36, 4 }
 0x2e4   : > { %v1635_v44 = vpop.permute.xlu0 %1634 }
 0x2e5   : > { %v2417_v53 = vsel %vm2415_vm9, %v2414_v12, %v2385_v31  ;;  %v1611_v40 = vpop.permute.xlu1 %1610 }
 0x2e6   : > { %v1666_v1 = vsel %vm747_vm2, %v5423_v33, %v1611_v40 }
 0x2e8   : > { %v1868_v50 = vpop.permute.xlu0 %1867 }
 0x2e9   : > { %v1901_v22 = vsel %vm747_vm2, %v5427_v34, %v1868_v50  ;;  %v1615_v23 = vpop.permute.xlu1 %1614 }
 0x2ea   : > { %v1667_v14 = vsel %vm749_vm15, %v1666_v1, %v1615_v23 }
 0x2ec   : > { %v1872_v45 = vpop.permute.xlu0 %1871 }
 0x2ed   : > { %v1902_v62 = vsel %vm749_vm15, %v1901_v22, %v1872_v45  ;;  %v1619_v60 = vpop.permute.xlu1 %1618 }
 0x2ee   : > { %v1668_v54 = vsel %vm751_vm0, %v1667_v14, %v1619_v60 }
 0x2f0   : > { %v1876_v4 = vpop.permute.xlu0 %1875 }
 0x2f1   : > { %v1903_v12 = vsel %vm751_vm0, %v1902_v62, %v1876_v4  ;;  %v1623_v41 = vpop.permute.xlu1 %1622 }
 0x2f2   : > { %v1669_v61 = vsel %vm753_vm10, %v1668_v54, %v1623_v41 }
 0x2f4   : > { %v1880_v57 = vpop.permute.xlu0 %1879 }
 0x2f5   : > { %v1627_v34 = vpop.permute.xlu1 %1626  ;;  %v1904_v5 = vsel %vm753_vm10, %v1903_v12, %v1880_v57 }
 0x2f6   : > { %v1670_v18 = vsel %vm755_vm12, %v1669_v61, %v1627_v34 }
 0x2f7   : > { %v1671_v3 = vsel %vm757_vm13, %v1670_v18, %v1631_v15 }
 0x2f8   : > { %v1855_v33 = vpop.permute.xlu0 %1854  ;;  %v1672_v6 = vsel %vm759_vm7, %v1671_v3, %v1635_v44 }
 0x2f9   : > { %v2384_v51 = vrot.slane %v1672_v6, 4  ;;  %v1884_v52 = vpop.permute.xlu1 %1883 }
 0x2fa   : > { %v1905_v43 = vsel %vm755_vm12, %v1904_v5, %v1884_v52 }
 0x2fb   : > { %v2416_v58 = vsel %vm2415_vm9, %v2413_v21, %v2384_v51  ;;  %vm2421_vm9 = vcmask 1045504  }
 0x2fc   : > { %v1859_v30 = vpop.permute.xlu0 %1858 }
 0x2fd   : > { %v1888_v13 = vpop.permute.xlu1 %1887 }
 0x2fe   : > { %v1906_v16 = vsel %vm757_vm13, %v1905_v43, %v1888_v13 }
 0x300   : > { %v1863_v32 = vpop.permute.xlu0 %1862 }
 0x301   : > { %v1892_v49 = vpop.permute.xlu1 %1891 }
 0x302   : > { %v1907_v11 = vsel %vm759_vm7, %v1906_v16, %v1892_v49 }
 0x303   : > { %v2391_v10 = vrot.slane %v1907_v11, 3 }
 0x304   : > { %v2096_v19 = vpop.permute.xlu0 %2095 }
 0x305   : > { %v2420_v63 = vsel %vm2418_vm14, %v2417_v53, %v2391_v10  ;;  %v1839_v24 = vpop.permute.xlu1 %1838  ;;  %v2129_v4 = vsel %vm747_vm2, %v5433_v47, %v2096_v19 }
 0x306   : > { %v1894_v21 = vsel %vm747_vm2, %v5429_v35, %v1839_v24 }
 0x308   : > { %v2100_v15 = vpop.permute.xlu0 %2099 }
 0x309   : > { %v1843_v27 = vpop.permute.xlu1 %1842  ;;  %v2130_v41 = vsel %vm749_vm15, %v2129_v4, %v2100_v15 }
 0x30a   : > { %v1895_v44 = vsel %vm749_vm15, %v1894_v21, %v1843_v27 }
 0x30c   : > { %v2104_v42 = vpop.permute.xlu0 %2103 }
 0x30d   : > { %v1847_v36 = vpop.permute.xlu1 %1846  ;;  %v2131_v57 = vsel %vm751_vm0, %v2130_v41, %v2104_v42 }
 0x30e   : > { %v1896_v40 = vsel %vm751_vm0, %v1895_v44, %v1847_v36 }
 0x310   : > { %v2079_v31 = vpop.permute.xlu0 %2078 }
 0x311   : > { %v1851_v50 = vpop.permute.xlu1 %1850 }
 0x312   : > { %v1897_v22 = vsel %vm753_vm10, %v1896_v40, %v1851_v50 }
 0x313   : > { %v1898_v23 = vsel %vm755_vm12, %v1897_v22, %v1855_v33 }
 0x314   : > { %v2083_v45 = vpop.permute.xlu0 %2082  ;;  %v1899_v53 = vsel %vm757_vm13, %v1898_v23, %v1859_v30 }
 0x315   : > { %v1900_v1 = vsel %vm759_vm7, %v1899_v53, %v1863_v32  ;;  %v2108_v62 = vpop.permute.xlu1 %2107 }
 0x316   : > { %v2390_v14 = vrot.slane %v1900_v1, 3  ;;  %v2132_v34 = vsel %vm753_vm10, %v2131_v57, %v2108_v62 }
 0x318   : > { %v2087_v60 = vpop.permute.xlu0 %2086  ;;  %v2419_v35 = vsel %vm2418_vm14, %v2416_v58, %v2390_v14 }
 0x319   : > { %v2112_v54 = vpop.permute.xlu1 %2111 }
 0x31a   : > { %v2133_v18 = vsel %vm755_vm12, %v2132_v34, %v2112_v54 }
 0x31c   : > { %v2091_v12 = vpop.permute.xlu0 %2090 }
 0x31d   : > { %v2116_v61 = vpop.permute.xlu1 %2115 }
 0x31e   : > { %v2134_v3 = vsel %vm757_vm13, %v2133_v18, %v2116_v61 }
 0x320   : > { %v2324_v6 = vpop.permute.xlu0 %2323 }
 0x321   : > { %v2120_v33 = vpop.permute.xlu1 %2119 }
 0x322   : > { %v2135_v5 = vsel %vm759_vm7, %v2134_v3, %v2120_v33 }
 0x323   : > { %v2397_v51 = vrot.slane %v2135_v5, 2 }
 0x324   : > { %v2328_v43 = vpop.permute.xlu0 %2327 }
 0x325   : > { %v2423_v47 = vsel %vm2421_vm9, %v2420_v63, %v2397_v51  ;;  %v2067_v52 = vpop.permute.xlu1 %2066 }
 0x326   : > { %v2122_v30 = vsel %vm747_vm2, %v5435_v39, %v2067_v52 }
 0x328   : > { %v2303_v32 = vpop.permute.xlu0 %2302 }
 0x329   : > { %v2071_v58 = vpop.permute.xlu1 %2070 }
 0x32a   : > { %v2123_v13 = vsel %vm749_vm15, %v2122_v30, %v2071_v58 }
 0x32c   : > { %v2307_v27 = vpop.permute.xlu0 %2306 }
 0x32d   : > { %v2075_v16 = vpop.permute.xlu1 %2074 }
 0x32e   : > { %v2124_v49 = vsel %vm751_vm0, %v2123_v13, %v2075_v16 }
 0x32f   : > { %v2125_v11 = vsel %vm753_vm10, %v2124_v49, %v2079_v31 }
 0x330   : > { %v2126_v10 = vsel %vm755_vm12, %v2125_v11, %v2083_v45  ;;  %v2311_v21 = vpop.permute.xlu0 %2310  ;;  %v2357_v45 = vsel %vm747_vm2, %v5439_v25, %v2324_v6 }
 0x331   : > { %v2127_v19 = vsel %vm757_vm13, %v2126_v10, %v2087_v60  ;;  %v2332_v24 = vpop.permute.xlu1 %2331  ;;  %v2358_v62 = vsel %vm749_vm15, %v2357_v45, %v2328_v43 }
 0x332   : > { %v2128_v63 = vsel %vm759_vm7, %v2127_v19, %v2091_v12  ;;  %v2359_v54 = vsel %vm751_vm0, %v2358_v62, %v2332_v24 }
 0x333   : > { %v2396_v15 = vrot.slane %v2128_v63, 2 }
 0x334   : > { %v2315_v40 = vpop.permute.xlu0 %2314 }
 0x335   : > { %v2336_v42 = vpop.permute.xlu1 %2335  ;;  %v2422_v39 = vsel %vm2421_vm9, %v2419_v35, %v2396_v15 }
 0x336   : > { %v2360_v61 = vsel %vm753_vm10, %v2359_v54, %v2336_v42 }
 0x338   : > { %v2319_v4 = vpop.permute.xlu0 %2318 }
 0x339   : > { %v2340_v36 = vpop.permute.xlu1 %2339 }
 0x33a   : > { %v2361_v18 = vsel %vm755_vm12, %v2360_v61, %v2340_v36 }
 0x33d   : > { %v2295_v44 = vpop.permute.xlu1 %2294 }
 0x33e   : > { %v2350_v50 = vsel %vm747_vm2, %v5442_v0, %v2295_v44 }
 0x341   : > { %v2299_v31 = vpop.permute.xlu1 %2298 }
 0x342   : > { %v2351_v22 = vsel %vm749_vm15, %v2350_v50, %v2299_v31  ;;  %vm2424_vm15 = vcmask 1046528  }
 0x343   : > { %v2352_v23 = vsel %vm751_vm0, %v2351_v22, %v2303_v32  ;;  %v3953_v32 = vld [vmem:[%s6246_s11] sm:$0xf] }
 0x344   : > { %v2353_v53 = vsel %vm753_vm10, %v2352_v23, %v2307_v27 }
 0x345   : > { %v3585_v1 = vpop.f32.mrb[20].mxu1  ;;  %v2354_v14 = vsel %vm755_vm12, %v2353_v53, %v2311_v21  ;;  %v2344_v60 = vpop.permute.xlu1 %2343 }
 0x346   : > { %v5963_v35 = vadd.f32 %v3585_v1, %v5687_v56  ;;  %v3587_v0 = vpop.f32.mrb[21].mxu1  ;;  %v2355_v12 = vsel %vm757_vm13, %v2354_v14, %v2315_v40  ;;  %v2362_v6 = vsel %vm757_vm13, %v2361_v18, %v2344_v60 }
 0x347   : > { %v5968_v41 = vadd.f32 %v3587_v0, %v5687_v56  ;;  %v3589_v25 = vpop.f32.mrb[22].mxu1  ;;  %v2356_v57 = vsel %vm759_vm7, %v2355_v12, %v2319_v4 }
 0x348   : > { %v3590_v34 = vpop.f32.mrb[23].mxu1  ;;  %v2402_v3 = vrot.slane %v2356_v57, 1 }
 0x349   : > { %v4693_v33 = vpack.c.bf16 %v5968_v41, %v5963_v35  ;;  %v2348_v5 = vpop.permute.xlu1 %2347 }
 0x34a   : > { %v2363_v56 = vsel %vm759_vm7, %v2362_v6, %v2348_v5  ;;  %v5977_v51 = vsel %vm2424_vm15, %v2422_v39, %v2402_v3 }
 0x34b   : > { %3764 = vst [vmem:[#allocation2 + $0x40] sm:$0xff] %v4693_v33  ;;  %v2403_v52 = vrot.slane %v2363_v56, 1  ;;  %v4906_v30 = vpack.c.bf16 %v5977_v51, %v5963_v35 }
 0x34d   : > { %v5979_v43 = vsel %vm2424_vm15, %v2423_v47, %v2403_v52  ;;  %v6046_v47 = vld.sshfl [vmem:[%s6245_s10] sm:$0x33 pattern:$0x76325410] }
 0x34e   : > { %v4694_v58 = vpack.c.bf16 %v5979_v43, %v5977_v51  ;;  %3796 = vrot.lane.b32.xlu1 %v5979_v43, %s4936_s20  ;;  %3615 = vrot.lane.b32.xlu0 %v5979_v43, %s4933_s26  ;;  %v4907_v13 = vpack.c.bf16 %v5979_v43, %v5968_v41  ;;  %v3967_v16 = vcombine.high %v6046_v47, %v6046_v47 }
 0x350   : > { %3773 = vst [vmem:[#allocation2 + $0x48] sm:$0xff] %v4694_v58  ;;  %4625 = vmatprep.mubr.msk.bf16.mxu0 %vm747_vm2, %v3967_v16 }
 0x352   : > { %3656 = vrot.lane.b32.xlu0 %v5979_v43, %s4932_s25  ;;  %3619 = vrot.lane.b32.xlu1 %v5977_v51, %s4933_s26 }
 0x356   : > { %3696 = vrot.lane.b32.xlu0 %v5979_v43, %s4934_s18  ;;  %3659 = vrot.lane.b32.xlu1 %v5977_v51, %s4932_s25 }
 0x35a   : > { %3736 = vrot.lane.b32.xlu0 %v5979_v43, %s4935_s19  ;;  %3699 = vrot.lane.b32.xlu1 %v5977_v51, %s4934_s18 }
 0x35e   : > { %3794 = vrot.lane.b32.xlu0 %v5977_v51, %s4936_s20  ;;  %3739 = vrot.lane.b32.xlu1 %v5977_v51, %s4935_s19 }
 0x362   : > { %3774 = vrot.lane.b32.xlu0 %v5963_v35, %s4936_s20  ;;  %3597 = vrot.lane.b32.xlu1 %v5963_v35, %s4933_s26 }
 0x366   : > { %3814 = vrot.lane.b32.xlu0 %v5963_v35, %s4937_s21  ;;  %3639 = vrot.lane.b32.xlu1 %v5963_v35, %s4932_s25 }
 0x36a   : > { %3593 = vrot.lane.b32.xlu0 %v5968_v41, %s4933_s26  ;;  %3679 = vrot.lane.b32.xlu1 %v5963_v35, %s4934_s18 }
 0x36e   : > { %3636 = vrot.lane.b32.xlu0 %v5968_v41, %s4932_s25  ;;  %3719 = vrot.lane.b32.xlu1 %v5963_v35, %s4935_s19 }
 0x372   : > { %3676 = vrot.lane.b32.xlu0 %v5968_v41, %s4934_s18  ;;  %3836 = vrot.lane.b32.xlu1 %v5979_v43, %s4937_s21 }
 0x376   : > { %3716 = vrot.lane.b32.xlu0 %v5968_v41, %s4935_s19  ;;  %3876 = vrot.lane.b32.xlu1 %v5979_v43, %s4938_s22 }
 0x37a   : > { %3834 = vrot.lane.b32.xlu0 %v5977_v51, %s4937_s21  ;;  %3776 = vrot.lane.b32.xlu1 %v5968_v41, %s4936_s20 }
 0x37e   : > { %3854 = vrot.lane.b32.xlu0 %v5963_v35, %s4938_s22  ;;  %3816 = vrot.lane.b32.xlu1 %v5968_v41, %s4937_s21 }
 0x382   : > { %3874 = vrot.lane.b32.xlu0 %v5977_v51, %s4938_s22  ;;  %3856 = vrot.lane.b32.xlu1 %v5968_v41, %s4938_s22 }
 0x386   : > { %3894 = vrot.lane.b32.xlu0 %v5963_v35, %s4939_s23  ;;  %3896 = vrot.lane.b32.xlu1 %v5968_v41, %s4939_s23 }
 0x38a   : > { %3914 = vrot.lane.b32.xlu0 %v5977_v51, %s4939_s23  ;;  %3916 = vrot.lane.b32.xlu1 %v5979_v43, %s4939_s23  ;;  %v6163_v51 = vld [vmem:[%s6238_s3 + $0x18] ss:$0 sm:$0xff] }
 0x38e   : > { %3956 = vperm.xlu0 %4862, %v3953_v32  }
 0x3c0   : > { %v3797_v49 = vpop.permute.xlu1 %3796  ;;  %v3616_v11 = vpop.permute.xlu0 %3615 }
 0x3c4   : > { %v3620_v10 = vpop.permute.xlu1 %3619  ;;  %v3657_v19 = vpop.permute.xlu0 %3656 }
 0x3c5   : > { %v3621_v24 = vsel %vm2434_vm1, %v3620_v10, %v3616_v11  ;;  %v3624_v63 = vsel %vm2434_vm1, %v3616_v11, %v3620_v10 }
 0x3c6   : > { %v3625_v15 = vmul.f32 %v3624_v63, %v5195_v28  ;;  %v3626_v27 = vmul.f32 %v3621_v24, %v5198_v29 }
 0x3c8   : > { %v4686_v42 = vpack.c.bf16 %v3626_v27, %v3625_v15  ;;  %v3660_v39 = vpop.permute.xlu1 %3659  ;;  %v3697_v36 = vpop.permute.xlu0 %3696 }
 0x3c9   : > { %v3661_v21 = vsel %vm747_vm2, %v3660_v39, %v3657_v19  ;;  %v3664_v44 = vsel %vm747_vm2, %v3657_v19, %v3660_v39 }
 0x3ca   : > { %3635 = vst [vmem:[#allocation2 + $0x8] sm:$0xff] %v4686_v42  ;;  %v6069_v40 = vmul.f32 %v3664_v44, %v5206_v37  ;;  %v3666_v50 = vmul.f32 %v3661_v21, %v5209_v38 }
 0x3cc   : > { %v4688_v31 = vpack.c.bf16 %v3666_v50, %v6069_v40  ;;  %v3700_v22 = vpop.permute.xlu1 %3699  ;;  %v3737_v23 = vpop.permute.xlu0 %3736 }
 0x3cd   : > { %v3701_v45 = vsel %vm2535_vm3, %v3700_v22, %v3697_v36  ;;  %v3704_v53 = vsel %vm2535_vm3, %v3697_v36, %v3700_v22 }
 0x3ce   : > { %3675 = vst [vmem:[#allocation2 + $0x18] sm:$0xff] %v4688_v31  ;;  %v6076_v1 = vmul.f32 %v3704_v53, %v5224_v55  ;;  %v6079_v62 = vmul.f32 %v3701_v45, %v5229_v59 }
 0x3d0   : > { %v4690_v14 = vpack.c.bf16 %v6079_v62, %v6076_v1  ;;  %v3740_v60 = vpop.permute.xlu1 %3739  ;;  %v3795_v0 = vpop.permute.xlu0 %3794 }
 0x3d1   : > { %v3741_v54 = vsel %vm2585_vm4, %v3740_v60, %v3737_v23  ;;  %v3744_v4 = vsel %vm2585_vm4, %v3737_v23, %v3740_v60  ;;  %v3798_v12 = vsel %vm2655_vm5, %v3795_v0, %v3797_v49  ;;  %v3802_v25 = vsel %vm2655_vm5, %v3797_v49, %v3795_v0 }
 0x3d2   : > { %3715 = vst [vmem:[#allocation2 + $0x28] sm:$0xff] %v4690_v14  ;;  %v6088_v61 = vmul.f32 %v3744_v4, %v5245_v7  ;;  %v6091_v57 = vmul.f32 %v3741_v54, %v5248_v8  ;;  %v6094_v34 = vmul.f32 %v3798_v12, %v5270_v46  ;;  %v6097_v18 = vmul.f32 %v3802_v25, %v5273_v48 }
 0x3d4   : > { %v4692_v3 = vpack.c.bf16 %v6091_v57, %v6088_v61  ;;  %v4696_v33 = vpack.c.bf16 %v6097_v18, %v6094_v34  ;;  %v3775_v6 = vpop.permute.xlu0 %3774  ;;  %v3598_v5 = vpop.permute.xlu1 %3597 }
 0x3d6   : > { %3755 = vst [vmem:[#allocation2 + $0x38] sm:$0xff] %v4692_v3  ;;  %3813 = vst [vmem:[#allocation2 + $0x58] sm:$0xff] %v4696_v33 }
 0x3d8   : > { %v3815_v56 = vpop.permute.xlu0 %3814  ;;  %v3640_v52 = vpop.permute.xlu1 %3639 }
 0x3dc   : > { %v3594_v58 = vpop.permute.xlu0 %3593  ;;  %v3680_v16 = vpop.permute.xlu1 %3679 }
 0x3dd   : > { %v3599_v32 = vsel %vm2434_vm1, %v3598_v5, %v3594_v58  ;;  %v3602_v49 = vsel %vm2434_vm1, %v3594_v58, %v3598_v5 }
 0x3de   : > { %v3603_v11 = vmul.f32 %v3602_v49, %v5195_v28  ;;  %v3604_v10 = vmul.f32 %v3599_v32, %v5198_v29 }
 0x3e0   : > { %v4685_v19 = vpack.c.bf16 %v3604_v10, %v3603_v11  ;;  %v3637_v24 = vpop.permute.xlu0 %3636  ;;  %v3720_v63 = vpop.permute.xlu1 %3719  ;;  %v4908_v44 = vpack.c.bf16 %v3626_v27, %v3604_v10  ;;  %v4909_v31 = vpack.c.bf16 %v3625_v15, %v3603_v11 }
 0x3e1   : > { %v3641_v42 = vsel %vm747_vm2, %v3640_v52, %v3637_v24  ;;  %v3644_v39 = vsel %vm747_vm2, %v3637_v24, %v3640_v52 }
 0x3e2   : > { %3613 = vst [vmem:[#allocation2] sm:$0xff] %v4685_v19  ;;  %v3645_v36 = vmul.f32 %v3644_v39, %v5206_v37  ;;  %v3646_v21 = vmul.f32 %v3641_v42, %v5209_v38  ;;  %4062 = vmatprep.subr.bf16.mxu0 %v4908_v44 }
 0x3e3   : > { %4063 = vmatpush1.bf16.msra.mxu0 %v4909_v31 }
 0x3e4   : > { %v4687_v22 = vpack.c.bf16 %v3646_v21, %v3645_v36  ;;  %v3677_v23 = vpop.permute.xlu0 %3676  ;;  %v3837_v45 = vpop.permute.xlu1 %3836  ;;  %v4910_v54 = vpack.c.bf16 %v3666_v50, %v3646_v21  ;;  %v4911_v4 = vpack.c.bf16 %v6069_v40, %v3645_v36 }
 0x3e5   : > { %v3681_v53 = vsel %vm2535_vm3, %v3680_v16, %v3677_v23  ;;  %v3684_v14 = vsel %vm2535_vm3, %v3677_v23, %v3680_v16 }
 0x3e6   : > { %3655 = vst [vmem:[#allocation2 + $0x10] sm:$0xff] %v4687_v22  ;;  %v3685_v60 = vmul.f32 %v3684_v14, %v5224_v55  ;;  %v3686_v0 = vmul.f32 %v3681_v53, %v5229_v59  ;;  %4064 = vmatprep.subr.bf16.mxu0 %v4910_v54 }
 0x3e7   : > { %4065 = vmatpush1.bf16.msra.mxu0 %v4911_v4 }
 0x3e8   : > { %v4689_v12 = vpack.c.bf16 %v3686_v0, %v3685_v60  ;;  %v3717_v27 = vpop.permute.xlu0 %3716  ;;  %v3877_v15 = vpop.permute.xlu1 %3876  ;;  %v4912_v52 = vpack.c.bf16 %v6076_v1, %v3685_v60  ;;  %v4913_v50 = vpack.c.bf16 %v6079_v62, %v3686_v0 }
 0x3e9   : > { %v3721_v25 = vsel %vm2585_vm4, %v3720_v63, %v3717_v27  ;;  %v3724_v3 = vsel %vm2585_vm4, %v3717_v27, %v3720_v63 }
 0x3ea   : > { %3695 = vst [vmem:[#allocation2 + $0x20] sm:$0xff] %v4689_v12  ;;  %v3725_v33 = vmul.f32 %v3724_v3, %v5245_v7  ;;  %v3726_v5 = vmul.f32 %v3721_v25, %v5248_v8  ;;  %4066 = vmatprep.subr.bf16.mxu0 %v4913_v50  ;;  %v6157_v3 = vld [vmem:[%s6238_s3 + $0x10] ss:$0 sm:$0xff] }
 0x3eb   : > { %4067 = vmatpush1.bf16.msra.mxu0 %v4912_v52 }
 0x3ec   : > { %v4691_v58 = vpack.c.bf16 %v3726_v5, %v3725_v33  ;;  %v3835_v40 = vpop.permute.xlu0 %3834  ;;  %v3777_v16 = vpop.permute.xlu1 %3776  ;;  %v4914_v63 = vpack.c.bf16 %v6088_v61, %v3725_v33  ;;  %v4915_v42 = vpack.c.bf16 %v6091_v57, %v3726_v5 }
 0x3ed   : > { %v3838_v32 = vsel %vm2705_vm6, %v3835_v40, %v3837_v45  ;;  %v3842_v49 = vsel %vm2705_vm6, %v3837_v45, %v3835_v40  ;;  %v3778_v11 = vsel %vm2655_vm5, %v3775_v6, %v3777_v16  ;;  %v3782_v10 = vsel %vm2655_vm5, %v3777_v16, %v3775_v6 }
 0x3ee   : > { %3735 = vst [vmem:[#allocation2 + $0x30] sm:$0xff] %v4691_v58  ;;  %v3843_v19 = vmul.f32 %v3838_v32, %v5283_v2  ;;  %v3844_v1 = vmul.f32 %v3842_v49, %v5289_v9  ;;  %v3783_v62 = vmul.f32 %v3778_v11, %v5270_v46  ;;  %v3784_v24 = vmul.f32 %v3782_v10, %v5273_v48 }
 0x3ef   : > { %4068 = vmatprep.subr.bf16.mxu0 %v4915_v42 }
 0x3f0   : > { %v3855_v39 = vpop.permute.xlu0 %3854  ;;  %v3817_v36 = vpop.permute.xlu1 %3816  ;;  %4069 = vmatpush1.bf16.msra.mxu0 %v4914_v63  ;;  %v4916_v57 = vpack.c.bf16 %v6097_v18, %v3784_v24  ;;  %v4917_v12 = vpack.c.bf16 %v6094_v34, %v3783_v62 }
 0x3f1   : > { %v3818_v21 = vsel %vm2705_vm6, %v3815_v56, %v3817_v36  ;;  %v3822_v6 = vsel %vm2705_vm6, %v3817_v36, %v3815_v56  ;;  %4070 = vmatprep.subr.bf16.mxu0 %v4907_v13 }
 0x3f2   : > { %v3823_v44 = vmul.f32 %v3818_v21, %v5283_v2  ;;  %v3824_v31 = vmul.f32 %v3822_v6, %v5289_v9 }
 0x3f4   : > { %v4697_v22 = vpack.c.bf16 %v3824_v31, %v3823_v44  ;;  %v3875_v61 = vpop.permute.xlu0 %3874  ;;  %v3857_v23 = vpop.permute.xlu1 %3856  ;;  %4071 = vmatpush1.bf16.msra.mxu0 %v4906_v30  ;;  %v4918_v25 = vpack.c.bf16 %v3844_v1, %v3824_v31  ;;  %v4919_v5 = vpack.c.bf16 %v3843_v19, %v3823_v44 }
 0x3f5   : > { %v3878_v45 = vsel %vm759_vm7, %v3875_v61, %v3877_v15  ;;  %v3882_v53 = vsel %vm759_vm7, %v3877_v15, %v3875_v61  ;;  %v3858_v56 = vsel %vm759_vm7, %v3855_v39, %v3857_v23  ;;  %v3862_v14 = vsel %vm759_vm7, %v3857_v23, %v3855_v39  ;;  %4072 = vmatprep.subr.bf16.mxu0 %v4916_v57 }
 0x3f6   : > { %3833 = vst [vmem:[#allocation2 + $0x60] sm:$0xff] %v4697_v22  ;;  %v3883_v60 = vmul.f32 %v3878_v45, %v5294_v20  ;;  %v3884_v0 = vmul.f32 %v3882_v53, %v5301_v26  ;;  %v3863_v41 = vmul.f32 %v3858_v56, %v5294_v20  ;;  %v3864_v43 = vmul.f32 %v3862_v14, %v5301_v26  ;;  %v4294_v45 = vld [vmem:[%s6248_s13] sm:$0xf] }
 0x3f8   : > { %v4700_v13 = vpack.c.bf16 %v3884_v0, %v3883_v60  ;;  %v4699_v18 = vpack.c.bf16 %v3864_v43, %v3863_v41  ;;  %v3895_v54 = vpop.permute.xlu0 %3894  ;;  %v3897_v4 = vpop.permute.xlu1 %3896  ;;  %4073 = vmatpush1.bf16.msra.mxu0 %v4917_v12  ;;  %v4920_v58 = vpack.c.bf16 %v3884_v0, %v3864_v43  ;;  %v4921_v49 = vpack.c.bf16 %v3883_v60, %v3863_v41 }
 0x3f9   : > { %v3898_v27 = vsel %vm2804_vm8, %v3895_v54, %v3897_v4  ;;  %v3902_v15 = vsel %vm2804_vm8, %v3897_v4, %v3895_v54  ;;  %4074 = vmatprep.subr.bf16.mxu0 %v4918_v25 }
 0x3fa   : > { %3893 = vst [vmem:[#allocation2 + $0x78] sm:$0xff] %v4700_v13  ;;  %3873 = vst [vmem:[#allocation2 + $0x70] sm:$0xff] %v4699_v18  ;;  %v3903_v35 = vmul.f32 %v6157_v3, %v3898_v27  ;;  %v3904_v30 = vmul.f32 %v6163_v51, %v3902_v15 }
 0x3fc   : > { %v3915_v34 = vpop.permute.xlu0 %3914  ;;  %v3917_v33 = vpop.permute.xlu1 %3916  ;;  %4075 = vmatpush1.bf16.msra.mxu0 %v4919_v5 }
 0x3fd   : > { %v3918_v52 = vsel %vm2804_vm8, %v3915_v34, %v3917_v33  ;;  %v3922_v50 = vsel %vm2804_vm8, %v3917_v33, %v3915_v34  ;;  %4076 = vmatprep.subr.bf16.mxu0 %v4920_v58 }
 0x3fe   : > { %v3923_v40 = vmul.f32 %v6157_v3, %v3918_v52  ;;  %v3924_v16 = vmul.f32 %v6163_v51, %v3922_v50 }
 0x400   : > { %v4702_v32 = vpack.c.bf16 %v3924_v16, %v3923_v40  ;;  %4077 = vmatpush1.bf16.msra.mxu0 %v4921_v49  ;;  %v4922_v11 = vpack.c.bf16 %v3923_v40, %v3903_v35  ;;  %v4923_v10 = vpack.c.bf16 %v3924_v16, %v3904_v30 }
 0x402   : > { %3933 = vst [vmem:[#allocation2 + $0x88] sm:$0xff] %v4702_v32  ;;  %4078 = vmatprep.subr.bf16.mxu0 %v4923_v10 }
 0x404   : > { %4079 = vmatpush1.bf16.msra.mxu0 %v4922_v11 }
 0x407   : > { %4095 = vmatmul.mubr.bf16.vlgmr.msra.gmra.mrb[20].mxu0 %v6046_v47 }
 0x408   : > { %4367 = vmatprep.mubr.bf16.mxu0 %v4940_v17 }
 0x40d   : > { %v3957_v19 = vpop.permute.xlu0 %3956 }
 0x4da   : > { %v4096_v1 = vpop.f32.mrb[20].mxu0 }
 0x4db   : > { %v4097_v62 = vadd.f32 %v4096_v1, %v3957_v19  ;;  %v4098_v24 = vpop.f32.mrb[21].mxu0 }
 0x4dc   : > { %v4099_v63 = vadd.f32 %v4098_v24, %v3957_v19  ;;  %v4100_v42 = vpop.f32.mrb[22].mxu0 }
 0x4dd   : > { %v4105_v39 = vmul.f32 0.70710677, %v4097_v62  ;;  %v4101_v36 = vpop.f32.mrb[23].mxu0  ;;  %v4103_v31 = vmul.f32 0.5, %v4097_v62 }
 0x4de   : > { %v4106_v21 = vmul.f32 0.70710677, %v4099_v63  ;;  %v4104_v61 = vmul.f32 0.5, %v4099_v63 }
 0x4df   : > { %4900 = verf.f32 %v4105_v39 }
 0x4e0   : > { %4902 = verf.f32 %v4106_v21 }
 0x4e9   : > { %v4901_v6 = vpop.eup %4900 }
 0x4ea   : > { %v4903_v44 = vpop.eup %4902  ;;  %v4109_v22 = vadd.f32 1.0, %v4901_v6 }
 0x4eb   : > { %v4110_v23 = vadd.f32 1.0, %v4903_v44 }
 0x4ec   : > { %v4111_v47 = vmul.f32 %v4109_v22, %v4103_v31 }
 0x4ed   : > { %v4112_v57 = vmul.f32 %v4110_v23, %v4104_v61 }
 0x4ee   : > { %4206 = vrot.lane.b32.xlu1 %v4111_v47, %s4936_s20  ;;  %4138 = vrot.lane.b32.xlu0 %v4111_v47, %s4932_s25 }
 0x4ef   : > { %v4707_v17 = vpack.c.bf16 %v4112_v57, %v4111_v47 }
 0x4f1   : > { %4205 = vst [vmem:[#allocation2 + $0x10] sm:$0x33] %v4707_v17 }
 0x4f2   : > { %4247 = vrot.lane.b32.xlu1 %v4111_v47, %s4938_s22  ;;  %4179 = vrot.lane.b32.xlu0 %v4111_v47, %s4935_s19 }
 0x4f6   : > { %4135 = vrot.lane.b32.xlu1 %v4112_v57, %s4932_s25  ;;  %4118 = vrot.lane.b32.xlu0 %v4111_v47, %s4933_s26 }
 0x4fa   : > { %4176 = vrot.lane.b32.xlu1 %v4112_v57, %s4935_s19  ;;  %4159 = vrot.lane.b32.xlu0 %v4111_v47, %s4934_s18 }
 0x4fe   : > { %4114 = vrot.lane.b32.xlu1 %v4112_v57, %s4933_s26  ;;  %4208 = vrot.lane.b32.xlu0 %v4112_v57, %s4936_s20 }
 0x502   : > { %4156 = vrot.lane.b32.xlu1 %v4112_v57, %s4934_s18  ;;  %4249 = vrot.lane.b32.xlu0 %v4112_v57, %s4938_s22  ;;  %s507_s22 = scalar_lea.vmem %s6249_s14, %s5038_s17 }
 0x506   : > { %4227 = vrot.lane.b32.xlu1 %v4111_v47, %s4937_s21  ;;  %4229 = vrot.lane.b32.xlu0 %v4112_v57, %s4937_s21 }
 0x50a   : > { %4268 = vrot.lane.b32.xlu1 %v4111_v47, %s4939_s23  ;;  %4270 = vrot.lane.b32.xlu0 %v4112_v57, %s4939_s23 }
 0x50e   : > { %4297 = vperm.xlu1 %4863, %v4294_v45  }
 0x560   : > { %v4207_v53 = vpop.permute.xlu1 %4206  ;;  %v4139_v56 = vpop.permute.xlu0 %4138 }
 0x564   : > { %v4248_v14 = vpop.permute.xlu1 %4247  ;;  %v4180_v60 = vpop.permute.xlu0 %4179 }
 0x568   : > { %v4136_v0 = vpop.permute.xlu1 %4135  ;;  %v4119_v41 = vpop.permute.xlu0 %4118 }
 0x569   : > { %v4140_v43 = vsel %vm747_vm2, %v4139_v56, %v4136_v0  ;;  %v4143_v13 = vsel %vm747_vm2, %v4136_v0, %v4139_v56 }
 0x56a   : > { %v4144_v18 = vmul.f32 %v4143_v13, %v5206_v37  ;;  %v4145_v54 = vmul.f32 %v4140_v43, %v5209_v38 }
 0x56c   : > { %v4704_v4 = vpack.c.bf16 %v4145_v54, %v4144_v18  ;;  %v4177_v12 = vpop.permute.xlu1 %4176  ;;  %v4160_v27 = vpop.permute.xlu0 %4159 }
 0x56d   : > { %v4181_v15 = vsel %vm2585_vm4, %v4180_v60, %v4177_v12  ;;  %v4184_v25 = vsel %vm2585_vm4, %v4177_v12, %v4180_v60 }
 0x56e   : > { %v4153_v35 = vrot.slane %v4704_v4, 6  ;;  %v4185_v30 = vmul.f32 %v4184_v25, %v5245_v7  ;;  %v4186_v34 = vmul.f32 %v4181_v15, %v5248_v8 }
 0x570   : > { %4155 = vst [vmem:[#allocation2] sm:$0xcc] %v4153_v35  ;;  %v4706_v33 = vpack.c.bf16 %v4186_v34, %v4185_v30  ;;  %v4115_v5 = vpop.permute.xlu1 %4114  ;;  %v4209_v52 = vpop.permute.xlu0 %4208 }
 0x571   : > { %v4120_v37 = vsel %vm2434_vm1, %v4119_v41, %v4115_v5  ;;  %v4123_v38 = vsel %vm2434_vm1, %v4115_v5, %v4119_v41  ;;  %v4210_v50 = vsel %vm2655_vm5, %v4207_v53, %v4209_v52  ;;  %v4214_v58 = vsel %vm2655_vm5, %v4209_v52, %v4207_v53 }
 0x572   : > { %v4194_v40 = vrot.slane %v4706_v33, 6  ;;  %v4124_v16 = vmul.f32 %v4123_v38, %v5195_v28  ;;  %v4125_v32 = vmul.f32 %v4120_v37, %v5198_v29  ;;  %v4215_v7 = vmul.f32 %v4210_v50, %v5270_v46 }
 0x573   : > { %v4216_v8 = vmul.f32 %v4214_v58, %v5273_v48  ;;  %vm4325_vm1 = vcmask 293888  }
 0x574   : > { %4196 = vst [vmem:[#allocation2 + $0x8] sm:$0xcc] %v4194_v40  ;;  %v4703_v49 = vpack.c.bf16 %v4125_v32, %v4124_v16  ;;  %v4157_v11 = vpop.permute.xlu1 %4156  ;;  %v4250_v10 = vpop.permute.xlu0 %4249 }
 0x575   : > { %v4708_v19 = vpack.c.bf16 %v4216_v8, %v4215_v7  ;;  %v4161_v1 = vsel %vm2535_vm3, %v4160_v27, %v4157_v11  ;;  %v4164_v62 = vsel %vm2535_vm3, %v4157_v11, %v4160_v27  ;;  %v4251_v24 = vsel %vm759_vm7, %v4248_v14, %v4250_v10 }
 0x576   : > { %4134 = vst [vmem:[#allocation2] sm:$0x33] %v4703_v49  ;;  %v4165_v28 = vmul.f32 %v4164_v62, %v5224_v55  ;;  %v4166_v29 = vmul.f32 %v4161_v1, %v5229_v59  ;;  %v4255_v46 = vsel %vm759_vm7, %v4250_v10, %v4248_v14  ;;  %v4256_v48 = vmul.f32 %v4251_v24, %v5294_v20 }
 0x577   : > { %v4224_v63 = vrot.slane %v4708_v19, 6  ;;  %v4257_v42 = vmul.f32 %v4255_v46, %v5301_v26 }
 0x578   : > { %v4705_v39 = vpack.c.bf16 %v4166_v29, %v4165_v28  ;;  %v4228_v36 = vpop.permute.xlu1 %4227  ;;  %v4230_v21 = vpop.permute.xlu0 %4229 }
 0x579   : > { %4226 = vst [vmem:[#allocation2 + $0x10] sm:$0xcc] %v4224_v63  ;;  %v4710_v6 = vpack.c.bf16 %v4257_v42, %v4256_v48  ;;  %v4231_v44 = vsel %vm2705_vm6, %v4228_v36, %v4230_v21  ;;  %v4235_v31 = vsel %vm2705_vm6, %v4230_v21, %v4228_v36 }
 0x57a   : > { %4175 = vst [vmem:[#allocation2 + $0x8] sm:$0x33] %v4705_v39  ;;  %v4236_v55 = vmul.f32 %v4231_v44, %v5283_v2  ;;  %v4237_v59 = vmul.f32 %v4235_v31, %v5289_v9 }
 0x57b   : > { %v4265_v22 = vrot.slane %v4710_v6, 6 }
 0x57c   : > { %v4709_v61 = vpack.c.bf16 %v4237_v59, %v4236_v55  ;;  %v4269_v20 = vpop.permute.xlu1 %4268  ;;  %v4271_v23 = vpop.permute.xlu0 %4270 }
 0x57d   : > { %4267 = vst [vmem:[#allocation2 + $0x18] sm:$0xcc] %v4265_v22  ;;  %v4272_v26 = vsel %vm2804_vm8, %v4269_v20, %v4271_v23  ;;  %v4276_v47 = vsel %vm2804_vm8, %v4271_v23, %v4269_v20 }
 0x57e   : > { %4246 = vst [vmem:[#allocation2 + $0x18] sm:$0x33] %v4709_v61  ;;  %v4277_v57 = vmul.f32 %v6157_v3, %v4272_v26  ;;  %v4278_v17 = vmul.f32 %v6163_v51, %v4276_v47  ;;  %v4288_v51 = vld [vmem:[%s6247_s12] sm:$0x3] }
 0x580   : > { %v4711_v45 = vpack.c.bf16 %v4278_v17, %v4277_v57 }
 0x581   : > { %v4892_v53 = vld [vmem:[#allocation2] ss:$8 sps:$4 sm:$0xff]   ;;  %v4894_v56 = vld [vmem:[#allocation2 + $0x4] ss:$8 sps:$4 sm:$0xff]  }
 0x582   : > { %4287 = vst [vmem:[#allocation2 + $0x20] sm:$0x33] %v4711_v45  ;;  %4335 = vmatprep.subr.bf16.mxu0 %v4894_v56 }
 0x583   : > { %4336 = vmatpush1.bf16.msra.mxu0 %v4892_v53 }
 0x585   : > { %v4895_v2 = vld [vmem:[#allocation2 + $0x10] ss:$8 sps:$4 sm:$0xff]   ;;  %v4897_v9 = vld [vmem:[#allocation2 + $0x14] ss:$8 sps:$4 sm:$0xff]  }
 0x586   : > { %4337 = vmatprep.subr.bf16.mxu0 %v4897_v9 }
 0x587   : > { %4338 = vmatpush1.bf16.msra.mxu0 %v4895_v2 }
 0x589   : > { %v4293_v14 = vld [vmem:[#allocation2 + $0x20] sm:$0x33] }
 0x58a   : > { %v4640_v60 = vcombine.high %v4293_v14, %v4293_v14  ;;  %v4639_v0 = vcombine.low %v4293_v14, %v4293_v14 }
 0x58c   : > { %4641 = vmatprep.subr.msk.bf16.mxu0 %vm2409_vm11, %v4640_v60  ;;  %v4330_v3 = vsel %vm2409_vm11, %v4639_v0, 0 }
 0x58d   : > { %4340 = vmatpush1.bf16.msra.mxu0 %v4330_v3  ;;  %v4298_v41 = vpop.permute.xlu1 %4297 }
 0x590   : > { %4642 = vmatmul.mubr.msk.bf16.vlgmr.msra.gmra.mrb[24].mxu0 %vm4325_vm1, %v4288_v51 }
 0x663   : > { %v4369_v43 = vpop.f32.mrb[24].mxu0 }
 0x664   : > { %v4370_v13 = vadd.f32 %v4369_v43, %v4298_v41  ;;  %v4371_v18 = vpop.f32.mrb[25].mxu0 }
 0x665   : > { %v4372_v54 = vadd.f32 %v4371_v18, %v4298_v41  ;;  %v4373_v4 = vpop.f32.mrb[26].mxu0 }
 0x666   : > { %v4374_v12 = vpop.f32.mrb[27].mxu0 }
 0x667   : > { %v4378_v27 = vcombine.low %v4370_v13, %v4372_v54 }
 0x669   : > { %4380 = vst [vmem:[%s507_s22] sm:$0xff] %v4378_v27 }
 0x66a PF: > { %s24_s29 = sadd.s32 1, %s4930_s29  }
 0x66b   : > { %p21_p4 = scmp.ge.s32.totalorder %s24_s29, 4  }
 0x66d   :  { %23 = sbr.rel (!%p21_p4) target bundleno = 1 (0x1), region = 112 }

</bundles_post_ra>
